<compile_context>
chip_gen: v5e
topology: v5e:2x2
jax: 0.10.0
libtpu: 0.0.40
codegen_flags: <defaults>
</compile_context>

<pallas_src>
import functools

import jax
import jax.numpy as jnp
from jax.experimental import pallas as pl
from jax.experimental.pallas import tpu as pltpu

H = 128               # stand-in for the module's hidden_size = 768 (lane-aligned, small)
NUM_CLASSES = 23
LOGITS_PAD = 128      # lane-dense logits tile; real classes are [:, :NUM_CLASSES]
LN_EPS = 1e-5


def _round_up(x, m):
    return -(-x // m) * m


def _vmem_limit_bytes():
    """Per-generation VMEM limit: ~3/4 of physical (v5e/v6e 128 MiB -> 96 MiB,
    v7x 64 MiB -> 48 MiB), capped at 100 MiB."""
    try:
        phys = getattr(pltpu.get_tpu_info(), "vmem_capacity_bytes", None)
    except Exception:
        phys = None
    if not phys:
        phys = 64 * 1024 * 1024        # conservative: v7x physical VMEM per core
    return int(min(100 * 1024 * 1024, (phys * 3) // 4))


def _choose_block_b(batch, seq, weight_bytes, vmem_limit):
    """Largest batch block that fits the VMEM budget while keeping ~8 grid steps."""
    # Streamed bytes per batch row (double-buffered by the Pallas pipeline):
    # 3 bf16 (L,H) activations + bf16 (2H,) W_final + i32 (2,) pos + bf16 outputs.
    per_row = 2 * (3 * seq * H * 2 + 2 * H * 2 + 2 * 4 + (LOGITS_PAD + H) * 2)
    budget = max(vmem_limit - 2 * weight_bytes - (4 << 20), 1 << 20)
    vmem_max = max(16, (budget // per_row) // 16 * 16)
    desired = _round_up(max(1, -(-batch // 8)), 16)
    return int(min(1024, vmem_max, desired))


def _mmrec_kernel(with_summary, *refs):
    f32, bf16 = jnp.float32, jnp.bfloat16
    if with_summary:
        (pos_ref, text_ref, phr_ref, qwen_ref, wfinal_ref,
         wp_ref, bp_ref, wk_ref, bk_ref,
         w1_ref, b1_ref, w23_ref, b23_ref, w4_ref, b4_ref,
         wip_ref, bip_ref, wv_ref, bv_ref, waout_ref, baout_ref,
         lng_ref, lnb_ref, wop_ref, bop_ref,
         logits_ref, unified_ref, enhanced_ref) = refs
    else:
        (pos_ref, text_ref, phr_ref, qwen_ref, wfinal_ref,
         wp_ref, bp_ref, wk_ref, bk_ref,
         w1_ref, b1_ref, w23_ref, b23_ref, w4_ref, b4_ref,
         logits_ref, unified_ref) = refs

    ht = text_ref[...]        # (TB, L, H) bf16  BERT(token) last hidden state
    hp = phr_ref[...]         # (TB, L, H) bf16  BERT(token_phrase)
    hq = qwen_ref[...]        # (TB, L, H) bf16  BERT(token_qwen)
    TB, L, _ = ht.shape
    pos = pos_ref[...]        # (TB, 2) int32  [pos1 | pos2]

    def mm(x, w):
        return jnp.dot(x, w, preferred_element_type=f32)

    # --- entity pooling: masked sublane-sum on the VPU (no per-row MXU pushes).
    # Each sum has exactly one non-zero term, so it reproduces the row gather exactly.
    l_idx = jax.lax.broadcasted_iota(jnp.int32, (TB, L, H), 1)
    head_hidden = jnp.sum(jnp.where(l_idx == pos[:, 0:1, None], ht, 0),
                          axis=1, dtype=f32).astype(bf16)                    # (TB, H)
    tail_hidden = jnp.sum(jnp.where(l_idx == pos[:, 1:2, None], ht, 0),
                          axis=1, dtype=f32).astype(bf16)                    # (TB, H)

    # --- mean pooling with f32 accumulation (no standalone f32 activation copies) ---
    image_mean = jnp.mean(hp, axis=1, dtype=f32)   # image_repr pre phrase_encoder
    qwen_mean = jnp.mean(hq, axis=1, dtype=f32)    # llm_summary_repr
    text_mean = jnp.mean(ht, axis=1, dtype=f32)    # hidden_text1

    # --- phrase_encoder(cat([llm_summary_repr1, hidden_text1, image_repr])): one K=3H matmul ---
    phrase_in = jnp.concatenate([qwen_mean, text_mean, image_mean], axis=-1).astype(bf16)
    image_repr = mm(phrase_in, wp_ref[...]) + bp_ref[...]                    # (TB, H) f32

    # --- unified_space.knowledge_projector(cat([head, tail, image_repr, W_final])): one K=5H matmul ---
    know_in = jnp.concatenate(
        [head_hidden, tail_hidden, image_repr.astype(bf16), wfinal_ref[...]], axis=-1)
    unified = mm(know_in, wk_ref[...]) + bk_ref[...]                         # (TB, H) f32
    unified_ref[...] = unified.astype(unified_ref.dtype)

    # --- DLRMStylePredictor (Dropout == identity; w2@w3 pre-fused into w23/b23) ---
    h = jnp.maximum(mm(unified.astype(bf16), w1_ref[...]) + b1_ref[...], 0.0)
    h = jnp.maximum(mm(h.astype(bf16), w23_ref[...]) + b23_ref[...], 0.0)
    logits = mm(h.astype(bf16), w4_ref[...]) + b4_ref[...]                   # (TB, LOGITS_PAD) f32
    logits_ref[...] = logits.astype(logits_ref.dtype)

    if with_summary:
        # LLMSummaryProcessor: enhanced_entity_repr only feeds text_repr, which never
        # reaches MMREC.forward's return values; kept behind a flag purely for fidelity.
        proj_ent = mm(jnp.concatenate([head_hidden, tail_hidden], axis=-1),
                      wip_ref[...]) + bip_ref[...]
        # MultiheadAttention over a single unmasked key/value position: softmax == 1,
        # so attn_out == out_proj(v_proj(llm_summary_repr)).
        v = mm(qwen_mean.astype(bf16), wv_ref[...]) + bv_ref[...]
        attn_out = mm(v.astype(bf16), waout_ref[...]) + baout_ref[...]
        pre_ln = attn_out + proj_ent
        mu = jnp.mean(pre_ln, axis=-1, keepdims=True)
        var = jnp.mean((pre_ln - mu) ** 2, axis=-1, keepdims=True)
        normed = (pre_ln - mu) * jax.lax.rsqrt(var + LN_EPS)
        enhanced = normed * lng_ref[...] + lnb_ref[...]
        out = mm(enhanced.astype(bf16), wop_ref[...]) + bop_ref[...]
        enhanced_ref[...] = out.astype(enhanced_ref.dtype)


def init_params(key):
    """Deterministic init matching MMREC._init_weights: W ~ N(0, 0.02), b = 0.

    Weights use (in, out) layout. NOTE: when importing a real PyTorch checkpoint,
    every nn.Linear / MHA in_proj / out_proj weight must be transposed from
    PyTorch's (out, in) layout.
    """
    ks = jax.random.split(key, 10)

    def lin(k, din, dout):
        w = jax.random.normal(k, (din, dout), jnp.float32) * 0.02
        b = jnp.zeros((1, dout), jnp.float32)
        return w, b

    wp, bp = lin(ks[0], 3 * H, H)                 # phrase_encoder
    wip, bip = lin(ks[1], 2 * H, H)               # llm_summary_processor.input_projection
    wain, bain = lin(ks[2], H, 3 * H)             # attention in_proj (q|k|v)
    waout, baout = lin(ks[3], H, H)               # attention out_proj
    lng = jnp.ones((1, H), jnp.float32)           # LayerNorm gamma
    lnb = jnp.zeros((1, H), jnp.float32)          # LayerNorm beta
    wop, bop = lin(ks[4], H, H)                   # output_projection
    wk, bk = lin(ks[5], 5 * H, H)                 # unified_space.knowledge_projector
    hid = H // 2
    w1, b1 = lin(ks[6], H, hid * 2)               # upstream_mlp Linear(H, hid*2)
    w2, b2 = lin(ks[7], hid * 2, hid)             # upstream_mlp Linear(hid*2, hid)
    w3, b3 = lin(ks[8], hid, hid // 2)            # downstream_mlp Linear(hid, hid//2)
    w4, b4 = lin(ks[9], hid // 2, NUM_CLASSES)    # downstream_mlp Linear(hid//2, 23)
    # (unified_space.text_projector / .norm exist in __init__ but are unused in forward)
    return (wp, bp, wip, bip, wain, bain, waout, baout, lng, lnb,
            wop, bop, wk, bk, w1, b1, w2, b2, w3, b3, w4, b4)


def prepare_params(params):
    """One-time host-side preprocessing:
      * fuse the back-to-back linears w2@w3 (no nonlinearity between them),
      * pad the 23-class head to a lane-dense 128-wide output,
      * keep only the v-projection third of the attention in_proj,
      * cast matmul weights to bf16 (biases / LayerNorm params stay f32).
    """
    (wp, bp, wip, bip, wain, bain, waout, baout, lng, lnb,
     wop, bop, wk, bk, w1, b1, w2, b2, w3, b3, w4, b4) = params
    bf16 = jnp.bfloat16

    w23 = w2 @ w3                                 # (2*hid, hid//2)
    b23 = b2 @ w3 + b3
    w4p = jnp.zeros((w4.shape[0], LOGITS_PAD), jnp.float32).at[:, :NUM_CLASSES].set(w4)
    b4p = jnp.zeros((1, LOGITS_PAD), jnp.float32).at[:, :NUM_CLASSES].set(b4)
    wv = wain[:, 2 * H:3 * H]                     # q/k thirds are never used
    bv = bain[:, 2 * H:3 * H]

    base = (wp.astype(bf16), bp, wk.astype(bf16), bk,
            w1.astype(bf16), b1, w23.astype(bf16), b23,
            w4p.astype(bf16), b4p)
    summary = (wip.astype(bf16), bip, wv.astype(bf16), bv,
               waout.astype(bf16), baout, lng, lnb, wop.astype(bf16), bop)
    return {"base": base, "summary": summary}


def mmrec_forward(hidden_text, hidden_phrases, hidden_qwen, pos1, pos2, w_final,
                  prepared, *, compute_enhanced=False, block_b=None):
    B, L, Hh = hidden_text.shape
    assert Hh == H
    bf16 = jnp.bfloat16

    weights = list(prepared["base"])
    if compute_enhanced:
        weights += list(prepared["summary"])
    weight_bytes = sum(int(w.size) * w.dtype.itemsize for w in weights)

    vmem_limit = _vmem_limit_bytes()
    if block_b is None:
        block_b = _choose_block_b(B, L, weight_bytes, vmem_limit)
    grid_b = -(-B // block_b)
    Bp = grid_b * block_b
    pad = Bp - B

    def pad_batch(x):
        if pad == 0:
            return x
        return jnp.pad(x, ((0, pad),) + ((0, 0),) * (x.ndim - 1))

    text = pad_batch(hidden_text.astype(bf16))
    phr = pad_batch(hidden_phrases.astype(bf16))
    qwen = pad_batch(hidden_qwen.astype(bf16))
    wfin = pad_batch(w_final.astype(bf16))
    pos = pad_batch(jnp.concatenate([pos1.reshape(B, 1), pos2.reshape(B, 1)],
                                    axis=1).astype(jnp.int32))

    # bf16 outputs: the kernel is HBM-bandwidth-bound, so writeback bytes count 1:1.
    out_shape = [jax.ShapeDtypeStruct((Bp, LOGITS_PAD), bf16),   # lane-dense logits
                 jax.ShapeDtypeStruct((Bp, H), bf16)]            # unified_repr
    out_specs = [pl.BlockSpec((block_b, LOGITS_PAD), lambda b: (b, 0)),
                 pl.BlockSpec((block_b, H), lambda b: (b, 0))]
    if compute_enhanced:
        out_shape.append(jax.ShapeDtypeStruct((Bp, H), bf16))
        out_specs.append(pl.BlockSpec((block_b, H), lambda b: (b, 0)))

    kernel = functools.partial(_mmrec_kernel, compute_enhanced)
    act_spec = pl.BlockSpec((block_b, L, H), lambda b: (b, 0, 0))

    def run(single_buffer_weights):
        def wspec(w):
            zeros = (0,) * w.ndim
            idx = lambda b, _z=zeros: _z   # constant block -> weight stays VMEM-resident
            if single_buffer_weights and hasattr(pl, "Buffered"):
                # Weights never change across grid steps: single-buffer them so the
                # freed VMEM can go to larger activation blocks (matters on v7x 64 MiB).
                return pl.BlockSpec(w.shape, idx, pipeline_mode=pl.Buffered(1))
            return pl.BlockSpec(w.shape, idx)

        in_specs = [pl.BlockSpec((block_b, 2), lambda b: (b, 0)),      # [pos1 | pos2]
                    act_spec, act_spec, act_spec,                      # text / phrases / qwen
                    pl.BlockSpec((block_b, 2 * H), lambda b: (b, 0)),  # W_final
                    ] + [wspec(w) for w in weights]

        return pl.pallas_call(
            kernel,
            out_shape=tuple(out_shape),
            grid_spec=pltpu.PrefetchScalarGridSpec(
                num_scalar_prefetch=0,
                grid=(grid_b,),
                in_specs=in_specs,
                out_specs=tuple(out_specs)),
            compiler_params=pltpu.CompilerParams(
                dimension_semantics=("parallel",),   # shards batch blocks across TCs on v7x
                vmem_limit_bytes=vmem_limit),
        )(pos, text, phr, qwen, wfin, *weights)

    try:
        outs = run(single_buffer_weights=True)
    except Exception:
        # pl.Buffered(1) pipeline_mode not supported by this jax/Mosaic build:
        # fall back to the default double-buffered weight pipeline.
        outs = run(single_buffer_weights=False)

    logits = outs[0][:B, :NUM_CLASSES].astype(jnp.float32)
    unified = outs[1][:B].astype(jnp.float32)
    if compute_enhanced:
        return logits, unified, outs[2][:B].astype(jnp.float32)
    # MMREC.forward returns (logits, unified_repr)
    return logits, unified


def mmrec_reference(hidden_text, hidden_phrases, hidden_qwen, pos1, pos2, w_final, prepared):
    """Pure-JAX reference mirroring the kernel's bf16/f32 casting decisions."""
    f32, bf16 = jnp.float32, jnp.bfloat16
    wp, bp, wk, bk, w1, b1, w23, b23, w4, b4 = prepared["base"]
    ht = hidden_text.astype(bf16)
    hp = hidden_phrases.astype(bf16)
    hq = hidden_qwen.astype(bf16)
    wfin = w_final.astype(bf16)
    B, L, _ = ht.shape
    pos = jnp.concatenate([pos1.reshape(B, 1), pos2.reshape(B, 1)], axis=1).astype(jnp.int32)

    l_idx = jnp.arange(L, dtype=jnp.int32)[None, :, None]
    head = jnp.sum(jnp.where(l_idx == pos[:, 0:1, None], ht, 0), axis=1, dtype=f32)
    tail = jnp.sum(jnp.where(l_idx == pos[:, 1:2, None], ht, 0), axis=1, dtype=f32)
    qwen_mean = jnp.mean(hq, axis=1, dtype=f32)
    text_mean = jnp.mean(ht, axis=1, dtype=f32)
    image_mean = jnp.mean(hp, axis=1, dtype=f32)

    def mm(x, w):
        return jnp.dot(x.astype(bf16), w, preferred_element_type=f32)

    image_repr = mm(jnp.concatenate([qwen_mean, text_mean, image_mean], axis=-1), wp) + bp
    know_in = jnp.concatenate([head.astype(bf16), tail.astype(bf16),
                               image_repr.astype(bf16), wfin], axis=-1)
    unified = jnp.dot(know_in, wk, preferred_element_type=f32) + bk
    h = jnp.maximum(mm(unified, w1) + b1, 0.0)
    h = jnp.maximum(mm(h, w23) + b23, 0.0)
    logits = (mm(h, w4) + b4)[:, :NUM_CLASSES]
    return logits, unified


if __name__ == "__main__":
    B, L = 64, 8
    key = jax.random.PRNGKey(0)
    keys = jax.random.split(key, 7)

    hidden_text = jax.random.normal(keys[0], (B, L, H), jnp.float32)
    hidden_phrases = jax.random.normal(keys[1], (B, L, H), jnp.float32)
    hidden_qwen = jax.random.normal(keys[2], (B, L, H), jnp.float32)
    pos1 = jax.random.randint(keys[3], (B, 1), 0, L).astype(jnp.int32)
    pos2 = jax.random.randint(keys[4], (B, 1), 0, L).astype(jnp.int32)
    w_final = jax.random.normal(keys[5], (B, 2 * H), jnp.float32)   # reck_encoder output
    raw_params = init_params(keys[6])
    prepared = prepare_params(raw_params)

    # default path: only what MMREC.forward actually returns
    logits, unified = mmrec_forward(hidden_text, hidden_phrases, hidden_qwen,
                                    pos1, pos2, w_final, prepared)
    jax.block_until_ready((logits, unified))
    assert logits.shape == (B, NUM_CLASSES)
    assert unified.shape == (B, H)

    # correctness vs a pure-JAX reference (loose tolerance: bf16 weights/outputs)
    ref_logits, ref_unified = mmrec_reference(hidden_text, hidden_phrases, hidden_qwen,
                                              pos1, pos2, w_final, prepared)
    assert jnp.allclose(logits, ref_logits, rtol=2e-2, atol=2e-2)
    assert jnp.allclose(unified, ref_unified, rtol=2e-2, atol=2e-2)

    # fidelity path: LLMSummaryProcessor / enhanced_entity_repr gated behind a flag
    logits2, unified2, enhanced = mmrec_forward(hidden_text, hidden_phrases, hidden_qwen,
                                                pos1, pos2, w_final, prepared,
                                                compute_enhanced=True)
    jax.block_until_ready((logits2, unified2, enhanced))
    assert enhanced.shape == (B, H)

    print("KERNEL_OK")
</pallas_src>

<mosaic_0001>
module attributes {stable_mosaic.version = 11 : i64} {
  func.func @_mmrec_kernel(%arg0: i32, %arg1: memref<16x2xi32, #tpu.memory_space<vmem>>, %arg2: memref<16x8x128xbf16, #tpu.memory_space<vmem>>, %arg3: memref<16x8x128xbf16, #tpu.memory_space<vmem>>, %arg4: memref<16x8x128xbf16, #tpu.memory_space<vmem>>, %arg5: memref<16x256xbf16, #tpu.memory_space<vmem>>, %arg6: memref<384x128xbf16, #tpu.memory_space<vmem>>, %arg7: memref<1x128xf32, #tpu.memory_space<vmem>>, %arg8: memref<640x128xbf16, #tpu.memory_space<vmem>>, %arg9: memref<1x128xf32, #tpu.memory_space<vmem>>, %arg10: memref<128x128xbf16, #tpu.memory_space<vmem>>, %arg11: memref<1x128xf32, #tpu.memory_space<vmem>>, %arg12: memref<128x32xbf16, #tpu.memory_space<vmem>>, %arg13: memref<1x32xf32, #tpu.memory_space<vmem>>, %arg14: memref<32x128xbf16, #tpu.memory_space<vmem>>, %arg15: memref<1x128xf32, #tpu.memory_space<vmem>>, %arg16: memref<16x128xbf16, #tpu.memory_space<vmem>>, %arg17: memref<16x128xbf16, #tpu.memory_space<vmem>>) attributes {dimension_semantics = [#tpu.dimension_semantics<parallel>], iteration_bounds = array<i64: 4>, scalar_prefetch = 0 : i64, scratch_operands = 0 : i64, tpu.core_type = #tpu.core_type<tc>, window_params = [{transform_indices = @transform_0, window_bounds = array<i64: 16, 2>}, {transform_indices = @transform_1, window_bounds = array<i64: 16, 8, 128>}, {transform_indices = @transform_2, window_bounds = array<i64: 16, 8, 128>}, {transform_indices = @transform_3, window_bounds = array<i64: 16, 8, 128>}, {transform_indices = @transform_4, window_bounds = array<i64: 16, 256>}, {pipeline_mode = #tpu.pipeline_mode<synchronous>, transform_indices = @transform_5, window_bounds = array<i64: 384, 128>}, {pipeline_mode = #tpu.pipeline_mode<synchronous>, transform_indices = @transform_6, window_bounds = array<i64: 1, 128>}, {pipeline_mode = #tpu.pipeline_mode<synchronous>, transform_indices = @transform_7, window_bounds = array<i64: 640, 128>}, {pipeline_mode = #tpu.pipeline_mode<synchronous>, transform_indices = @transform_8, window_bounds = array<i64: 1, 128>}, {pipeline_mode = #tpu.pipeline_mode<synchronous>, transform_indices = @transform_9, window_bounds = array<i64: 128, 128>}, {pipeline_mode = #tpu.pipeline_mode<synchronous>, transform_indices = @transform_10, window_bounds = array<i64: 1, 128>}, {pipeline_mode = #tpu.pipeline_mode<synchronous>, transform_indices = @transform_11, window_bounds = array<i64: 128, 32>}, {pipeline_mode = #tpu.pipeline_mode<synchronous>, transform_indices = @transform_12, window_bounds = array<i64: 1, 32>}, {pipeline_mode = #tpu.pipeline_mode<synchronous>, transform_indices = @transform_13, window_bounds = array<i64: 32, 128>}, {pipeline_mode = #tpu.pipeline_mode<synchronous>, transform_indices = @transform_14, window_bounds = array<i64: 1, 128>}, {transform_indices = @transform_15, window_bounds = array<i64: 16, 128>}, {transform_indices = @transform_16, window_bounds = array<i64: 16, 128>}]} {
    %c0 = arith.constant 0 : index
    %c0_0 = arith.constant 0 : index
    %c0_1 = arith.constant 0 : index
    %0 = vector.load %arg2[%c0, %c0_0, %c0_1] : memref<16x8x128xbf16, #tpu.memory_space<vmem>>, vector<16x8x128xbf16>
    %c0_2 = arith.constant 0 : index
    %c0_3 = arith.constant 0 : index
    %c0_4 = arith.constant 0 : index
    %1 = vector.load %arg3[%c0_2, %c0_3, %c0_4] : memref<16x8x128xbf16, #tpu.memory_space<vmem>>, vector<16x8x128xbf16>
    %c0_5 = arith.constant 0 : index
    %c0_6 = arith.constant 0 : index
    %c0_7 = arith.constant 0 : index
    %2 = vector.load %arg4[%c0_5, %c0_6, %c0_7] : memref<16x8x128xbf16, #tpu.memory_space<vmem>>, vector<16x8x128xbf16>
    %c0_8 = arith.constant 0 : index
    %c0_9 = arith.constant 0 : index
    %3 = vector.load %arg1[%c0_8, %c0_9] : memref<16x2xi32, #tpu.memory_space<vmem>>, vector<16x2xi32>
    %4 = tpu.iota {dimensions = array<i32: 1>} : vector<16x8x128xi32>
    %5 = vector.extract_strided_slice %3 {offsets = [0, 0], sizes = [16, 1], strides = [1, 1]} : vector<16x2xi32> to vector<16x1xi32>
    %6 = vector.shape_cast %5 : vector<16x1xi32> to vector<16x1x1xi32>
    %7 = vector.broadcast %6 : vector<16x1x1xi32> to vector<16x8x128xi32>
    %8 = arith.cmpi eq, %4, %7 : vector<16x8x128xi32>
    %c0_i32 = arith.constant 0 : i32
    %9 = arith.sitofp %c0_i32 : i32 to bf16
    %10 = vector.broadcast %9 : bf16 to vector<16x8x128xbf16>
    %11 = arith.select %8, %0, %10 : vector<16x8x128xi1>, vector<16x8x128xbf16>
    %12 = arith.extf %11 : vector<16x8x128xbf16> to vector<16x8x128xf32>
    %cst = arith.constant dense<0.000000e+00> : vector<16x128xf32>
    %13 = vector.multi_reduction <add>, %12, %cst [1] : vector<16x8x128xf32> to vector<16x128xf32>
    %14 = arith.truncf %13 : vector<16x128xf32> to vector<16x128xbf16>
    %15 = vector.extract_strided_slice %3 {offsets = [0, 1], sizes = [16, 1], strides = [1, 1]} : vector<16x2xi32> to vector<16x1xi32>
    %16 = vector.shape_cast %15 : vector<16x1xi32> to vector<16x1x1xi32>
    %17 = vector.broadcast %16 : vector<16x1x1xi32> to vector<16x8x128xi32>
    %18 = arith.cmpi eq, %4, %17 : vector<16x8x128xi32>
    %c0_i32_10 = arith.constant 0 : i32
    %19 = arith.sitofp %c0_i32_10 : i32 to bf16
    %20 = vector.broadcast %19 : bf16 to vector<16x8x128xbf16>
    %21 = arith.select %18, %0, %20 : vector<16x8x128xi1>, vector<16x8x128xbf16>
    %22 = arith.extf %21 : vector<16x8x128xbf16> to vector<16x8x128xf32>
    %cst_11 = arith.constant dense<0.000000e+00> : vector<16x128xf32>
    %23 = vector.multi_reduction <add>, %22, %cst_11 [1] : vector<16x8x128xf32> to vector<16x128xf32>
    %24 = arith.truncf %23 : vector<16x128xf32> to vector<16x128xbf16>
    %25 = arith.extf %1 : vector<16x8x128xbf16> to vector<16x8x128xf32>
    %cst_12 = arith.constant dense<0.000000e+00> : vector<16x128xf32>
    %26 = vector.multi_reduction <add>, %25, %cst_12 [1] : vector<16x8x128xf32> to vector<16x128xf32>
    %cst_13 = arith.constant 8.000000e+00 : f32
    %27 = vector.broadcast %cst_13 : f32 to vector<16x128xf32>
    %28 = arith.divf %26, %27 : vector<16x128xf32>
    %29 = arith.extf %2 : vector<16x8x128xbf16> to vector<16x8x128xf32>
    %cst_14 = arith.constant dense<0.000000e+00> : vector<16x128xf32>
    %30 = vector.multi_reduction <add>, %29, %cst_14 [1] : vector<16x8x128xf32> to vector<16x128xf32>
    %cst_15 = arith.constant 8.000000e+00 : f32
    %31 = vector.broadcast %cst_15 : f32 to vector<16x128xf32>
    %32 = arith.divf %30, %31 : vector<16x128xf32>
    %33 = arith.extf %0 : vector<16x8x128xbf16> to vector<16x8x128xf32>
    %cst_16 = arith.constant dense<0.000000e+00> : vector<16x128xf32>
    %34 = vector.multi_reduction <add>, %33, %cst_16 [1] : vector<16x8x128xf32> to vector<16x128xf32>
    %cst_17 = arith.constant 8.000000e+00 : f32
    %35 = vector.broadcast %cst_17 : f32 to vector<16x128xf32>
    %36 = arith.divf %34, %35 : vector<16x128xf32>
    %37 = tpu.concatenate %32, %36, %28 in 1 : vector<16x128xf32>, vector<16x128xf32>, vector<16x128xf32> -> vector<16x384xf32>
    %38 = arith.truncf %37 : vector<16x384xf32> to vector<16x384xbf16>
    %c0_18 = arith.constant 0 : index
    %c0_19 = arith.constant 0 : index
    %39 = vector.load %arg6[%c0_18, %c0_19] : memref<384x128xbf16, #tpu.memory_space<vmem>>, vector<384x128xbf16>
    %cst_20 = arith.constant dense<0.000000e+00> : vector<16x128xf32>
    %40 = tpu.matmul %38, %39, %cst_20 {dimension_numbers = #tpu.dot_dimension_numbers<[1], [0], [0], [1], [0, 0, 1, 1], [], []>} : vector<16x384xbf16>, vector<384x128xbf16>, vector<16x128xf32> -> vector<16x128xf32>
    %c0_21 = arith.constant 0 : index
    %c0_22 = arith.constant 0 : index
    %41 = vector.load %arg7[%c0_21, %c0_22] : memref<1x128xf32, #tpu.memory_space<vmem>>, vector<1x128xf32>
    %42 = vector.broadcast %41 : vector<1x128xf32> to vector<16x128xf32>
    %43 = arith.addf %40, %42 : vector<16x128xf32>
    %44 = arith.truncf %43 : vector<16x128xf32> to vector<16x128xbf16>
    %c0_23 = arith.constant 0 : index
    %c0_24 = arith.constant 0 : index
    %45 = vector.load %arg5[%c0_23, %c0_24] : memref<16x256xbf16, #tpu.memory_space<vmem>>, vector<16x256xbf16>
    %46 = tpu.concatenate %14, %24, %44, %45 in 1 : vector<16x128xbf16>, vector<16x128xbf16>, vector<16x128xbf16>, vector<16x256xbf16> -> vector<16x640xbf16>
    %c0_25 = arith.constant 0 : index
    %c0_26 = arith.constant 0 : index
    %47 = vector.load %arg8[%c0_25, %c0_26] : memref<640x128xbf16, #tpu.memory_space<vmem>>, vector<640x128xbf16>
    %cst_27 = arith.constant dense<0.000000e+00> : vector<16x128xf32>
    %48 = tpu.matmul %46, %47, %cst_27 {dimension_numbers = #tpu.dot_dimension_numbers<[1], [0], [0], [1], [0, 0, 1, 1], [], []>} : vector<16x640xbf16>, vector<640x128xbf16>, vector<16x128xf32> -> vector<16x128xf32>
    %c0_28 = arith.constant 0 : index
    %c0_29 = arith.constant 0 : index
    %49 = vector.load %arg9[%c0_28, %c0_29] : memref<1x128xf32, #tpu.memory_space<vmem>>, vector<1x128xf32>
    %50 = vector.broadcast %49 : vector<1x128xf32> to vector<16x128xf32>
    %51 = arith.addf %48, %50 : vector<16x128xf32>
    %52 = arith.truncf %51 : vector<16x128xf32> to vector<16x128xbf16>
    %c0_30 = arith.constant 0 : index
    %c0_31 = arith.constant 0 : index
    %53 = vector.load %arg17[%c0_30, %c0_31] : memref<16x128xbf16, #tpu.memory_space<vmem>>, vector<16x128xbf16>
    tpu.vector_store %arg17[%c0_30, %c0_31], %52 {strides = array<i32>} : memref<16x128xbf16, #tpu.memory_space<vmem>>, vector<16x128xbf16>,
    %54 = arith.truncf %51 : vector<16x128xf32> to vector<16x128xbf16>
    %c0_32 = arith.constant 0 : index
    %c0_33 = arith.constant 0 : index
    %55 = vector.load %arg10[%c0_32, %c0_33] : memref<128x128xbf16, #tpu.memory_space<vmem>>, vector<128x128xbf16>
    %cst_34 = arith.constant dense<0.000000e+00> : vector<16x128xf32>
    %56 = tpu.matmul %54, %55, %cst_34 {dimension_numbers = #tpu.dot_dimension_numbers<[1], [0], [0], [1], [0, 0, 1, 1], [], []>} : vector<16x128xbf16>, vector<128x128xbf16>, vector<16x128xf32> -> vector<16x128xf32>
    %c0_35 = arith.constant 0 : index
    %c0_36 = arith.constant 0 : index
    %57 = vector.load %arg11[%c0_35, %c0_36] : memref<1x128xf32, #tpu.memory_space<vmem>>, vector<1x128xf32>
    %58 = vector.broadcast %57 : vector<1x128xf32> to vector<16x128xf32>
    %59 = arith.addf %56, %58 : vector<16x128xf32>
    %cst_37 = arith.constant 0.000000e+00 : f32
    %60 = vector.broadcast %cst_37 : f32 to vector<16x128xf32>
    %61 = arith.maximumf %59, %60 : vector<16x128xf32>
    %62 = arith.truncf %61 : vector<16x128xf32> to vector<16x128xbf16>
    %c0_38 = arith.constant 0 : index
    %c0_39 = arith.constant 0 : index
    %63 = vector.load %arg12[%c0_38, %c0_39] : memref<128x32xbf16, #tpu.memory_space<vmem>>, vector<128x32xbf16>
    %cst_40 = arith.constant dense<0.000000e+00> : vector<16x32xf32>
    %64 = tpu.matmul %62, %63, %cst_40 {dimension_numbers = #tpu.dot_dimension_numbers<[1], [0], [0], [1], [0, 0, 1, 1], [], []>} : vector<16x128xbf16>, vector<128x32xbf16>, vector<16x32xf32> -> vector<16x32xf32>
    %c0_41 = arith.constant 0 : index
    %c0_42 = arith.constant 0 : index
    %65 = vector.load %arg13[%c0_41, %c0_42] : memref<1x32xf32, #tpu.memory_space<vmem>>, vector<1x32xf32>
    %66 = vector.broadcast %65 : vector<1x32xf32> to vector<16x32xf32>
    %67 = arith.addf %64, %66 : vector<16x32xf32>
    %cst_43 = arith.constant 0.000000e+00 : f32
    %68 = vector.broadcast %cst_43 : f32 to vector<16x32xf32>
    %69 = arith.maximumf %67, %68 : vector<16x32xf32>
    %70 = arith.truncf %69 : vector<16x32xf32> to vector<16x32xbf16>
    %c0_44 = arith.constant 0 : index
    %c0_45 = arith.constant 0 : index
    %71 = vector.load %arg14[%c0_44, %c0_45] : memref<32x128xbf16, #tpu.memory_space<vmem>>, vector<32x128xbf16>
    %cst_46 = arith.constant dense<0.000000e+00> : vector<16x128xf32>
    %72 = tpu.matmul %70, %71, %cst_46 {dimension_numbers = #tpu.dot_dimension_numbers<[1], [0], [0], [1], [0, 0, 1, 1], [], []>} : vector<16x32xbf16>, vector<32x128xbf16>, vector<16x128xf32> -> vector<16x128xf32>
    %c0_47 = arith.constant 0 : index
    %c0_48 = arith.constant 0 : index
    %73 = vector.load %arg15[%c0_47, %c0_48] : memref<1x128xf32, #tpu.memory_space<vmem>>, vector<1x128xf32>
    %74 = vector.broadcast %73 : vector<1x128xf32> to vector<16x128xf32>
    %75 = arith.addf %72, %74 : vector<16x128xf32>
    %76 = arith.truncf %75 : vector<16x128xf32> to vector<16x128xbf16>
    %c0_49 = arith.constant 0 : index
    %c0_50 = arith.constant 0 : index
    %77 = vector.load %arg16[%c0_49, %c0_50] : memref<16x128xbf16, #tpu.memory_space<vmem>>, vector<16x128xbf16>
    tpu.vector_store %arg16[%c0_49, %c0_50], %76 {strides = array<i32>} : memref<16x128xbf16, #tpu.memory_space<vmem>>, vector<16x128xbf16>,
    return
  }
  func.func @transform_0(%arg0: i32) -> (i32, i32) {
    %c0_i32 = arith.constant 0 : i32
    %c0_i32_0 = arith.constant 0 : i32
    return %arg0, %c0_i32 : i32, i32
  }
  func.func @transform_1(%arg0: i32) -> (i32, i32, i32) {
    %c0_i32 = arith.constant 0 : i32
    %c0_i32_0 = arith.constant 0 : i32
    %c0_i32_1 = arith.constant 0 : i32
    return %arg0, %c0_i32, %c0_i32_0 : i32, i32, i32
  }
  func.func @transform_2(%arg0: i32) -> (i32, i32, i32) {
    %c0_i32 = arith.constant 0 : i32
    %c0_i32_0 = arith.constant 0 : i32
    %c0_i32_1 = arith.constant 0 : i32
    return %arg0, %c0_i32, %c0_i32_0 : i32, i32, i32
  }
  func.func @transform_3(%arg0: i32) -> (i32, i32, i32) {
    %c0_i32 = arith.constant 0 : i32
    %c0_i32_0 = arith.constant 0 : i32
    %c0_i32_1 = arith.constant 0 : i32
    return %arg0, %c0_i32, %c0_i32_0 : i32, i32, i32
  }
  func.func @transform_4(%arg0: i32) -> (i32, i32) {
    %c0_i32 = arith.constant 0 : i32
    %c0_i32_0 = arith.constant 0 : i32
    return %arg0, %c0_i32 : i32, i32
  }
  func.func @transform_5(%arg0: i32) -> (i32, i32) {
    %c0_i32 = arith.constant 0 : i32
    %c0_i32_0 = arith.constant 0 : i32
    %c0_i32_1 = arith.constant 0 : i32
    return %c0_i32, %c0_i32_0 : i32, i32
  }
  func.func @transform_6(%arg0: i32) -> (i32, i32) {
    %c0_i32 = arith.constant 0 : i32
    %c0_i32_0 = arith.constant 0 : i32
    %c0_i32_1 = arith.constant 0 : i32
    return %c0_i32, %c0_i32_0 : i32, i32
  }
  func.func @transform_7(%arg0: i32) -> (i32, i32) {
    %c0_i32 = arith.constant 0 : i32
    %c0_i32_0 = arith.constant 0 : i32
    %c0_i32_1 = arith.constant 0 : i32
    return %c0_i32, %c0_i32_0 : i32, i32
  }
  func.func @transform_8(%arg0: i32) -> (i32, i32) {
    %c0_i32 = arith.constant 0 : i32
    %c0_i32_0 = arith.constant 0 : i32
    %c0_i32_1 = arith.constant 0 : i32
    return %c0_i32, %c0_i32_0 : i32, i32
  }
  func.func @transform_9(%arg0: i32) -> (i32, i32) {
    %c0_i32 = arith.constant 0 : i32
    %c0_i32_0 = arith.constant 0 : i32
    %c0_i32_1 = arith.constant 0 : i32
    return %c0_i32, %c0_i32_0 : i32, i32
  }
  func.func @transform_10(%arg0: i32) -> (i32, i32) {
    %c0_i32 = arith.constant 0 : i32
    %c0_i32_0 = arith.constant 0 : i32
    %c0_i32_1 = arith.constant 0 : i32
    return %c0_i32, %c0_i32_0 : i32, i32
  }
  func.func @transform_11(%arg0: i32) -> (i32, i32) {
    %c0_i32 = arith.constant 0 : i32
    %c0_i32_0 = arith.constant 0 : i32
    %c0_i32_1 = arith.constant 0 : i32
    return %c0_i32, %c0_i32_0 : i32, i32
  }
  func.func @transform_12(%arg0: i32) -> (i32, i32) {
    %c0_i32 = arith.constant 0 : i32
    %c0_i32_0 = arith.constant 0 : i32
    %c0_i32_1 = arith.constant 0 : i32
    return %c0_i32, %c0_i32_0 : i32, i32
  }
  func.func @transform_13(%arg0: i32) -> (i32, i32) {
    %c0_i32 = arith.constant 0 : i32
    %c0_i32_0 = arith.constant 0 : i32
    %c0_i32_1 = arith.constant 0 : i32
    return %c0_i32, %c0_i32_0 : i32, i32
  }
  func.func @transform_14(%arg0: i32) -> (i32, i32) {
    %c0_i32 = arith.constant 0 : i32
    %c0_i32_0 = arith.constant 0 : i32
    %c0_i32_1 = arith.constant 0 : i32
    return %c0_i32, %c0_i32_0 : i32, i32
  }
  func.func @transform_15(%arg0: i32) -> (i32, i32) {
    %c0_i32 = arith.constant 0 : i32
    %c0_i32_0 = arith.constant 0 : i32
    return %arg0, %c0_i32 : i32, i32
  }
  func.func @transform_16(%arg0: i32) -> (i32, i32) {
    %c0_i32 = arith.constant 0 : i32
    %c0_i32_0 = arith.constant 0 : i32
    return %arg0, %c0_i32 : i32, i32
  }
}

module attributes {stable_mosaic.version = 11 : i64} {
  func.func @_mmrec_kernel(%arg0: i32, %arg1: memref<16x2xi32, #tpu.memory_space<vmem>>, %arg2: memref<16x8x128xbf16, #tpu.memory_space<vmem>>, %arg3: memref<16x8x128xbf16, #tpu.memory_space<vmem>>, %arg4: memref<16x8x128xbf16, #tpu.memory_space<vmem>>, %arg5: memref<16x256xbf16, #tpu.memory_space<vmem>>, %arg6: memref<384x128xbf16, #tpu.memory_space<vmem>>, %arg7: memref<1x128xf32, #tpu.memory_space<vmem>>, %arg8: memref<640x128xbf16, #tpu.memory_space<vmem>>, %arg9: memref<1x128xf32, #tpu.memory_space<vmem>>, %arg10: memref<128x128xbf16, #tpu.memory_space<vmem>>, %arg11: memref<1x128xf32, #tpu.memory_space<vmem>>, %arg12: memref<128x32xbf16, #tpu.memory_space<vmem>>, %arg13: memref<1x32xf32, #tpu.memory_space<vmem>>, %arg14: memref<32x128xbf16, #tpu.memory_space<vmem>>, %arg15: memref<1x128xf32, #tpu.memory_space<vmem>>, %arg16: memref<16x128xbf16, #tpu.memory_space<vmem>>, %arg17: memref<16x128xbf16, #tpu.memory_space<vmem>>) attributes {dimension_semantics = [#tpu.dimension_semantics<parallel>], iteration_bounds = array<i64: 4>, scalar_prefetch = 0 : i64, scratch_operands = 0 : i64, tpu.core_type = #tpu.core_type<tc>, window_params = [{transform_indices = @transform_0, window_bounds = array<i64: 16, 2>}, {transform_indices = @transform_1, window_bounds = array<i64: 16, 8, 128>}, {transform_indices = @transform_2, window_bounds = array<i64: 16, 8, 128>}, {transform_indices = @transform_3, window_bounds = array<i64: 16, 8, 128>}, {transform_indices = @transform_4, window_bounds = array<i64: 16, 256>}, {pipeline_mode = #tpu.pipeline_mode<synchronous>, transform_indices = @transform_5, window_bounds = array<i64: 384, 128>}, {pipeline_mode = #tpu.pipeline_mode<synchronous>, transform_indices = @transform_6, window_bounds = array<i64: 1, 128>}, {pipeline_mode = #tpu.pipeline_mode<synchronous>, transform_indices = @transform_7, window_bounds = array<i64: 640, 128>}, {pipeline_mode = #tpu.pipeline_mode<synchronous>, transform_indices = @transform_8, window_bounds = array<i64: 1, 128>}, {pipeline_mode = #tpu.pipeline_mode<synchronous>, transform_indices = @transform_9, window_bounds = array<i64: 128, 128>}, {pipeline_mode = #tpu.pipeline_mode<synchronous>, transform_indices = @transform_10, window_bounds = array<i64: 1, 128>}, {pipeline_mode = #tpu.pipeline_mode<synchronous>, transform_indices = @transform_11, window_bounds = array<i64: 128, 32>}, {pipeline_mode = #tpu.pipeline_mode<synchronous>, transform_indices = @transform_12, window_bounds = array<i64: 1, 32>}, {pipeline_mode = #tpu.pipeline_mode<synchronous>, transform_indices = @transform_13, window_bounds = array<i64: 32, 128>}, {pipeline_mode = #tpu.pipeline_mode<synchronous>, transform_indices = @transform_14, window_bounds = array<i64: 1, 128>}, {transform_indices = @transform_15, window_bounds = array<i64: 16, 128>}, {transform_indices = @transform_16, window_bounds = array<i64: 16, 128>}]} {
    %c0 = arith.constant 0 : index
    %c0_0 = arith.constant 0 : index
    %c0_1 = arith.constant 0 : index
    %0 = vector.load %arg2[%c0, %c0_0, %c0_1] : memref<16x8x128xbf16, #tpu.memory_space<vmem>>, vector<16x8x128xbf16>
    %c0_2 = arith.constant 0 : index
    %c0_3 = arith.constant 0 : index
    %c0_4 = arith.constant 0 : index
    %1 = vector.load %arg3[%c0_2, %c0_3, %c0_4] : memref<16x8x128xbf16, #tpu.memory_space<vmem>>, vector<16x8x128xbf16>
    %c0_5 = arith.constant 0 : index
    %c0_6 = arith.constant 0 : index
    %c0_7 = arith.constant 0 : index
    %2 = vector.load %arg4[%c0_5, %c0_6, %c0_7] : memref<16x8x128xbf16, #tpu.memory_space<vmem>>, vector<16x8x128xbf16>
    %c0_8 = arith.constant 0 : index
    %c0_9 = arith.constant 0 : index
    %3 = vector.load %arg1[%c0_8, %c0_9] : memref<16x2xi32, #tpu.memory_space<vmem>>, vector<16x2xi32>
    %4 = tpu.iota {dimensions = array<i32: 1>} : vector<16x8x128xi32>
    %5 = vector.extract_strided_slice %3 {offsets = [0, 0], sizes = [16, 1], strides = [1, 1]} : vector<16x2xi32> to vector<16x1xi32>
    %6 = vector.shape_cast %5 : vector<16x1xi32> to vector<16x1x1xi32>
    %7 = vector.broadcast %6 : vector<16x1x1xi32> to vector<16x8x128xi32>
    %8 = arith.cmpi eq, %4, %7 : vector<16x8x128xi32>
    %c0_i32 = arith.constant 0 : i32
    %9 = arith.sitofp %c0_i32 : i32 to bf16
    %10 = vector.broadcast %9 : bf16 to vector<16x8x128xbf16>
    %11 = arith.select %8, %0, %10 : vector<16x8x128xi1>, vector<16x8x128xbf16>
    %12 = arith.extf %11 : vector<16x8x128xbf16> to vector<16x8x128xf32>
    %cst = arith.constant dense<0.000000e+00> : vector<16x128xf32>
    %13 = vector.multi_reduction <add>, %12, %cst [1] : vector<16x8x128xf32> to vector<16x128xf32>
    %14 = arith.truncf %13 : vector<16x128xf32> to vector<16x128xbf16>
    %15 = vector.extract_strided_slice %3 {offsets = [0, 1], sizes = [16, 1], strides = [1, 1]} : vector<16x2xi32> to vector<16x1xi32>
    %16 = vector.shape_cast %15 : vector<16x1xi32> to vector<16x1x1xi32>
    %17 = vector.broadcast %16 : vector<16x1x1xi32> to vector<16x8x128xi32>
    %18 = arith.cmpi eq, %4, %17 : vector<16x8x128xi32>
    %c0_i32_10 = arith.constant 0 : i32
    %19 = arith.sitofp %c0_i32_10 : i32 to bf16
    %20 = vector.broadcast %19 : bf16 to vector<16x8x128xbf16>
    %21 = arith.select %18, %0, %20 : vector<16x8x128xi1>, vector<16x8x128xbf16>
    %22 = arith.extf %21 : vector<16x8x128xbf16> to vector<16x8x128xf32>
    %cst_11 = arith.constant dense<0.000000e+00> : vector<16x128xf32>
    %23 = vector.multi_reduction <add>, %22, %cst_11 [1] : vector<16x8x128xf32> to vector<16x128xf32>
    %24 = arith.truncf %23 : vector<16x128xf32> to vector<16x128xbf16>
    %25 = arith.extf %1 : vector<16x8x128xbf16> to vector<16x8x128xf32>
    %cst_12 = arith.constant dense<0.000000e+00> : vector<16x128xf32>
    %26 = vector.multi_reduction <add>, %25, %cst_12 [1] : vector<16x8x128xf32> to vector<16x128xf32>
    %cst_13 = arith.constant 8.000000e+00 : f32
    %27 = vector.broadcast %cst_13 : f32 to vector<16x128xf32>
    %28 = arith.divf %26, %27 : vector<16x128xf32>
    %29 = arith.extf %2 : vector<16x8x128xbf16> to vector<16x8x128xf32>
    %cst_14 = arith.constant dense<0.000000e+00> : vector<16x128xf32>
    %30 = vector.multi_reduction <add>, %29, %cst_14 [1] : vector<16x8x128xf32> to vector<16x128xf32>
    %cst_15 = arith.constant 8.000000e+00 : f32
    %31 = vector.broadcast %cst_15 : f32 to vector<16x128xf32>
    %32 = arith.divf %30, %31 : vector<16x128xf32>
    %33 = arith.extf %0 : vector<16x8x128xbf16> to vector<16x8x128xf32>
    %cst_16 = arith.constant dense<0.000000e+00> : vector<16x128xf32>
    %34 = vector.multi_reduction <add>, %33, %cst_16 [1] : vector<16x8x128xf32> to vector<16x128xf32>
    %cst_17 = arith.constant 8.000000e+00 : f32
    %35 = vector.broadcast %cst_17 : f32 to vector<16x128xf32>
    %36 = arith.divf %34, %35 : vector<16x128xf32>
    %37 = tpu.concatenate %32, %36, %28 in 1 : vector<16x128xf32>, vector<16x128xf32>, vector<16x128xf32> -> vector<16x384xf32>
    %38 = arith.truncf %37 : vector<16x384xf32> to vector<16x384xbf16>
    %c0_18 = arith.constant 0 : index
    %c0_19 = arith.constant 0 : index
    %39 = vector.load %arg6[%c0_18, %c0_19] : memref<384x128xbf16, #tpu.memory_space<vmem>>, vector<384x128xbf16>
    %cst_20 = arith.constant dense<0.000000e+00> : vector<16x128xf32>
    %40 = tpu.matmul %38, %39, %cst_20 {dimension_numbers = #tpu.dot_dimension_numbers<[1], [0], [0], [1], [0, 0, 1, 1], [], []>} : vector<16x384xbf16>, vector<384x128xbf16>, vector<16x128xf32> -> vector<16x128xf32>
    %c0_21 = arith.constant 0 : index
    %c0_22 = arith.constant 0 : index
    %41 = vector.load %arg7[%c0_21, %c0_22] : memref<1x128xf32, #tpu.memory_space<vmem>>, vector<1x128xf32>
    %42 = vector.broadcast %41 : vector<1x128xf32> to vector<16x128xf32>
    %43 = arith.addf %40, %42 : vector<16x128xf32>
    %44 = arith.truncf %43 : vector<16x128xf32> to vector<16x128xbf16>
    %c0_23 = arith.constant 0 : index
    %c0_24 = arith.constant 0 : index
    %45 = vector.load %arg5[%c0_23, %c0_24] : memref<16x256xbf16, #tpu.memory_space<vmem>>, vector<16x256xbf16>
    %46 = tpu.concatenate %14, %24, %44, %45 in 1 : vector<16x128xbf16>, vector<16x128xbf16>, vector<16x128xbf16>, vector<16x256xbf16> -> vector<16x640xbf16>
    %c0_25 = arith.constant 0 : index
    %c0_26 = arith.constant 0 : index
    %47 = vector.load %arg8[%c0_25, %c0_26] : memref<640x128xbf16, #tpu.memory_space<vmem>>, vector<640x128xbf16>
    %cst_27 = arith.constant dense<0.000000e+00> : vector<16x128xf32>
    %48 = tpu.matmul %46, %47, %cst_27 {dimension_numbers = #tpu.dot_dimension_numbers<[1], [0], [0], [1], [0, 0, 1, 1], [], []>} : vector<16x640xbf16>, vector<640x128xbf16>, vector<16x128xf32> -> vector<16x128xf32>
    %c0_28 = arith.constant 0 : index
    %c0_29 = arith.constant 0 : index
    %49 = vector.load %arg9[%c0_28, %c0_29] : memref<1x128xf32, #tpu.memory_space<vmem>>, vector<1x128xf32>
    %50 = vector.broadcast %49 : vector<1x128xf32> to vector<16x128xf32>
    %51 = arith.addf %48, %50 : vector<16x128xf32>
    %52 = arith.truncf %51 : vector<16x128xf32> to vector<16x128xbf16>
    %c0_30 = arith.constant 0 : index
    %c0_31 = arith.constant 0 : index
    %53 = vector.load %arg17[%c0_30, %c0_31] : memref<16x128xbf16, #tpu.memory_space<vmem>>, vector<16x128xbf16>
    tpu.vector_store %arg17[%c0_30, %c0_31], %52 {strides = array<i32>} : memref<16x128xbf16, #tpu.memory_space<vmem>>, vector<16x128xbf16>,
    %54 = arith.truncf %51 : vector<16x128xf32> to vector<16x128xbf16>
    %c0_32 = arith.constant 0 : index
    %c0_33 = arith.constant 0 : index
    %55 = vector.load %arg10[%c0_32, %c0_33] : memref<128x128xbf16, #tpu.memory_space<vmem>>, vector<128x128xbf16>
    %cst_34 = arith.constant dense<0.000000e+00> : vector<16x128xf32>
    %56 = tpu.matmul %54, %55, %cst_34 {dimension_numbers = #tpu.dot_dimension_numbers<[1], [0], [0], [1], [0, 0, 1, 1], [], []>} : vector<16x128xbf16>, vector<128x128xbf16>, vector<16x128xf32> -> vector<16x128xf32>
    %c0_35 = arith.constant 0 : index
    %c0_36 = arith.constant 0 : index
    %57 = vector.load %arg11[%c0_35, %c0_36] : memref<1x128xf32, #tpu.memory_space<vmem>>, vector<1x128xf32>
    %58 = vector.broadcast %57 : vector<1x128xf32> to vector<16x128xf32>
    %59 = arith.addf %56, %58 : vector<16x128xf32>
    %cst_37 = arith.constant 0.000000e+00 : f32
    %60 = vector.broadcast %cst_37 : f32 to vector<16x128xf32>
    %61 = arith.maximumf %59, %60 : vector<16x128xf32>
    %62 = arith.truncf %61 : vector<16x128xf32> to vector<16x128xbf16>
    %c0_38 = arith.constant 0 : index
    %c0_39 = arith.constant 0 : index
    %63 = vector.load %arg12[%c0_38, %c0_39] : memref<128x32xbf16, #tpu.memory_space<vmem>>, vector<128x32xbf16>
    %cst_40 = arith.constant dense<0.000000e+00> : vector<16x32xf32>
    %64 = tpu.matmul %62, %63, %cst_40 {dimension_numbers = #tpu.dot_dimension_numbers<[1], [0], [0], [1], [0, 0, 1, 1], [], []>} : vector<16x128xbf16>, vector<128x32xbf16>, vector<16x32xf32> -> vector<16x32xf32>
    %c0_41 = arith.constant 0 : index
    %c0_42 = arith.constant 0 : index
    %65 = vector.load %arg13[%c0_41, %c0_42] : memref<1x32xf32, #tpu.memory_space<vmem>>, vector<1x32xf32>
    %66 = vector.broadcast %65 : vector<1x32xf32> to vector<16x32xf32>
    %67 = arith.addf %64, %66 : vector<16x32xf32>
    %cst_43 = arith.constant 0.000000e+00 : f32
    %68 = vector.broadcast %cst_43 : f32 to vector<16x32xf32>
    %69 = arith.maximumf %67, %68 : vector<16x32xf32>
    %70 = arith.truncf %69 : vector<16x32xf32> to vector<16x32xbf16>
    %c0_44 = arith.constant 0 : index
    %c0_45 = arith.constant 0 : index
    %71 = vector.load %arg14[%c0_44, %c0_45] : memref<32x128xbf16, #tpu.memory_space<vmem>>, vector<32x128xbf16>
    %cst_46 = arith.constant dense<0.000000e+00> : vector<16x128xf32>
    %72 = tpu.matmul %70, %71, %cst_46 {dimension_numbers = #tpu.dot_dimension_numbers<[1], [0], [0], [1], [0, 0, 1, 1], [], []>} : vector<16x32xbf16>, vector<32x128xbf16>, vector<16x128xf32> -> vector<16x128xf32>
    %c0_47 = arith.constant 0 : index
    %c0_48 = arith.constant 0 : index
    %73 = vector.load %arg15[%c0_47, %c0_48] : memref<1x128xf32, #tpu.memory_space<vmem>>, vector<1x128xf32>
    %74 = vector.broadcast %73 : vector<1x128xf32> to vector<16x128xf32>
    %75 = arith.addf %72, %74 : vector<16x128xf32>
    %76 = arith.truncf %75 : vector<16x128xf32> to vector<16x128xbf16>
    %c0_49 = arith.constant 0 : index
    %c0_50 = arith.constant 0 : index
    %77 = vector.load %arg16[%c0_49, %c0_50] : memref<16x128xbf16, #tpu.memory_space<vmem>>, vector<16x128xbf16>
    tpu.vector_store %arg16[%c0_49, %c0_50], %76 {strides = array<i32>} : memref<16x128xbf16, #tpu.memory_space<vmem>>, vector<16x128xbf16>,
    return
  }
  func.func @transform_0(%arg0: i32) -> (i32, i32) {
    %c0_i32 = arith.constant 0 : i32
    %c0_i32_0 = arith.constant 0 : i32
    return %arg0, %c0_i32 : i32, i32
  }
  func.func @transform_1(%arg0: i32) -> (i32, i32, i32) {
    %c0_i32 = arith.constant 0 : i32
    %c0_i32_0 = arith.constant 0 : i32
    %c0_i32_1 = arith.constant 0 : i32
    return %arg0, %c0_i32, %c0_i32_0 : i32, i32, i32
  }
  func.func @transform_2(%arg0: i32) -> (i32, i32, i32) {
    %c0_i32 = arith.constant 0 : i32
    %c0_i32_0 = arith.constant 0 : i32
    %c0_i32_1 = arith.constant 0 : i32
    return %arg0, %c0_i32, %c0_i32_0 : i32, i32, i32
  }
  func.func @transform_3(%arg0: i32) -> (i32, i32, i32) {
    %c0_i32 = arith.constant 0 : i32
    %c0_i32_0 = arith.constant 0 : i32
    %c0_i32_1 = arith.constant 0 : i32
    return %arg0, %c0_i32, %c0_i32_0 : i32, i32, i32
  }
  func.func @transform_4(%arg0: i32) -> (i32, i32) {
    %c0_i32 = arith.constant 0 : i32
    %c0_i32_0 = arith.constant 0 : i32
    return %arg0, %c0_i32 : i32, i32
  }
  func.func @transform_5(%arg0: i32) -> (i32, i32) {
    %c0_i32 = arith.constant 0 : i32
    %c0_i32_0 = arith.constant 0 : i32
    %c0_i32_1 = arith.constant 0 : i32
    return %c0_i32, %c0_i32_0 : i32, i32
  }
  func.func @transform_6(%arg0: i32) -> (i32, i32) {
    %c0_i32 = arith.constant 0 : i32
    %c0_i32_0 = arith.constant 0 : i32
    %c0_i32_1 = arith.constant 0 : i32
    return %c0_i32, %c0_i32_0 : i32, i32
  }
  func.func @transform_7(%arg0: i32) -> (i32, i32) {
    %c0_i32 = arith.constant 0 : i32
    %c0_i32_0 = arith.constant 0 : i32
    %c0_i32_1 = arith.constant 0 : i32
    return %c0_i32, %c0_i32_0 : i32, i32
  }
  func.func @transform_8(%arg0: i32) -> (i32, i32) {
    %c0_i32 = arith.constant 0 : i32
    %c0_i32_0 = arith.constant 0 : i32
    %c0_i32_1 = arith.constant 0 : i32
    return %c0_i32, %c0_i32_0 : i32, i32
  }
  func.func @transform_9(%arg0: i32) -> (i32, i32) {
    %c0_i32 = arith.constant 0 : i32
    %c0_i32_0 = arith.constant 0 : i32
    %c0_i32_1 = arith.constant 0 : i32
    return %c0_i32, %c0_i32_0 : i32, i32
  }
  func.func @transform_10(%arg0: i32) -> (i32, i32) {
    %c0_i32 = arith.constant 0 : i32
    %c0_i32_0 = arith.constant 0 : i32
    %c0_i32_1 = arith.constant 0 : i32
    return %c0_i32, %c0_i32_0 : i32, i32
  }
  func.func @transform_11(%arg0: i32) -> (i32, i32) {
    %c0_i32 = arith.constant 0 : i32
    %c0_i32_0 = arith.constant 0 : i32
    %c0_i32_1 = arith.constant 0 : i32
    return %c0_i32, %c0_i32_0 : i32, i32
  }
  func.func @transform_12(%arg0: i32) -> (i32, i32) {
    %c0_i32 = arith.constant 0 : i32
    %c0_i32_0 = arith.constant 0 : i32
    %c0_i32_1 = arith.constant 0 : i32
    return %c0_i32, %c0_i32_0 : i32, i32
  }
  func.func @transform_13(%arg0: i32) -> (i32, i32) {
    %c0_i32 = arith.constant 0 : i32
    %c0_i32_0 = arith.constant 0 : i32
    %c0_i32_1 = arith.constant 0 : i32
    return %c0_i32, %c0_i32_0 : i32, i32
  }
  func.func @transform_14(%arg0: i32) -> (i32, i32) {
    %c0_i32 = arith.constant 0 : i32
    %c0_i32_0 = arith.constant 0 : i32
    %c0_i32_1 = arith.constant 0 : i32
    return %c0_i32, %c0_i32_0 : i32, i32
  }
  func.func @transform_15(%arg0: i32) -> (i32, i32) {
    %c0_i32 = arith.constant 0 : i32
    %c0_i32_0 = arith.constant 0 : i32
    return %arg0, %c0_i32 : i32, i32
  }
  func.func @transform_16(%arg0: i32) -> (i32, i32) {
    %c0_i32 = arith.constant 0 : i32
    %c0_i32_0 = arith.constant 0 : i32
    return %arg0, %c0_i32 : i32, i32
  }
}

</mosaic_0001>

<bundles_post_ra>
// kernel: tpu_custom_call.1
= control target key start
LH: loop header
LB: loop body
LE: loop exit
PB: predicated region body
PF: predicated region fallthrough
CT: control target
= control target key end

     0   :  { %s5205_s0 = inlined_call_operand.vmem [shape: s32[64,2], index: 0, kind: input, shape index: {}]   ;;  %s5206_s1 = inlined_call_operand.hbm [shape: bf16[64,8,128], index: 1, kind: input, shape index: {}]   ;;  %s5207_s2 = inlined_call_operand.hbm [shape: bf16[64,8,128], index: 2, kind: input, shape index: {}]   ;;  %s5208_s3 = inlined_call_operand.hbm [shape: bf16[64,8,128], index: 3, kind: input, shape index: {}]   ;;  %s5209_s4 = inlined_call_operand.vmem [shape: bf16[64,256], index: 4, kind: input, shape index: {}]   ;;  %s5210_s5 = inlined_call_operand.hbm [shape: bf16[384,128], index: 5, kind: input, shape index: {}]   ;;  %s5211_s6 = inlined_call_operand.vmem [shape: f32[1,128], index: 6, kind: input, shape index: {}]   ;;  %s5212_s7 = inlined_call_operand.hbm [shape: bf16[640,128], index: 7, kind: input, shape index: {}]   ;;  %s5213_s8 = inlined_call_operand.vmem [shape: f32[1,128], index: 8, kind: input, shape index: {}]   ;;  %s5214_s9 = inlined_call_operand.vmem [shape: bf16[128,128], index: 9, kind: input, shape index: {}]   ;;  %s5215_s10 = inlined_call_operand.vmem [shape: f32[1,128], index: 10, kind: input, shape index: {}]   ;;  %s5216_s11 = inlined_call_operand.vmem [shape: bf16[128,32], index: 11, kind: input, shape index: {}]   ;;  %s5217_s12 = inlined_call_operand.vmem [shape: f32[1,32], index: 12, kind: input, shape index: {}]   ;;  %s5218_s13 = inlined_call_operand.hbm [shape: bf16[32,128], index: 13, kind: input, shape index: {}]   ;;  %s5219_s14 = inlined_call_operand.vmem [shape: f32[1,128], index: 14, kind: input, shape index: {}]   ;;  %s5220_s15 = inlined_call_operand.hbm [shape: bf16[64,128], index: 15, kind: output, shape index: {0}]   ;;  %s5221_s16 = inlined_call_operand.hbm [shape: bf16[64,128], index: 16, kind: output, shape index: {1}]  }
   0x1   :  { %5244 = sst [smem:[#allocation30_spill]] %s5205_s0 }
   0x2   :  { %5245 = sst [smem:[#allocation31_spill]] %s5207_s2 }
   0x3   :  { %5246 = sst [smem:[#allocation32_spill]] %s5210_s5 }
   0x4   :  { %5247 = sst [smem:[#allocation33_spill]] %s5213_s8 }
   0x5   :  { %5248 = sst [smem:[#allocation34_spill]] %s5215_s10 }
   0x6   :  { %5249 = sst [smem:[#allocation35_spill]] %s5216_s11 }
   0x7   :  { %5250 = sst [smem:[#allocation36_spill]] %s5217_s12 }
   0x8   :  { %5251 = sst [smem:[#allocation37_spill]] %s5219_s14 }
   0x9   :  { %5252 = sst [smem:[#allocation38_spill]] %s5220_s15 }
   0xa   :  { %5253 = sst [smem:[#allocation39_spill]] %s5221_s16 }
   0xb   :  { %22 = vsyncpa [#allocation3], 0 }
   0xc   :  { %24 = vsyncpa [#allocation3 + $0x1], 0 }
   0xd   :  { %25 = vsyncpa [#allocation6], 0 }
   0xe   :  { %27 = vsyncpa [#allocation6 + $0x1], 0 }
   0xf   :  { %28 = vsyncpa [#allocation9], 0 }
  0x10   :  { %29 = vsyncpa [#allocation12], 0 }
  0x11   :  { %30 = vsyncpa [#allocation4], 0 }
  0x12   :  { %32 = vsyncpa [#allocation4 + $0x1], 0 }
  0x13   :  { %33 = vsyncpa [#allocation15], 0 }
  0x14   :  { %35 = vsyncpa [#allocation15 + $0x1], 0  ;;  %s4058_s21 = smov 0   ;;  %s4060_s22 = smov 0  }
  0x15   :  { %s4062_s23 = smov 0   ;;  %s4064_s24 = smov 0  }
  0x16 LB: > { %5254 = sst [smem:[#allocation22_spill]] %s3949_s21  ;;  %s4079_s25 = sadd.s32 4294967295, %s3961_s24   ;;  %s3961_s24 = sphi %s4064_s24, %s5356_s24   ;;  %s3957_s23 = sphi %s4062_s23, %s5360_s23   ;;  %s3953_s22 = sphi %s4060_s22, %s5359_s22   ;;  %s3949_s21 = sphi %s4058_s21, %s5358_s21  }
  0x17   : > { %5255 = sst [smem:[#allocation23_spill]] %s3961_s24  ;;  %s3006_s26 = sadd.s32 4294967294, %s3961_s24  }
  0x18   : > { %p87_p0 = scmp.ne.s32.totalorder %s3953_s22, %s3949_s21  ;;  %p5237_p1 = scmp.eq.s32.totalorder %s4079_s25, 0 }
  0x19   : > { %p399_p2 = scmp.eq.s32.totalorder %s4079_s25, 3  ;;  %p405_p3 = scmp.eq.s32.totalorder %s3006_s26, 3 }
  0x1a   : > { %p4088_p4 = por %p5237_p1, %p87_p0  ;;  %p3007_p5 = scmp.ge.s32.totalorder %s3961_s24, 1 }
  0x1b   : > { %p4093_p6 = por %p405_p3, %p87_p0  ;;  %p438_p7 = scmp.lt.s32.totalorder %s3961_s24, 5 }
  0x1c   : > { %s5259_s5 = sld [smem:[#allocation32_spill]]  ;;  %s3963_s18 = smov [#allocation8]  }
  0x1d   : > { %s5257_s28 = scalar_select %p4093_p6, 1, 0 }
  0x1e   : > { %p4101_p8 = pnand %p3007_p5, %p438_p7  ;;  %s451_s19 = sshll.u32 %s3963_s18, 4  ;;  %s452_s19 = int_to_ptr.vmem [resolvable:$true] %s451_s19 }
  0x1f   : > { %5258 = sst [smem:[#allocation24_spill]] %s5257_s28  ;;  %s4114_s26 = sadd.s32 1, %s3961_s24  }
  0x20   : > { %p3580_p9 = pneg %p4101_p8  ;;  %5262 = sst [smem:[#allocation25_spill]] %s4114_s26 }
  0x21   : > { %s5225_s29 = smov 64   ;;  %s5227_s30 = smov 4  }
  0x22   : > { %s449_s0 = sshll.u32 %s5259_s5, 4  ;;  %p4109_p10 = pnand %p3580_p9, %p5237_p1  ;;  %s450_s0 = int_to_ptr.hbm [resolvable:$true] %s449_s0 }
  0x23   : > { %s71_s18 = ssub.s32 %s3961_s24, %s4114_s26  ;;  %s74_s5 = sadd.s32 1, %s3957_s23 }
  0x24   : > { %3583 = dma.hbm_to_vmem [thread:$0]  (!%p4109_p10), %s450_s0, 3072, %s452_s19, [#allocation9], %s5225_s29, %s5225_s29, %s5227_s30  }
  0x25   : > { %p72_p11 = scmp.eq.s32.totalorder %s71_s18, 0  ;;  %p81_p12 = scmp.ne.s32.totalorder %s3957_s23, %s3953_s22 }
  0x26   : > { %p82_p13 = scmp.eq.s32.totalorder %s3961_s24, 0  ;;  %p3610_p0 = scmp.lt.s32.totalorder %s3961_s24, 4 }
  0x27   : > { %s4129_s28 = scalar_select %p72_p11, %s3957_s23, %s74_s5  }
  0x28   : > { %p83_p3 = por %p82_p13, %p81_p12  ;;  %p4133_p5 = por %p399_p2, %p81_p12 }
  0x29   : > { %5263 = sst [smem:[#allocation26_spill]] %s4129_s28  ;;  %s5234_s15 = sand.u32 1, %s3957_s23  }
  0x2a   : > { %s5264_s21 = scalar_select %p4133_p5, 1, 0 }
  0x2b   : > { %s4139_s14 = sshll.u32 %s3961_s24, 6  ;;  %s4143_s0 = sshll.u32 %s5234_s15, 6 }
  0x2c   : > { %5265 = sst [smem:[#allocation27_spill]] %s5264_s21  ;;  %p4145_p7 = pnand %p3610_p0, %p83_p3 }
  0x2d   : > { %s545_s5 = sand.u32 1, %s3961_s24   ;;  %s5267_s2 = sld [smem:[#allocation31_spill]] }
  0x2e   : > { %s549_s28 = scalar_lea.vmem [#allocation5], %s4143_s0  ;;  %s466_s12 = sshll.u32 %s5212_s7, 4  ;;  %s467_s12 = int_to_ptr.hbm [resolvable:$true] %s466_s12 }
  0x2f   : > { %s557_s26 = sshll.u32 %s549_s28, 4  ;;  %s4158_s10 = scalar_lea.sflag [#allocation6], %s545_s5  ;;  %s558_s26 = int_to_ptr.vmem [resolvable:$true] %s557_s26 }
  0x30   : > { %p3705_p9 = pneg %p4145_p7 }
  0x33   : > { %s554_s30 = scalar_lea.hbm %s5267_s2, %s4139_s14 }
  0x34   : > { %s555_s16 = sshll.u32 %s554_s30, 4  ;;  %s3708_s30 = scalar_lea.hbm %s5267_s2, 256  ;;  %s556_s16 = int_to_ptr.hbm [resolvable:$true] %s555_s16 }
  0x35   : > { %s3701_s8 = sshra.s32 %s556_s16, 4  ;;  %s3702_s8 = int_to_ptr.hbm [resolvable:$true] %s3701_s8 }
  0x36   : > { %s3703_s11 = scalar_lea.hbm %s3702_s8, 64  ;;  %p3709_p13 = scmp.lt.s32.totalorder %s3702_s8, %s5267_s2 }
  0x37   : > { %p3704_p2 = scmp.ne.s32.totalorder %s3702_s8, %s3703_s11  ;;  %p3710_p0 = scmp.lt.s32.totalorder %s3708_s30, %s3703_s11 }
  0x39   : > { %p3706_p11 = pnand %p3705_p9, %p3704_p2  ;;  %p3711_p3 = por %p3710_p0, %p3709_p13 }
  0x3b   : > { %p3707_p12 = pneg %p3706_p11 }
  0x3d   : > { %p3712_p1 = pnand %p3711_p3, %p3707_p12 }
  0x3f   : > { %3715 = shalt.err (!%p3712_p1)
}
  0x40   : > { %s5268_s15 = smov 4   ;;  %s5269_s21 = smov 64  }
  0x41   : > { %3596 = dma.hbm_to_vmem [thread:$0]  (!%p4145_p7), %s556_s16, 1024, %s558_s26, %s4158_s10, %s5269_s21, %s5269_s21, %s5268_s15  }
  0x42   : > { %s3966_s5 = smov [#allocation10]   ;;  %s495_s28 = sshll.u32 %s5218_s13, 4  ;;  %s496_s28 = int_to_ptr.hbm [resolvable:$true] %s495_s28 }
  0x43   : > { %s468_s24 = sshll.u32 %s3966_s5, 4  ;;  %s3967_s29 = smov [#allocation11]   ;;  %s469_s24 = int_to_ptr.vmem [resolvable:$true] %s468_s24 }
  0x44   : > { %3586 = dma.hbm_to_vmem [thread:$0]  (!%p4109_p10), %s467_s12, 5120, %s469_s24, [#allocation9], %s5269_s21, %s5269_s21, %s5268_s15  }
  0x45   : > { %s497_s30 = sshll.u32 %s3967_s29, 4  ;;  %s532_s18 = scalar_lea.hbm %s5206_s1, %s4139_s14  ;;  %s498_s30 = int_to_ptr.vmem [resolvable:$true] %s497_s30 }
  0x46   : > { %3589 = dma.hbm_to_vmem [thread:$0]  (!%p4109_p10), %s496_s28, 256, %s498_s30, [#allocation12], %s5269_s21, %s5269_s21, %s5268_s15  }
  0x47   : > { %s533_s5 = sshll.u32 %s532_s18, 4  ;;  %s527_s8 = scalar_lea.vmem [#allocation2], %s4143_s0  ;;  %s534_s5 = int_to_ptr.hbm [resolvable:$true] %s533_s5 }
  0x48   : > { %s535_s11 = sshll.u32 %s527_s8, 4  ;;  %s5270_s2 = sand.u32 1, %s3957_s23   ;;  %s536_s11 = int_to_ptr.vmem [resolvable:$true] %s535_s11 }
  0x49   : > { %s524_s12 = scalar_lea.sflag [#allocation3], %s5270_s2  ;;  %s3791_s24 = sshra.s32 %s534_s5, 4  ;;  %s3792_s24 = int_to_ptr.hbm [resolvable:$true] %s3791_s24 }
  0x4a   : > { %s3793_s29 = scalar_lea.hbm %s3792_s24, 64  ;;  %s3798_s26 = scalar_lea.hbm %s5206_s1, 256 }
  0x4b   : > { %p3794_p1 = scmp.ne.s32.totalorder %s3792_s24, %s3793_s29  ;;  %p3799_p10 = scmp.lt.s32.totalorder %s3792_s24, %s5206_s1 }
  0x4c   : > { %p3800_p12 = scmp.lt.s32.totalorder %s3798_s26, %s3793_s29 }
  0x4d   : > { %p3796_p2 = pnand %p3794_p1, %p3705_p9 }
  0x4e   : > { %p3801_p13 = por %p3800_p12, %p3799_p10 }
  0x4f   : > { %p3797_p11 = pneg %p3796_p2 }
  0x51   : > { %p3802_p0 = pnand %p3801_p13, %p3797_p11 }
  0x53   : > { %3805 = shalt.err (!%p3802_p0)
}
  0x54   : > { %3593 = dma.hbm_to_vmem [thread:$0]  (!%p4145_p7), %s534_s5, 1024, %s536_s11, %s524_s12, %s5269_s21, %s5269_s21, %s5268_s15  }
  0x55   : > { %s576_s8 = scalar_lea.hbm %s5208_s3, %s4139_s14  ;;  %s571_s16 = scalar_lea.vmem [#allocation7], %s4143_s0 }
  0x56   : > { %s577_s20 = sshll.u32 %s576_s8, 4  ;;  %s579_s24 = sshll.u32 %s571_s16, 4  ;;  %s578_s20 = int_to_ptr.hbm [resolvable:$true] %s577_s20  ;;  %s580_s24 = int_to_ptr.vmem [resolvable:$true] %s579_s24 }
  0x57   : > { %s3821_s29 = sshra.s32 %s578_s20, 4  ;;  %s3828_s5 = scalar_lea.hbm %s5208_s3, 256  ;;  %s3822_s29 = int_to_ptr.hbm [resolvable:$true] %s3821_s29 }
  0x58   : > { %s3823_s26 = scalar_lea.hbm %s3822_s29, 64  ;;  %p3829_p11 = scmp.lt.s32.totalorder %s3822_s29, %s5208_s3 }
  0x59   : > { %p3824_p3 = scmp.ne.s32.totalorder %s3822_s29, %s3823_s26  ;;  %p3830_p10 = scmp.lt.s32.totalorder %s3828_s5, %s3823_s26 }
  0x5b   : > { %p3826_p1 = pnand %p3824_p3, %p3705_p9  ;;  %p3831_p12 = por %p3830_p10, %p3829_p11 }
  0x5d   : > { %p3827_p2 = pneg %p3826_p1 }
  0x5f   : > { %p3832_p13 = pnand %p3831_p12, %p3827_p2 }
  0x61   : > { %3835 = shalt.err (!%p3832_p13)
}
  0x62   : > { %3599 = dma.hbm_to_vmem [thread:$0]  (!%p4145_p7), %s578_s20, 1024, %s580_s24, %s4158_s10, %s5269_s21, %s5269_s21, %s5268_s15  }
  0x63   : > { %601 = sbr.rel (%p4101_p8) target bundleno = 964 (0x3c4), region = 80 }
  0x68   : > { %s4234_s14 = sand.u32 1, %s3953_s22  }
  0x69   : > { %s3022_s0 = sshll.u32 %s4234_s14, 6  ;;  %s604_s2 = scalar_lea.sflag [#allocation3], %s4234_s14 }
  0x6a   : > { %s4238_s18 = scalar_lea.vmem [#allocation2], %s3022_s0 }
  0x6b   : > { %3924 = dma.done.wait (%p4088_p4), %s604_s2, 1024  }
  0x6c   : > { %3926 = vsyncadd (%p4088_p4), %s604_s2, 4294966272  ;;  %s613_s10 = sand.u32 1, %s4079_s25   ;;  %s4245_s19 = scalar_lea.vmem [#allocation5], %s3022_s0 }
  0x6d   : > { %s614_s17 = scalar_lea.sflag [#allocation6], %s613_s10 }
  0x6e   : > { %3928 = dma.done.wait (%p4088_p4), %s614_s17, 2048  }
  0x6f   : > { %3930 = vsyncadd (%p4088_p4), %s614_s17, 4294965248  ;;  %s4251_s15 = scalar_lea.vmem [#allocation7], %s3022_s0  ;;  %p5271_p8 = scmp.eq.s32.totalorder %s4079_s25, 0 }
  0x71   : > { %3932 = dma.done.wait (%p5271_p8), [#allocation9], 8192   ;;  %p5272_p7 = pmov %p5271_p8 }
  0x73   : > { %3934 = vsyncadd (%p5272_p7), [#allocation9], 4294959104  ;;  %p5273_p9 = pmov %p5272_p7 }
  0x74   : > { %p5274_p0 = pmov %p5272_p7 }
  0x75   : > { %3936 = dma.done.wait (%p5273_p9), [#allocation12], 256  }
  0x76   : > { %3938 = vsyncadd (%p5274_p0), [#allocation12], 4294967040  ;;  %s3030_s21 = sshll.u32 %s4079_s25, 1  ;;  %v3968_v0 = vmov 0   ;;  %s5275_s16 = sld [smem:[#allocation30_spill]]  ;;  %v3407_v3 = vld [vmem:[#allocation8 + $0xb8] sm:$0xff] }
  0x77   : > { %3658 = vset.pattern.permute.xlu1 %v3968_v0  ;;  %3657 = vset.pattern.permute.xlu0 %v3968_v0  ;;  %p719_p4 = scmp.lt.s32.totalorder %s3030_s21, 7  ;;  %v3391_v7 = vld [vmem:[#allocation8 + $0x38] sm:$0xff]  ;;  %v3406_v12 = vld [vmem:[#allocation8 + $0xb0] sm:$0xff]  ;;  %v3405_v24 = vld [vmem:[#allocation8 + $0xa8] sm:$0xff]  ;;  %vm1674_vm1 = vcmask 1041409   ;;  %vm1676_vm2 = vcmask 1042434  }
  0x78   : > { %3659 = vset.pattern.permute.xlu2 %v3968_v0  ;;  %1988 = vmatpush.bf16.msra.mxu2 %v3407_v3  ;;  %v3399_v11 = vld [vmem:[#allocation8 + $0x78] sm:$0xff]  ;;  %v3390_v18 = vld [vmem:[#allocation8 + $0x30] sm:$0xff]  ;;  %v3471_v25 = vld [vmem:[%s4245_s19] sm:$0xff]   ;;  %vm1678_vm3 = vcmask 1043459   ;;  %vm1680_vm4 = vcmask 1044484   ;;  %vm1682_vm5 = vcmask 1045509  }
  0x79   : > { %s5362_s21 = smov (!%p719_p4, %s3030_s21), 7  ;;  %1960 = vmatpush.bf16.msra.mxu0 %v3391_v7  ;;  %1974 = vmatpush.bf16.msra.mxu1 %v3399_v11  ;;  %v3398_v19 = vld [vmem:[#allocation8 + $0x70] sm:$0xff]  ;;  %v3544_v30 = vld [vmem:[%s4245_s19 + $0x8] sm:$0xff]   ;;  %v3472_v35 = vunpack.c.l.bf16 %v3471_v25  ;;  %v3473_v37 = vunpack.c.h.bf16 %v3471_v25  ;;  %v4313_v41 = vld [vmem:[%s4245_s19 + $0x20] sm:$0xff]   ;;  %vm1684_vm6 = vcmask 1046534   ;;  %vm1686_vm7 = vcmask 1047559  }
  0x7a   : > { %s3031_s27 = sshll.u32 %s5362_s21, 3  ;;  %v3389_v34 = vld [vmem:[#allocation8 + $0x28] sm:$0xff]  ;;  %v3545_v36 = vld [vmem:[%s4245_s19 + $0x10] sm:$0xff]   ;;  %v3476_v38 = vunpack.c.l.bf16 %v3544_v30  ;;  %v3477_v39 = vunpack.c.h.bf16 %v3544_v30  ;;  %v3404_v45 = vld [vmem:[#allocation8 + $0xa0] sm:$0xff]  ;;  %v3488_v55 = vunpack.c.l.bf16 %v4313_v41  ;;  %s5345_s20 = sld [smem:[#allocation35_spill]] }
  0x7b   : > { %v3480_v40 = vunpack.c.l.bf16 %v3545_v36  ;;  %v3397_v44 = vld [vmem:[#allocation8 + $0x68] sm:$0xff]  ;;  %v3481_v46 = vunpack.c.h.bf16 %v3545_v36  ;;  %v3546_v47 = vld [vmem:[%s4245_s19 + $0x18] sm:$0xff]   ;;  %v3388_v53 = vld [vmem:[#allocation8 + $0x20] sm:$0xff]  ;;  %v1283_v56 = vrot.slane %v3472_v35, 4  ;;  %v1289_v57 = vrot.slane %v3473_v37, 4  ;;  %s732_s28 = scalar_lea.vmem %s5209_s4, %s3031_s27  ;;  %s5347_s12 = sld [smem:[#allocation34_spill]] }
  0x7c   : > { %s722_s24 = scalar_lea.vmem %s5275_s16, %s3031_s27  ;;  %1989 = vmatpush.bf16.msra.mxu2 %v3406_v12  ;;  %v3484_v51 = vunpack.c.l.bf16 %v3546_v47  ;;  %v3485_v54 = vunpack.c.h.bf16 %v3546_v47  ;;  %v1295_v58 = vrot.slane %v3476_v38, 4  ;;  %v1301_v59 = vrot.slane %v3477_v39, 4  ;;  %v3396_v61 = vld [vmem:[#allocation8 + $0x60] sm:$0xff]  ;;  %v3403_v62 = vld [vmem:[#allocation8 + $0x98] sm:$0xff]  ;;  %v3548_v30 = vld [vmem:[%s4245_s19 + $0x28] sm:$0xff]   ;;  %s3468_s17 = sshll.u32 %s4079_s25, 3 }
  0x7d   : > { %v4270_v1 = vld [vmem:[%s722_s24 + $0x8] sm:$0xff]  ;;  %v4272_v2 = vld [vmem:[%s722_s24] sm:$0xff]  ;;  %1961 = vmatpush.bf16.msra.mxu0 %v3390_v18  ;;  %1975 = vmatpush.bf16.msra.mxu1 %v3398_v19  ;;  %v1307_v60 = vrot.slane %v3480_v40, 4  ;;  %v1284_v63 = vadd.f32 %v3472_v35, %v1283_v56  ;;  %v1313_v0 = vrot.slane %v3481_v46, 4  ;;  %v1290_v7 = vadd.f32 %v3473_v37, %v1289_v57  ;;  %v3387_v11 = vld [vmem:[#allocation8 + $0x18] sm:$0xff]  ;;  %s5350_s8 = sld [smem:[#allocation39_spill]] }
  0x7e   : > { %v5238_v4 = vperm.slane %v4270_v1, 0  ;;  %v803_v5 = vperm.slane %v4272_v2, 0  ;;  %v790_v6 = vrot.slane %v4272_v2, 2  ;;  %v796_v8 = vrot.slane %v4270_v1, 1  ;;  %v3549_v35 = vld [vmem:[%s4245_s19 + $0x30] sm:$0xff]   ;;  %v4339_v36 = vld [vmem:[%s4245_s19 + $0x38] sm:$0xff]  }
  0x7f   : > { %v789_v9 = vrot.slane %v4272_v2, 1  ;;  %v797_v10 = vrot.slane %v4270_v1, 2  ;;  %v798_v14 = vrot.slane %v4270_v1, 3  ;;  %v791_v15 = vrot.slane %v4272_v2, 3  ;;  %v3394_v56 = vld [vmem:[#allocation8 + $0x50] sm:$0xff]  ;;  %v3401_v57 = vld [vmem:[#allocation8 + $0x88] sm:$0xff] }
  0x80   : > { %844 = vperm.xlu1 %3658, %v5238_v4   ;;  %820 = vperm.xlu0 %3657, %v803_v5   ;;  %v4284_v13 = vperm.slane %v790_v6, 0  ;;  %v792_v16 = vrot.slane %v4272_v2, 4  ;;  %v793_v17 = vrot.slane %v4272_v2, 5  ;;  %v4291_v20 = vperm.slane %v796_v8, 0  ;;  %s2772_s26 = scalar_lea.sflag [#allocation15], %s4234_s14 }
  0x81   : > { %v4293_v21 = vperm.slane %v789_v9, 0  ;;  %v4295_v22 = vperm.slane %v797_v10, 0  ;;  %v799_v23 = vrot.slane %v4270_v1, 4  ;;  %v4299_v26 = vperm.slane %v798_v14, 0  ;;  %1990 = vmatpush.bf16.msra.mxu2 %v3405_v24  ;;  %1962 = vmatpush.bf16.msra.mxu0 %v3389_v34 }
  0x82   : > { %826 = vperm.xlu2 %3659, %v4284_v13   ;;  %v4301_v27 = vperm.slane %v791_v15, 0  ;;  %v800_v28 = vrot.slane %v4270_v1, 5  ;;  %v801_v29 = vrot.slane %v4270_v1, 6  ;;  %v4306_v31 = vperm.slane %v792_v16, 0  ;;  %1976 = vmatpush.bf16.msra.mxu1 %v3397_v44 }
  0x83   : > { %v4308_v32 = vperm.slane %v793_v17, 0  ;;  %v794_v33 = vrot.slane %v4272_v2, 6  ;;  %v4315_v42 = vperm.slane %v799_v23, 0  ;;  %v795_v43 = vrot.slane %v4272_v2, 7  ;;  %s2800_s16 = scalar_lea.hbm %s5350_s8, %s3468_s17  ;;  %s3871_s25 = scalar_lea.hbm %s5350_s8, 32 }
  0x84   : > { %v4321_v48 = vperm.slane %v800_v28, 0  ;;  %v4323_v49 = vperm.slane %v801_v29, 0  ;;  %v802_v50 = vrot.slane %v4270_v1, 7  ;;  %v1319_v3 = vrot.slane %v3484_v51, 4  ;;  %v3395_v28 = vld [vmem:[#allocation8 + $0x58] sm:$0xff]  ;;  %v3402_v29 = vld [vmem:[#allocation8 + $0x90] sm:$0xff] }
  0x85   : > { %v4326_v52 = vperm.slane %v794_v33, 0  ;;  %1991 = vmatpush.bf16.msra.mxu2 %v3404_v45  ;;  %v1325_v6 = vrot.slane %v3485_v54, 4  ;;  %v1296_v8 = vadd.f32 %v3476_v38, %v1295_v58  ;;  %v1302_v9 = vadd.f32 %v3477_v39, %v1301_v59  ;;  %1963 = vmatpush.bf16.msra.mxu0 %v3388_v53  ;;  %s2803_s29 = sshll.u32 %s2800_s16, 4  ;;  %s2804_s29 = int_to_ptr.hbm [resolvable:$true] %s2803_s29 }
  0x86   : > { %v1308_v10 = vadd.f32 %v3480_v40, %v1307_v60  ;;  %1977 = vmatpush.bf16.msra.mxu1 %v3396_v61  ;;  %v1285_v12 = vrot.slane %v1284_v63, 2  ;;  %v1314_v14 = vadd.f32 %v3481_v46, %v1313_v0  ;;  %v1320_v15 = vadd.f32 %v3484_v51, %v1319_v3 }
  0x87   : > { %v1326_v16 = vadd.f32 %v3485_v54, %v1325_v6  ;;  %v1291_v17 = vrot.slane %v1290_v7, 2  ;;  %v1297_v18 = vrot.slane %v1296_v8, 2  ;;  %v1303_v19 = vrot.slane %v1302_v9, 2  ;;  %v3385_v6 = vld [vmem:[#allocation8 + $0x8] sm:$0xff] }
  0x88   : > { %847 = vperm.xlu1 %3658, %v4291_v20   ;;  %823 = vperm.xlu0 %3657, %v4293_v21   ;;  %v1309_v23 = vrot.slane %v1308_v10, 2  ;;  %v4330_v24 = vperm.slane %v795_v43, 0  ;;  %v4332_v25 = vperm.slane %v802_v50, 0  ;;  %v1286_v33 = vadd.f32 %v1285_v12, %v1284_v63  ;;  %v3386_v43 = vld [vmem:[#allocation8 + $0x10] sm:$0xff] }
  0x89   : > { %1992 = vmatpush.bf16.msra.mxu2 %v3403_v62  ;;  %v1315_v34 = vrot.slane %v1314_v14, 2  ;;  %v4341_v37 = vadd.f32 %v1291_v17, %v1290_v7  ;;  %v4343_v38 = vadd.f32 %v1297_v18, %v1296_v8  ;;  %v4345_v39 = vadd.f32 %v1303_v19, %v1302_v9  ;;  %1964 = vmatpush.bf16.msra.mxu0 %v3387_v11  ;;  %v3393_v7 = vld [vmem:[#allocation8 + $0x48] sm:$0xff] }
  0x8a   : > { %850 = vperm.xlu2 %3659, %v4295_v22   ;;  %5276 = vst [vmem:[#allocation28_spill] sm:$0xff] %v4332_v25  ;;  %v1321_v40 = vrot.slane %v1320_v15, 2  ;;  %1978 = vmatpush.bf16.msra.mxu1 %v3395_v28  ;;  %v3489_v44 = vunpack.c.h.bf16 %v4313_v41  ;;  %v1287_v45 = vrot.slane %v1286_v33, 1  ;;  %v4348_v46 = vadd.f32 %v1309_v23, %v1308_v10  ;;  %v3384_v41 = vld [vmem:[#allocation8] sm:$0xff] }
  0x8b   : > { %v1327_v47 = vrot.slane %v1326_v16, 2  ;;  %v3492_v50 = vunpack.c.l.bf16 %v3548_v30  ;;  %v3493_v51 = vunpack.c.h.bf16 %v3548_v30  ;;  %v4351_v53 = vadd.f32 %v1315_v34, %v1314_v14 }
  0x8c   : > { %v1331_v54 = vrot.slane %v3488_v55, 4  ;;  %v3496_v58 = vunpack.c.l.bf16 %v3549_v35  ;;  %v3497_v59 = vunpack.c.h.bf16 %v3549_v35  ;;  %v3500_v60 = vunpack.c.l.bf16 %v4339_v36 }
  0x8d   : > { %1993 = vmatpush.bf16.msra.mxu2 %v3402_v29  ;;  %v3501_v61 = vunpack.c.h.bf16 %v4339_v36  ;;  %v1293_v62 = vrot.slane %v4341_v37, 1  ;;  %v1299_v63 = vrot.slane %v4343_v38, 1  ;;  %v1305_v0 = vrot.slane %v4345_v39, 1  ;;  %1965 = vmatpush.bf16.msra.mxu0 %v3386_v43 }
  0x8e   : > { %v4360_v3 = vadd.f32 %v1321_v40, %v1320_v15  ;;  %1979 = vmatpush.bf16.msra.mxu1 %v3394_v56  ;;  %v4362_v8 = vadd.f32 %v1287_v45, %v1286_v33  ;;  %v1311_v9 = vrot.slane %v4348_v46, 1  ;;  %v4365_v10 = vadd.f32 %v1327_v47, %v1326_v16  ;;  %v3400_v15 = vld [vmem:[#allocation8 + $0x80] sm:$0xff] }
  0x8f   : > { %v1337_v11 = vrot.slane %v3489_v44, 4  ;;  %v1317_v12 = vrot.slane %v4351_v53, 1  ;;  %v1332_v14 = vadd.f32 %v3488_v55, %v1331_v54  ;;  %v1343_v17 = vrot.slane %v3492_v50, 4 }
  0x90   : > { %853 = vperm.xlu1 %3658, %v4299_v26   ;;  %829 = vperm.xlu0 %3657, %v4301_v27   ;;  %v1349_v18 = vrot.slane %v3493_v51, 4  ;;  %v1355_v23 = vrot.slane %v3496_v58, 4  ;;  %v1361_v28 = vrot.slane %v3497_v59, 4  ;;  %v1367_v29 = vrot.slane %v3500_v60, 4 }
  0x91   : > { %1994 = vmatpush.bf16.msra.mxu2 %v3401_v57  ;;  %v1338_v19 = vadd.f32 %v3489_v44, %v1337_v11  ;;  %v1333_v16 = vrot.slane %v1332_v14, 2  ;;  %v1344_v30 = vadd.f32 %v3492_v50, %v1343_v17  ;;  %v1373_v34 = vrot.slane %v3501_v61, 4  ;;  %1966 = vmatpush.bf16.msra.mxu0 %v3385_v6  ;;  %v3392_v17 = vld [vmem:[#allocation8 + $0x40] sm:$0xff] }
  0x92   : > { %832 = vperm.xlu2 %3659, %v4306_v31   ;;  %v1350_v33 = vadd.f32 %v3493_v51, %v1349_v18  ;;  %1980 = vmatpush.bf16.msra.mxu1 %v3393_v7  ;;  %v1356_v35 = vadd.f32 %v3496_v58, %v1355_v23  ;;  %v1362_v36 = vadd.f32 %v3497_v59, %v1361_v28  ;;  %v1323_v51 = vrot.slane %v4360_v3, 1 }
  0x93   : > { %v1339_v55 = vrot.slane %v1338_v19, 2  ;;  %v1368_v40 = vadd.f32 %v3500_v60, %v1367_v29  ;;  %v1334_v43 = vadd.f32 %v1333_v16, %v1332_v14  ;;  %v1345_v44 = vrot.slane %v1344_v30, 2 }
  0x94   : > { %v1351_v45 = vrot.slane %v1350_v33, 2  ;;  %v1374_v47 = vadd.f32 %v3501_v61, %v1373_v34  ;;  %v1357_v56 = vrot.slane %v1356_v35, 2  ;;  %v1363_v57 = vrot.slane %v1362_v36, 2 }
  0x95   : > { %1995 = vmatpush.bf16.msra.mxu2 %v3400_v15  ;;  %v1340_v54 = vadd.f32 %v1339_v55, %v1338_v19  ;;  %v1369_v50 = vrot.slane %v1368_v40, 2  ;;  %v1346_v6 = vadd.f32 %v1345_v44, %v1344_v30  ;;  %1967 = vmatpush.bf16.msra.mxu0 %v3384_v41  ;;  %v4375_v58 = vadd.f32 %v1293_v62, %v4341_v37  ;;  %v4422_v44 = vld [vmem:[%s4251_s15 + $0x20] sm:$0xff]  }
  0x96   : > { %v1352_v7 = vadd.f32 %v1351_v45, %v1350_v33  ;;  %v1375_v11 = vrot.slane %v1374_v47, 2  ;;  %v1358_v59 = vadd.f32 %v1357_v56, %v1356_v35  ;;  %v1364_v60 = vadd.f32 %v1363_v57, %v1362_v36  ;;  %1981 = vmatpush.bf16.msra.mxu1 %v3392_v17  ;;  %v3503_v35 = vld [vmem:[%s4251_s15] sm:$0xff]   ;;  %v4432_v56 = vld [vmem:[%s4251_s15 + $0x30] sm:$0xff]  }
  0x97   : > { %v1370_v14 = vadd.f32 %v1369_v50, %v1368_v40  ;;  %v1329_v61 = vrot.slane %v4365_v10, 1  ;;  %v1335_v18 = vrot.slane %v1334_v43, 1  ;;  %v1341_v15 = vrot.slane %v1340_v54, 1 }
  0x98   : > { %835 = vperm.xlu1 %3658, %v4308_v32   ;;  %856 = vperm.xlu0 %3657, %v4315_v42   ;;  %v1376_v19 = vadd.f32 %v1375_v11, %v1374_v47  ;;  %v1347_v23 = vrot.slane %v1346_v6, 1  ;;  %v1353_v28 = vrot.slane %v1352_v7, 1  ;;  %v1359_v29 = vrot.slane %v1358_v59, 1 }
  0x99   : > { %v1365_v16 = vrot.slane %v1364_v60, 1  ;;  %v4383_v37 = vadd.f32 %v1299_v63, %v4343_v38  ;;  %v1371_v62 = vrot.slane %v1370_v14, 1  ;;  %v4388_v33 = vadd.f32 %v1305_v0, %v4345_v39  ;;  %v3552_v0 = vld [vmem:[%s4251_s15 + $0x10] sm:$0xff]  }
  0x9a   : > { %859 = vperm.xlu2 %3659, %v4321_v48   ;;  %v1377_v30 = vrot.slane %v1376_v19, 1  ;;  %v4391_v34 = vadd.f32 %v1311_v9, %v4348_v46  ;;  %v4394_v41 = vadd.f32 %v1317_v12, %v4351_v53  ;;  %v3969_v55 = vmov 8.0   ;;  %v3551_v53 = vld [vmem:[%s4251_s15 + $0x8] sm:$0xff]  }
  0x9b   : > { %3668 = vrcp.f32 %v3969_v55  ;;  %v4399_v38 = vadd.f32 %v1323_v51, %v4360_v3  ;;  %v4402_v39 = vadd.f32 %v1329_v61, %v4365_v10  ;;  %v4404_v46 = vadd.f32 %v1335_v18, %v1334_v43  ;;  %v4419_v3 = vld [vmem:[%s4251_s15 + $0x18] sm:$0xff]  }
  0x9c   : > { %v4406_v63 = vadd.f32 %v1341_v15, %v1340_v54  ;;  %v4410_v9 = vadd.f32 %v1347_v23, %v1346_v6  ;;  %v4412_v12 = vadd.f32 %v1353_v28, %v1352_v7  ;;  %v4414_v36 = vadd.f32 %v1359_v29, %v1358_v59  ;;  %v4429_v54 = vld [vmem:[%s4251_s15 + $0x28] sm:$0xff]  }
  0x9d   : > { %v4416_v40 = vadd.f32 %v1365_v16, %v1364_v60  ;;  %v4424_v10 = vadd.f32 %v1371_v62, %v1370_v14  ;;  %v4426_v43 = vadd.f32 %v1377_v30, %v1376_v19  ;;  %v3504_v45 = vunpack.c.l.bf16 %v3503_v35 }
  0x9e   : > { %v3505_v47 = vunpack.c.h.bf16 %v3503_v35  ;;  %v3508_v57 = vunpack.c.l.bf16 %v3551_v53  ;;  %v3509_v50 = vunpack.c.h.bf16 %v3551_v53  ;;  %v3512_v51 = vunpack.c.l.bf16 %v3552_v0 }
  0x9f   : > { %v3513_v6 = vunpack.c.h.bf16 %v3552_v0  ;;  %v3516_v7 = vunpack.c.l.bf16 %v4419_v3  ;;  %v3970_v19 = vmov 1   ;;  %v1418_v28 = vrot.slane %v3504_v45, 4 }
  0xa0   : > { %862 = vperm.xlu1 %3658, %v4323_v49   ;;  %838 = vperm.xlu0 %3657, %v4326_v52   ;;  %v1424_v29 = vrot.slane %v3505_v47, 4  ;;  %v1430_v16 = vrot.slane %v3508_v57, 4  ;;  %v1436_v62 = vrot.slane %v3509_v50, 4  ;;  %v1442_v30 = vrot.slane %v3512_v51, 4 }
  0xa1   : > { %v3669_v14 = vpop.eup %3668  ;;  %v1448_v55 = vrot.slane %v3513_v6, 4  ;;  %v1419_v53 = vadd.f32 %v3504_v45, %v1418_v28  ;;  %v1454_v15 = vrot.slane %v3516_v7, 4 }
  0xa2   : > { %841 = vperm.xlu2 %3659, %v4330_v24   ;;  %v1380_v23 = vmul.f32 8.0, %v3669_v14  ;;  %vm1384_vm0 = vweird.f32 %v3669_v14  ;;  %v1425_v0 = vadd.f32 %v3505_v47, %v1424_v29  ;;  %v1431_v18 = vadd.f32 %v3508_v57, %v1430_v16 }
  0xa3   : > { %v1437_v61 = vadd.f32 %v3509_v50, %v1436_v62  ;;  %v1443_v17 = vadd.f32 %v3512_v51, %v1442_v30  ;;  %v1449_v60 = vadd.f32 %v3513_v6, %v1448_v55  ;;  %v1420_v59 = vrot.slane %v1419_v53, 2 }
  0xa4   : > { %v1381_v35 = vsub.f32 1.0, %v1380_v23  ;;  %v1426_v11 = vrot.slane %v1425_v0, 2  ;;  %v1455_v4 = vadd.f32 %v3516_v7, %v1454_v15  ;;  %v1432_v23 = vrot.slane %v1431_v18, 2 }
  0xa5   : > { %v1444_v45 = vrot.slane %v1443_v17, 2  ;;  %v1450_v47 = vrot.slane %v1449_v60, 2 }
  0xa6   : > { %v1382_v2 = vmul.f32 %v3669_v14, %v1381_v35  ;;  %v1427_v29 = vadd.f32 %v1426_v11, %v1425_v0  ;;  %v1456_v57 = vrot.slane %v1455_v4, 2  ;;  %v1433_v6 = vadd.f32 %v1432_v23, %v1431_v18 }
  0xa7   : > { %v1445_v62 = vadd.f32 %v1444_v45, %v1443_v17  ;;  %v4454_v30 = vadd.f32 %v1450_v47, %v1449_v60  ;;  %v5277_v11 = vperm.slane %v4270_v1, 0  ;;  %v5278_v47 = vunpack.c.h.bf16 %v4419_v3 }
  0xa8   : > { %3660 = vset.pattern.permute.xlu1 %v3970_v19  ;;  %865 = vperm.xlu0 %3657, %v4332_v25   ;;  %v1438_v25 = vrot.slane %v1437_v61, 2  ;;  %v1383_v28 = vadd.f32 %v3669_v14, %v1382_v2  ;;  %v4463_v18 = vadd.f32 %v1456_v57, %v1455_v4  ;;  %v1434_v1 = vrot.slane %v1433_v6, 1 }
  0xa9   : > { %1044 = vperm.xlu1 %3660, %v803_v5   ;;  %v4447_v5 = vld [vmem:[%s4251_s15 + $0x38] sm:$0xff]   ;;  %v1446_v35 = vrot.slane %v1445_v62, 1  ;;  %v1452_v45 = vrot.slane %v4454_v30, 1  ;;  %v5285_v3 = vunpack.c.h.bf16 %v4432_v56  ;;  %s3028_s15 = sshll.u32 %s4234_s14, 3 }
  0xaa   : > { %3661 = vset.pattern.permute.xlu2 %v3970_v19  ;;  %v3532_v50 = vunpack.c.l.bf16 %v4447_v5  ;;  %v3533_v51 = vunpack.c.h.bf16 %v4447_v5  ;;  %v1439_v16 = vadd.f32 %v1438_v25, %v1437_v61  ;;  %v4452_v7 = vsel %vm1384_vm0, %v3669_v14, %v1383_v28  ;;  %s5126_s21 = scalar_lea.vmem [#allocation14], %s3028_s15 }
  0xab   : > { %1047 = vperm.xlu2 %3661, %v4293_v21   ;;  %v1421_v21 = vadd.f32 %v1420_v59, %v1419_v53  ;;  %v1386_v59 = vmul.f32 %v4452_v7, %v4362_v8  ;;  %v1387_v25 = vmul.f32 %v4452_v7, %v4375_v58  ;;  %v1428_v61 = vrot.slane %v1427_v29, 1  ;;  %s2801_s24 = sshll.u32 %s5126_s21, 4  ;;  %s2802_s24 = int_to_ptr.vmem [resolvable:$true] %s2801_s24 }
  0xac   : > { %v1388_v14 = vmul.f32 %v4452_v7, %v4383_v37  ;;  %v1389_v60 = vmul.f32 %v4452_v7, %v4388_v33  ;;  %v1391_v8 = vmul.f32 %v4452_v7, %v4394_v41  ;;  %v1394_v58 = vmul.f32 %v4452_v7, %v4404_v46 }
  0xad   : > { %v1422_v15 = vrot.slane %v1421_v21, 1  ;;  %v1395_v4 = vmul.f32 %v4452_v7, %v4406_v63  ;;  %v1396_v37 = vmul.f32 %v4452_v7, %v4410_v9  ;;  %v1392_v33 = vmul.f32 %v4452_v7, %v4399_v38 }
  0xae   : > { %v1398_v41 = vmul.f32 %v4452_v7, %v4414_v36  ;;  %v1399_v46 = vmul.f32 %v4452_v7, %v4416_v40  ;;  %v1400_v63 = vmul.f32 %v4452_v7, %v4424_v10  ;;  %v1745_v9 = vsel %vm1674_vm1, %v1387_v25, %v1386_v59 }
  0xaf   : > { %v1752_v17 = vsel %vm1674_vm1, %v1395_v4, %v1394_v58  ;;  %v1401_v38 = vmul.f32 %v4452_v7, %v4426_v43  ;;  %v1440_v55 = vrot.slane %v1439_v16, 1  ;;  %v4504_v0 = vadd.f32 %v1428_v61, %v1427_v29 }
  0xb0   : > { %3662 = vset.pattern.permute.xlu0 %v3970_v19  ;;  %v4498_v19 = vadd.f32 %v1422_v15, %v1421_v21  ;;  %v4506_v2 = vadd.f32 %v1434_v1, %v1433_v6  ;;  %v1460_v28 = vrot.slane %v5278_v47, 4  ;;  %v1458_v6 = vrot.slane %v4463_v18, 1 }
  0xb1   : > { %1071 = vperm.xlu1 %3660, %v4291_v20   ;;  %1068 = vperm.xlu0 %3662, %v5277_v11   ;;  %v1390_v20 = vmul.f32 %v4452_v7, %v4391_v34  ;;  %v1393_v34 = vmul.f32 %v4452_v7, %v4402_v39  ;;  %v1746_v39 = vsel %vm1676_vm2, %v1388_v14, %v1745_v9  ;;  %v5280_v61 = vunpack.c.l.bf16 %v4422_v44 }
  0xb2   : > { %v1747_v36 = vsel %vm1678_vm3, %v1389_v60, %v1746_v39  ;;  %v4517_v57 = vadd.f32 %v1440_v55, %v1439_v16  ;;  %v4523_v15 = vadd.f32 %v1446_v35, %v1445_v62  ;;  %v5279_v11 = vmov %v5278_v47 }
  0xb3   : > { %1050 = vperm.xlu2 %3661, %v4284_v13   ;;  %v1397_v13 = vmul.f32 %v4452_v7, %v4412_v12  ;;  %v1753_v12 = vsel %vm1676_vm2, %v1396_v37, %v1752_v17  ;;  %v1748_v10 = vsel %vm1680_vm4, %v1390_v20, %v1747_v36  ;;  %v1461_v59 = vadd.f32 %v5279_v11, %v1460_v28 }
  0xb4   : > { %v1749_v43 = vsel %vm1682_vm5, %v1391_v8, %v1748_v10  ;;  %v1466_v14 = vrot.slane %v5280_v61, 4  ;;  %v5281_v16 = vunpack.c.h.bf16 %v4422_v44  ;;  %v5282_v20 = vunpack.c.l.bf16 %v4429_v54 }
  0xb5   : > { %v1754_v40 = vsel %vm1678_vm3, %v1397_v13, %v1753_v12  ;;  %v1750_v21 = vsel %vm1684_vm6, %v1392_v33, %v1749_v43  ;;  %v5283_v8 = vunpack.c.h.bf16 %v4429_v54  ;;  %v5284_v62 = vunpack.c.l.bf16 %v4432_v56 }
  0xb6   : > { %v1755_v53 = vsel %vm1680_vm4, %v1398_v41, %v1754_v40  ;;  %v1472_v60 = vrot.slane %v5281_v16, 4  ;;  %v1478_v1 = vrot.slane %v5282_v20, 4  ;;  %v1496_v37 = vrot.slane %v5285_v3, 4 }
  0xb7   : > { %v1756_v23 = vsel %vm1682_vm5, %v1399_v46, %v1755_v53  ;;  %v1484_v58 = vrot.slane %v5283_v8, 4  ;;  %v1490_v4 = vrot.slane %v5284_v62, 4  ;;  %v5286_v33 = vmov %v5280_v61 }
  0xb8   : > { %v1757_v29 = vsel %vm1684_vm6, %v1400_v63, %v1756_v23  ;;  %v5287_v13 = vmov %v5281_v16  ;;  %v5288_v46 = vmov %v5282_v20  ;;  %v1502_v9 = vrot.slane %v3532_v50, 4 }
  0xb9   : > { %1074 = vperm.xlu1 %3660, %v4295_v22   ;;  %1077 = vperm.xlu0 %3662, %v4299_v26   ;;  %v1751_v22 = vsel %vm1686_vm7, %v1393_v34, %v1750_v21  ;;  %v1758_v26 = vsel %vm1686_vm7, %v1401_v38, %v1757_v29  ;;  %v1467_v34 = vadd.f32 %v5286_v33, %v1466_v14 }
  0xba   : > { %v1763_v25 = vpack.c.bf16 %v1758_v26, %v1751_v22  ;;  %v1473_v41 = vadd.f32 %v5287_v13, %v1472_v60  ;;  %v1479_v63 = vadd.f32 %v5288_v46, %v1478_v1  ;;  %v5289_v38 = vmov %v5283_v8 }
  0xbb   : > { %1053 = vperm.xlu2 %3661, %v4301_v27   ;;  %v1462_v27 = vrot.slane %v1461_v59, 2  ;;  %v1485_v39 = vadd.f32 %v5289_v38, %v1484_v58  ;;  %v5290_v12 = vmov %v5284_v62  ;;  %v5291_v40 = vmov %v5285_v3 }
  0xbc   : > { %1996 = vmatmul.bf16.vlgmr.msra.gmra.mxu2 %v1763_v25  ;;  %v1491_v36 = vadd.f32 %v5290_v12, %v1490_v4  ;;  %v1497_v55 = vadd.f32 %v5291_v40, %v1496_v37  ;;  %v1468_v35 = vrot.slane %v1467_v34, 2  ;;  %v1474_v10 = vrot.slane %v1473_v41, 2  ;;  %v4597_v12 = vld [vmem:[%s4238_s18 + $0x8] sm:$0xf] }
  0xbd   : > { %v1463_v17 = vadd.f32 %v1462_v27, %v1461_v59  ;;  %v1480_v44 = vrot.slane %v1479_v63, 2  ;;  %v1503_v53 = vadd.f32 %v3532_v50, %v1502_v9  ;;  %v1453_v43 = vadd.f32 %v1452_v45, %v4454_v30  ;;  %v4591_v9 = vld [vmem:[%s4238_s18 + $0x4] sm:$0xf] }
  0xbe   : > { %v1486_v23 = vrot.slane %v1485_v39, 2  ;;  %v1492_v47 = vrot.slane %v1491_v36, 2  ;;  %v1498_v28 = vrot.slane %v1497_v55, 2  ;;  %v1469_v54 = vadd.f32 %v1468_v35, %v1467_v34 }
  0xbf   : > { %v1475_v21 = vadd.f32 %v1474_v10, %v1473_v41  ;;  %v1481_v29 = vadd.f32 %v1480_v44, %v1479_v63  ;;  %v1504_v56 = vrot.slane %v1503_v53, 2  ;;  %v1464_v22 = vrot.slane %v1463_v17, 1  ;;  %v4583_v41 = vld [vmem:[%s4238_s18] sm:$0xf]  ;;  %v4606_v10 = vld [vmem:[%s4238_s18 + $0x10] sm:$0xf] }
  0xc0   : > { %v1487_v26 = vadd.f32 %v1486_v23, %v1485_v39  ;;  %v1493_v11 = vadd.f32 %v1492_v47, %v1491_v36  ;;  %v1499_v59 = vadd.f32 %v1498_v28, %v1497_v55  ;;  %v1470_v50 = vrot.slane %v1469_v54, 1  ;;  %v4600_v36 = vld [vmem:[%s4238_s18 + $0xc] sm:$0xf]  ;;  %v4612_v47 = vld [vmem:[%s4238_s18 + $0x14] sm:$0xf] }
  0xc1   : > { %1056 = vperm.xlu1 %3660, %v4306_v31   ;;  %1059 = vperm.xlu0 %3662, %v4308_v32   ;;  %v1476_v25 = vrot.slane %v1475_v21, 1  ;;  %v1482_v30 = vrot.slane %v1481_v29, 1  ;;  %v1505_v45 = vadd.f32 %v1504_v56, %v1503_v53  ;;  %v1508_v31 = vrot.slane %v3533_v51, 4  ;;  %v4615_v28 = vld [vmem:[%s4238_s18 + $0x18] sm:$0xf] }
  0xc2   : > { %v1488_v61 = vrot.slane %v1487_v26, 1  ;;  %v1494_v14 = vrot.slane %v1493_v11, 1  ;;  %v1500_v16 = vrot.slane %v1499_v59, 1  ;;  %v1459_v32 = vadd.f32 %v1458_v6, %v4463_v18  ;;  %5292 = vst [vmem:[#allocation29_spill] sm:$0xff] %v4615_v28 }
  0xc3   : > { %1080 = vperm.xlu2 %3661, %v4315_v42   ;;  %v1471_v60 = vadd.f32 %v1470_v50, %v1469_v54  ;;  %v1477_v20 = vadd.f32 %v1476_v25, %v1475_v21  ;;  %v1506_v1 = vrot.slane %v1505_v45, 1  ;;  %v1483_v27 = vadd.f32 %v1482_v30, %v1481_v29  ;;  %v4618_v54 = vld [vmem:[%s4238_s18 + $0x1c] sm:$0xf]  ;;  %v4632_v30 = vld [vmem:[%s4238_s18 + $0x24] sm:$0xf] }
  0xc4   : > { %v1489_v8 = vadd.f32 %v1488_v61, %v1487_v26  ;;  %v1495_v58 = vadd.f32 %v1494_v14, %v1493_v11  ;;  %v1509_v42 = vadd.f32 %v3533_v51, %v1508_v31  ;;  %v1465_v62 = vadd.f32 %v1464_v22, %v1463_v17  ;;  %v4624_v22 = vld [vmem:[%s4238_s18 + $0x20] sm:$0xf]  ;;  %v4638_v61 = vld [vmem:[%s4238_s18 + $0x2c] sm:$0xf] }
  0xc5   : > { %v1501_v4 = vadd.f32 %v1500_v16, %v1499_v59  ;;  %v1514_v3 = vmul.f32 %v4498_v19, %v4452_v7  ;;  %v1515_v37 = vmul.f32 %v4504_v0, %v4452_v7  ;;  %v1507_v33 = vadd.f32 %v1506_v1, %v1505_v45  ;;  %v4635_v45 = vld [vmem:[%s4238_s18 + $0x28] sm:$0xf] }
  0xc6   : > { %v1510_v18 = vrot.slane %v1509_v42, 2  ;;  %v1516_v6 = vmul.f32 %v4506_v2, %v4452_v7  ;;  %v1517_v34 = vmul.f32 %v4517_v57, %v4452_v7  ;;  %v1518_v5 = vmul.f32 %v4523_v15, %v4452_v7 }
  0xc7   : > { %v1519_v51 = vmul.f32 %v1453_v43, %v4452_v7  ;;  %v1522_v19 = vmul.f32 %v1471_v60, %v4452_v7  ;;  %v1523_v0 = vmul.f32 %v1477_v20, %v4452_v7  ;;  %v1524_v2 = vmul.f32 %v1483_v27, %v4452_v7  ;;  %v5293_v27 = vld [vmem:[#allocation28_spill] sm:$0xff] }
  0xc8   : > { %v1511_v13 = vadd.f32 %v1510_v18, %v1509_v42  ;;  %v1525_v57 = vmul.f32 %v1489_v8, %v4452_v7  ;;  %v1527_v15 = vmul.f32 %v1501_v4, %v4452_v7  ;;  %v1675_v46 = vsel %vm1674_vm1, %v1515_v37, %v1514_v3 }
  0xc9   : > { %1083 = vperm.xlu1 %3660, %v4321_v48   ;;  %1086 = vperm.xlu0 %3662, %v4323_v49   ;;  %v1526_v48 = vmul.f32 %v1495_v58, %v4452_v7  ;;  %v1520_v49 = vmul.f32 %v1459_v32, %v4452_v7  ;;  %v1688_v63 = vsel %vm1674_vm1, %v1523_v0, %v1522_v19  ;;  %v1530_v44 = vunpack.c.l.bf16 %v4583_v41 }
  0xca   : > { %v1512_v17 = vrot.slane %v1511_v13, 1  ;;  %v1528_v38 = vmul.f32 %v1507_v33, %v4452_v7  ;;  %v1677_v39 = vsel %vm1676_vm2, %v1516_v6, %v1675_v46  ;;  %v1521_v40 = vmul.f32 %v1465_v62, %v4452_v7 }
  0xcb   : > { %1062 = vperm.xlu2 %3661, %v4326_v52   ;;  %v1689_v52 = vsel %vm1676_vm2, %v1524_v2, %v1688_v63  ;;  %v1679_v55 = vsel %vm1678_vm3, %v1517_v34, %v1677_v39  ;;  %v1531_v21 = vunpack.c.l.bf16 %v4591_v9  ;;  %v1532_v26 = vunpack.c.l.bf16 %v4597_v12 }
  0xcc   : > { %v1690_v35 = vsel %vm1678_vm3, %v1525_v57, %v1689_v52  ;;  %v1513_v53 = vadd.f32 %v1512_v17, %v1511_v13  ;;  %v1681_v43 = vsel %vm1680_vm4, %v1518_v5, %v1679_v55  ;;  %v1533_v11 = vunpack.c.l.bf16 %v4600_v36  ;;  %v4653_v17 = vld [vmem:[%s4238_s18 + $0x30] sm:$0xf]  ;;  %v4656_v55 = vld [vmem:[%s4238_s18 + $0x34] sm:$0xf] }
  0xcd   : > { %v1691_v23 = vsel %vm1680_vm4, %v1526_v48, %v1690_v35  ;;  %v1683_v29 = vsel %vm1682_vm5, %v1519_v51, %v1681_v43  ;;  %v1534_v14 = vunpack.c.l.bf16 %v4606_v10  ;;  %v1535_v31 = vunpack.c.l.bf16 %v4612_v47  ;;  %v4659_v35 = vld [vmem:[%s4238_s18 + $0x38] sm:$0xf] }
  0xce   : > { %v1692_v56 = vsel %vm1682_vm5, %v1527_v15, %v1691_v23  ;;  %v1529_v59 = vmul.f32 %v1513_v53, %v4452_v7  ;;  %v1685_v50 = vsel %vm1684_vm6, %v1520_v49, %v1683_v29  ;;  %v1536_v32 = vunpack.c.l.bf16 %v4615_v28 }
  0xcf   : > { %v1693_v25 = vsel %vm1684_vm6, %v1528_v38, %v1692_v56  ;;  %v1687_v16 = vsel %vm1686_vm7, %v1521_v40, %v1685_v50  ;;  %v1537_v60 = vunpack.c.l.bf16 %v4618_v54  ;;  %v1538_v1 = vunpack.c.l.bf16 %v4624_v22 }
  0xd0   : > { %v1694_v20 = vsel %vm1686_vm7, %v1529_v59, %v1693_v25  ;;  %v1539_v58 = vunpack.c.l.bf16 %v4632_v30  ;;  %v1540_v42 = vunpack.c.l.bf16 %v4635_v45  ;;  %v1546_v62 = vrot.slane %v1530_v44, 4 }
  0xd1   : > { %1065 = vperm.xlu1 %3660, %v4330_v24   ;;  %v1761_v8 = vpack.c.bf16 %v1694_v20, %v1687_v16  ;;  %v1541_v24 = vunpack.c.l.bf16 %v4638_v61  ;;  %v1552_v4 = vrot.slane %v1531_v21, 4  ;;  %v1558_v3 = vrot.slane %v1532_v26, 4 }
  0xd2   : > { %v1564_v37 = vrot.slane %v1533_v11, 4  ;;  %v1570_v33 = vrot.slane %v1534_v14, 4  ;;  %v1576_v18 = vrot.slane %v1535_v31, 4  ;;  %v1582_v6 = vrot.slane %v1536_v32, 4 }
  0xd3   : > { %1089 = vperm.xlu2 %3661, %v5293_v27   ;;  %1968 = vmatmul.bf16.vlgmr.msra.gmra.mxu0 %v1761_v8  ;;  %v1588_v34 = vrot.slane %v1537_v60, 4  ;;  %v1547_v5 = vadd.f32 %v1546_v62, %v1530_v44  ;;  %v1553_v51 = vadd.f32 %v1552_v4, %v1531_v21  ;;  %v1559_v19 = vadd.f32 %v1558_v3, %v1532_v26  ;;  %v4662_v44 = vld [vmem:[%s4238_s18 + $0x3c] sm:$0xf] }
  0xd4   : > { %v1565_v0 = vadd.f32 %v1564_v37, %v1533_v11  ;;  %v1571_v13 = vadd.f32 %v1570_v33, %v1534_v14  ;;  %v1577_v2 = vadd.f32 %v1576_v18, %v1535_v31  ;;  %v1583_v57 = vadd.f32 %v1582_v6, %v1536_v32  ;;  %5294 = vst [vmem:[#allocation28_spill] sm:$0xff] %v4662_v44 }
  0xd5   : > { %v1589_v48 = vadd.f32 %v1588_v34, %v1537_v60  ;;  %v1548_v49 = vrot.slane %v1547_v5, 2  ;;  %v1554_v15 = vrot.slane %v1553_v51, 2  ;;  %v1560_v46 = vrot.slane %v1559_v19, 2 }
  0xd6   : > { %v1566_v63 = vrot.slane %v1565_v0, 2  ;;  %v1572_v38 = vrot.slane %v1571_v13, 2  ;;  %v1578_v39 = vrot.slane %v1577_v2, 2  ;;  %v1584_v52 = vrot.slane %v1583_v57, 2 }
  0xd7   : > { %v1590_v40 = vrot.slane %v1589_v48, 2  ;;  %v1549_v53 = vadd.f32 %v1548_v49, %v1547_v5  ;;  %v1555_v43 = vadd.f32 %v1554_v15, %v1553_v51  ;;  %v1561_v23 = vadd.f32 %v1560_v46, %v1559_v19 }
  0xd8   : > { %v1567_v21 = vadd.f32 %v1566_v63, %v1565_v0  ;;  %v4664_v29 = vadd.f32 %v1572_v38, %v1571_v13  ;;  %v4666_v56 = vadd.f32 %v1578_v39, %v1577_v2  ;;  %v4668_v26 = vadd.f32 %v1584_v52, %v1583_v57 }
  0xd9   : > { %v4670_v11 = vadd.f32 %v1590_v40, %v1589_v48  ;;  %v1550_v59 = vrot.slane %v1549_v53, 1  ;;  %v1556_v50 = vrot.slane %v1555_v43, 1  ;;  %v1562_v25 = vrot.slane %v1561_v23, 1 }
  0xda   : > { %v1568_v14 = vrot.slane %v1567_v21, 1  ;;  %v1542_v16 = vunpack.c.l.bf16 %v4653_v17  ;;  %v1543_v31 = vunpack.c.l.bf16 %v4656_v55  ;;  %v1544_v32 = vunpack.c.l.bf16 %v4659_v35 }
  0xdb   : > { %v1545_v60 = vunpack.c.l.bf16 %v4662_v44  ;;  %v1574_v20 = vrot.slane %v4664_v29, 1  ;;  %v1580_v27 = vrot.slane %v4666_v56, 1  ;;  %v1586_v8 = vrot.slane %v4668_v26, 1 }
  0xdc   : > { %v1592_v62 = vrot.slane %v4670_v11, 1  ;;  %v1551_v4 = vadd.f32 %v1550_v59, %v1549_v53  ;;  %v1557_v3 = vadd.f32 %v1556_v50, %v1555_v43  ;;  %v1563_v37 = vadd.f32 %v1562_v25, %v1561_v23  ;;  %v4680_v18 = vpop.permute.xlu2 %826 }
  0xdd   : > { %v1569_v33 = vadd.f32 %v1568_v14, %v1567_v21  ;;  %v1594_v6 = vrot.slane %v1538_v1, 4  ;;  %v1600_v34 = vrot.slane %v1539_v58, 4  ;;  %v1606_v5 = vrot.slane %v1540_v42, 4 }
  0xde   : > { %v1612_v51 = vrot.slane %v1541_v24, 4  ;;  %v1618_v19 = vrot.slane %v1542_v16, 4  ;;  %v1624_v0 = vrot.slane %v1543_v31, 4  ;;  %v1630_v13 = vrot.slane %v1544_v32, 4 }
  0xdf   : > { %v1636_v2 = vrot.slane %v1545_v60, 4  ;;  %v1595_v57 = vadd.f32 %v1594_v6, %v1538_v1  ;;  %v1601_v48 = vadd.f32 %v1600_v34, %v1539_v58  ;;  %v1607_v49 = vadd.f32 %v1606_v5, %v1540_v42 }
  0xe0   : > { %v1613_v15 = vadd.f32 %v1612_v51, %v1541_v24  ;;  %v1619_v46 = vadd.f32 %v1618_v19, %v1542_v16  ;;  %v1625_v63 = vadd.f32 %v1624_v0, %v1543_v31  ;;  %v1631_v38 = vadd.f32 %v1630_v13, %v1544_v32 }
  0xe1   : > { %v1637_v39 = vadd.f32 %v1636_v2, %v1545_v60  ;;  %v1596_v52 = vrot.slane %v1595_v57, 2  ;;  %v1602_v40 = vrot.slane %v1601_v48, 2  ;;  %v1608_v53 = vrot.slane %v1607_v49, 2 }
  0xe2   : > { %v1614_v43 = vrot.slane %v1613_v15, 2  ;;  %v1620_v23 = vrot.slane %v1619_v46, 2  ;;  %v1626_v21 = vrot.slane %v1625_v63, 2  ;;  %v1632_v1 = vrot.slane %v1631_v38, 2 }
  0xe3   : > { %v1638_v59 = vrot.slane %v1637_v39, 2  ;;  %v1597_v50 = vadd.f32 %v1596_v52, %v1595_v57  ;;  %v1603_v58 = vadd.f32 %v1602_v40, %v1601_v48  ;;  %v1609_v25 = vadd.f32 %v1608_v53, %v1607_v49 }
  0xe4   : > { %v1615_v14 = vadd.f32 %v1614_v43, %v1613_v15  ;;  %v1621_v42 = vadd.f32 %v1620_v23, %v1619_v46  ;;  %v1627_v6 = vadd.f32 %v1626_v21, %v1625_v63  ;;  %v1633_v34 = vadd.f32 %v1632_v1, %v1631_v38  ;;  %v851_v13 = vpop.permute.xlu2 %850 }
  0xe5   : > { %v1639_v24 = vadd.f32 %v1638_v59, %v1637_v39  ;;  %v1598_v16 = vrot.slane %v1597_v50, 1  ;;  %v1604_v31 = vrot.slane %v1603_v58, 1  ;;  %v1610_v32 = vrot.slane %v1609_v25, 1 }
  0xe6   : > { %v1616_v60 = vrot.slane %v1615_v14, 1  ;;  %v1622_v5 = vrot.slane %v1621_v42, 1  ;;  %v1628_v51 = vrot.slane %v1627_v6, 1  ;;  %v1634_v19 = vrot.slane %v1633_v34, 1 }
  0xe7   : > { %v1640_v0 = vrot.slane %v1639_v24, 1  ;;  %v1599_v2 = vadd.f32 %v1598_v16, %v1597_v50  ;;  %v1605_v44 = vadd.f32 %v1604_v31, %v1603_v58  ;;  %v1611_v28 = vadd.f32 %v1610_v32, %v1609_v25 }
  0xe8   : > { %v1617_v57 = vadd.f32 %v1616_v60, %v1615_v14  ;;  %v1575_v48 = vadd.f32 %v1574_v20, %v4664_v29  ;;  %v1581_v49 = vadd.f32 %v1580_v27, %v4666_v56  ;;  %v1587_v15 = vadd.f32 %v1586_v8, %v4668_v26 }
  0xe9   : > { %v1623_v46 = vadd.f32 %v1622_v5, %v1621_v42  ;;  %v1593_v63 = vadd.f32 %v1592_v62, %v4670_v11  ;;  %v1629_v38 = vadd.f32 %v1628_v51, %v1627_v6  ;;  %v1642_v39 = vmul.f32 %v1551_v4, %v4452_v7 }
  0xea   : > { %v1643_v52 = vmul.f32 %v1557_v3, %v4452_v7  ;;  %v1635_v40 = vadd.f32 %v1634_v19, %v1633_v34  ;;  %v1641_v53 = vadd.f32 %v1640_v0, %v1639_v24  ;;  %v1644_v43 = vmul.f32 %v1563_v37, %v4452_v7 }
  0xeb   : > { %v1645_v23 = vmul.f32 %v1569_v33, %v4452_v7  ;;  %v1650_v29 = vmul.f32 %v1599_v2, %v4452_v7  ;;  %v1651_v56 = vmul.f32 %v1605_v44, %v4452_v7  ;;  %v1652_v26 = vmul.f32 %v1611_v28, %v4452_v7 }
  0xec   : > { %v1653_v20 = vmul.f32 %v1617_v57, %v4452_v7  ;;  %v1646_v11 = vmul.f32 %v1575_v48, %v4452_v7  ;;  %v1647_v27 = vmul.f32 %v1581_v49, %v4452_v7  ;;  %v1648_v8 = vmul.f32 %v1587_v15, %v4452_v7  ;;  %v833_v59 = vpop.permute.xlu2 %832 }
  0xed   : > { %v1654_v62 = vmul.f32 %v1623_v46, %v4452_v7  ;;  %v1655_v4 = vmul.f32 %v1629_v38, %v4452_v7  ;;  %v1713_v3 = vsel %vm1674_vm1, %v1643_v52, %v1642_v39  ;;  %v1720_v37 = vsel %vm1674_vm1, %v1651_v56, %v1650_v29 }
  0xee   : > { %v787_v33 = vlaneseq  ;;  %v1649_v44 = vmul.f32 %v1593_v63, %v4452_v7  ;;  %v1656_v28 = vmul.f32 %v1635_v40, %v4452_v7  ;;  %v1714_v21 = vsel %vm1676_vm2, %v1644_v43, %v1713_v3 }
  0xef   : > { %v1721_v1 = vsel %vm1676_vm2, %v1652_v26, %v1720_v37  ;;  %v1657_v58 = vmul.f32 %v1641_v53, %v4452_v7  ;;  %v1715_v25 = vsel %vm1678_vm3, %v1645_v23, %v1714_v21 }
  0xf0   : > { %v1722_v14 = vsel %vm1678_vm3, %v1653_v20, %v1721_v1  ;;  %v4724_v42 = vshrl.u32 %v787_v33, 7  ;;  %v1716_v34 = vsel %vm1680_vm4, %v1646_v11, %v1715_v25 }
  0xf1   : > { %v1723_v24 = vsel %vm1680_vm4, %v1654_v62, %v1722_v14  ;;  %v1717_v16 = vsel %vm1682_vm5, %v1647_v27, %v1716_v34 }
  0xf2   : > { %v845_v50 = vpop.permute.xlu1 %844  ;;  %v821_v6 = vpop.permute.xlu0 %820  ;;  %v1724_v31 = vsel %vm1682_vm5, %v1655_v4, %v1723_v24  ;;  %vm869_vm8 = vcmp.eq.s32.totalorder %v4724_v42, %v4680_v18  ;;  %v1718_v7 = vsel %vm1684_vm6, %v1648_v8, %v1717_v16  ;;  %vm877_vm10 = vcmp.eq.s32.totalorder %v4724_v42, %v851_v13 }
  0xf3   : > { %v1725_v32 = vsel %vm1684_vm6, %v1656_v28, %v1724_v31  ;;  %vm885_vm9 = vmpackc.low %vm869_vm8, %vm869_vm8  ;;  %v1719_v60 = vsel %vm1686_vm7, %v1649_v44, %v1718_v7  ;;  %vm871_vm11 = vcmp.eq.s32.totalorder %v4724_v42, %v833_v59  ;;  %vm875_vm14 = vcmp.eq.s32.totalorder %v4724_v42, %v845_v50 }
  0xf4   : > { %v1726_v5 = vsel %vm1686_vm7, %v1657_v58, %v1725_v32  ;;  %v901_v19 = vsel %vm885_vm9, %v4597_v12, 0  ;;  %vm893_vm12 = vmpackc.low %vm877_vm10, %vm877_vm10  ;;  %v860_v0 = vpop.permute.xlu2 %859  ;;  %vm867_vm15 = vcmp.eq.s32.totalorder %v4724_v42, %v821_v6 }
  0xf5   : > { %v1762_v51 = vpack.c.bf16 %v1726_v5, %v1719_v60  ;;  %vm887_vm13 = vmpackc.low %vm871_vm11, %vm871_vm11  ;;  %v917_v57 = vunpack.c.l.bf16 %v901_v19  ;;  %v909_v13 = vsel %vm893_vm12, %v4635_v45, 0  ;;  %vm880_vm10 = vcmp.eq.s32.totalorder %v4724_v42, %v860_v0 }
  0xf6   : > { %v903_v48 = vsel %vm887_vm13, %v4606_v10, 0  ;;  %vm4743_vm0 = vmpackc.low %vm875_vm14, %vm875_vm14  ;;  %v925_v15 = vunpack.c.l.bf16 %v909_v13 }
  0xf7   : > { %1982 = vmatmul.bf16.vlgmr.msra.gmra.mxu1 %v1762_v51  ;;  %v943_v46 = vrot.slane %v917_v57, 4  ;;  %vm4748_vm9 = vmpackc.low %vm867_vm15, %vm867_vm15  ;;  %v919_v38 = vunpack.c.l.bf16 %v903_v48  ;;  %v907_v39 = vsel %vm4743_vm0, %v4624_v22, 0 }
  0xf8   : > { %v991_v53 = vrot.slane %v925_v15, 4  ;;  %v899_v43 = vsel %vm4748_vm9, %v4583_v41, 0  ;;  %vm4764_vm13 = vmpackc.low %vm880_vm10, %vm880_vm10  ;;  %v923_v20 = vunpack.c.l.bf16 %v907_v39 }
  0xf9   : > { %v944_v26 = vadd.f32 %v943_v46, %v917_v57  ;;  %v955_v27 = vrot.slane %v919_v38, 4  ;;  %v915_v8 = vunpack.c.l.bf16 %v899_v43  ;;  %v912_v4 = vsel %vm4764_vm13, %v4656_v55, 0  ;;  %v3412_v43 = vld [vmem:[#allocation10 + $0x10] sm:$0xff] }
  0xfa   : > { %v848_v18 = vpop.permute.xlu1 %847  ;;  %v824_v2 = vpop.permute.xlu0 %823  ;;  %v992_v62 = vadd.f32 %v991_v53, %v925_v15  ;;  %v979_v44 = vrot.slane %v923_v20, 4  ;;  %v928_v21 = vunpack.c.l.bf16 %v912_v4 }
  0xfb   : > { %vm876_vm8 = vcmp.eq.s32.totalorder %v4724_v42, %v848_v18  ;;  %vm868_vm12 = vcmp.eq.s32.totalorder %v4724_v42, %v824_v2  ;;  %v945_v33 = vrot.slane %v944_v26, 2  ;;  %v956_v28 = vadd.f32 %v955_v27, %v919_v38 }
  0xfc   : > { %vm4756_vm11 = vmpackc.low %vm876_vm8, %vm876_vm8  ;;  %v842_v29 = vpop.permute.xlu2 %841  ;;  %v993_v59 = vrot.slane %v992_v62, 2  ;;  %v931_v50 = vrot.slane %v915_v8, 4  ;;  %v980_v6 = vadd.f32 %v979_v44, %v923_v20  ;;  %v1009_v31 = vrot.slane %v928_v21, 4  ;;  %v3417_v44 = vld [vmem:[#allocation10 + $0x38] sm:$0xff] }
  0xfd   : > { %v908_v11 = vsel %vm4756_vm11, %v4632_v30, 0  ;;  %vm884_vm14 = vmpackc.low %vm868_vm12, %vm868_vm12  ;;  %v946_v14 = vadd.f32 %v945_v33, %v944_v26  ;;  %v957_v34 = vrot.slane %v956_v28, 2  ;;  %vm874_vm0 = vcmp.eq.s32.totalorder %v4724_v42, %v842_v29  ;;  %2474 = vmatpush.bf16.msra.mxu3 %v3417_v44  ;;  %v5321_v44 = vld [vmem:[#allocation29_spill] sm:$0xff] }
  0xfe   : > { %v924_v3 = vunpack.c.l.bf16 %v908_v11  ;;  %v900_v37 = vsel %vm884_vm14, %v4591_v9, 0  ;;  %v994_v32 = vadd.f32 %v993_v59, %v992_v62  ;;  %v932_v60 = vadd.f32 %v931_v50, %v915_v8  ;;  %vm4782_vm10 = vmpackc.low %vm874_vm0, %vm874_vm0 }
  0xff   : > { %v916_v1 = vunpack.c.l.bf16 %v900_v37  ;;  %v947_v51 = vrot.slane %v946_v14, 1  ;;  %v981_v19 = vrot.slane %v980_v6, 2  ;;  %v958_v0 = vadd.f32 %v957_v34, %v956_v28 }
 0x100   : > { %v985_v58 = vrot.slane %v924_v3, 4  ;;  %v1010_v18 = vadd.f32 %v1009_v31, %v928_v21  ;;  %v995_v57 = vrot.slane %v994_v32, 1  ;;  %v933_v13 = vrot.slane %v932_v60, 2 }
 0x101   : > { %v937_v7 = vrot.slane %v916_v1, 4  ;;  %v948_v15 = vadd.f32 %v947_v51, %v946_v14  ;;  %v982_v46 = vadd.f32 %v981_v19, %v980_v6  ;;  %v959_v63 = vrot.slane %v958_v0, 1 }
 0x102   : > { %v854_v40 = vpop.permute.xlu1 %853  ;;  %v830_v56 = vpop.permute.xlu0 %829  ;;  %v986_v5 = vadd.f32 %v985_v58, %v924_v3  ;;  %v1011_v52 = vrot.slane %v1010_v18, 2  ;;  %v996_v23 = vadd.f32 %v995_v57, %v994_v32  ;;  %v934_v29 = vadd.f32 %v933_v13, %v932_v60 }
 0x103   : > { %vm878_vm15 = vcmp.eq.s32.totalorder %v4724_v42, %v854_v40  ;;  %v938_v2 = vadd.f32 %v937_v7, %v916_v1  ;;  %vm870_vm9 = vcmp.eq.s32.totalorder %v4724_v42, %v830_v56  ;;  %v1029_v11 = vpack.c.bf16 %v948_v15, %v948_v15 }
 0x104   : > { %v987_v48 = vrot.slane %v986_v5, 2  ;;  %vm4777_vm8 = vmpackc.low %vm878_vm15, %vm878_vm15  ;;  %v983_v27 = vrot.slane %v982_v46, 1  ;;  %v960_v62 = vadd.f32 %v959_v63, %v958_v0  ;;  %v906_v4 = vsel %vm4782_vm10, %v4618_v54, 0  ;;  %v3416_v54 = vld [vmem:[#allocation10 + $0x30] sm:$0xff] }
 0x105   : > { %v1048_v24 = vpop.permute.xlu2 %1047  ;;  %v939_v40 = vrot.slane %v938_v2, 2  ;;  %v910_v53 = vsel %vm4777_vm8, %v4638_v61, 0  ;;  %vm4790_vm12 = vmpackc.low %vm870_vm9, %vm870_vm9  ;;  %v1012_v28 = vadd.f32 %v1011_v52, %v1010_v18  ;;  %v1037_v1 = vpack.c.bf16 %v996_v23, %v996_v23  ;;  %2475 = vmatpush.bf16.msra.mxu3 %v3416_v54 }
 0x106   : > { %v988_v56 = vadd.f32 %v987_v48, %v986_v5  ;;  %vm1092_vm14 = vcmp.eq.s32.totalorder %v4724_v42, %v1048_v24  ;;  %v926_v3 = vunpack.c.l.bf16 %v910_v53  ;;  %v902_v37 = vsel %vm4790_vm12, %v4600_v36, 0  ;;  %v3415_v48 = vld [vmem:[#allocation10 + $0x28] sm:$0xff] }
 0x107   : > { %v940_v21 = vadd.f32 %v939_v40, %v938_v2  ;;  %v935_v59 = vrot.slane %v934_v29, 1  ;;  %vm4812_vm8 = vmpackc.low %vm1092_vm14, %vm1092_vm14  ;;  %v918_v14 = vunpack.c.l.bf16 %v902_v37  ;;  %v4822_v24 = vperm.slane %v1029_v11, 0 }
 0x108   : > { %v989_v50 = vrot.slane %v988_v56, 1  ;;  %v984_v31 = vadd.f32 %v983_v27, %v982_v46  ;;  %v997_v7 = vrot.slane %v926_v3, 4  ;;  %v1013_v32 = vrot.slane %v1012_v28, 1  ;;  %v3414_v27 = vld [vmem:[#allocation10 + $0x20] sm:$0xff] }
 0x109   : > { %v941_v60 = vrot.slane %v940_v21, 1  ;;  %v1124_v5 = vsel %vm4812_vm8, %v4591_v9, 0  ;;  %v936_v51 = vadd.f32 %v935_v59, %v934_v29  ;;  %v949_v13 = vrot.slane %v918_v14, 4  ;;  %2476 = vmatpush.bf16.msra.mxu3 %v3415_v48 }
 0x10a   : > { %v836_v25 = vpop.permute.xlu1 %835  ;;  %v857_v16 = vpop.permute.xlu0 %856  ;;  %v990_v2 = vadd.f32 %v989_v50, %v988_v56  ;;  %v4831_v49 = vperm.slane %v1037_v1, 0  ;;  %v998_v15 = vadd.f32 %v997_v7, %v926_v3  ;;  %v1140_v46 = vunpack.c.l.bf16 %v1124_v5  ;;  %v5324_v7 = vld [vmem:[#allocation28_spill] sm:$0xff] }
 0x10b   : > { %vm872_vm11 = vcmp.eq.s32.totalorder %v4724_v42, %v836_v25  ;;  %vm879_vm13 = vcmp.eq.s32.totalorder %v4724_v42, %v857_v16  ;;  %v922_v25 = vunpack.c.l.bf16 %v906_v4  ;;  %v1031_v16 = vpack.c.bf16 %v960_v62, %v960_v62 }
 0x10c   : > { %vm4798_vm15 = vmpackc.low %vm872_vm11, %vm872_vm11  ;;  %v1035_v52 = vpack.c.bf16 %v984_v31, %v984_v31  ;;  %v1014_v40 = vadd.f32 %v1013_v32, %v1012_v28  ;;  %v942_v53 = vadd.f32 %v941_v60, %v940_v21  ;;  %v1027_v29 = vpack.c.bf16 %v936_v51, %v936_v51 }
 0x10d   : > { %v4795_v26 = vpop.permute.xlu2 %1050  ;;  %vm4808_vm0 = vmpackc.low %vm879_vm13, %vm879_vm13  ;;  %v904_v6 = vsel %vm4798_vm15, %v4612_v47, 0  ;;  %v973_v57 = vrot.slane %v922_v25, 4  ;;  %v4849_v23 = vperm.slane %v1031_v16, 0  ;;  %v1036_v8 = vpack.c.bf16 %v990_v2, %v990_v2  ;;  %2477 = vmatpush.bf16.msra.mxu3 %v3414_v27 }
 0x10e   : > { %v911_v34 = vsel %vm4808_vm0, %v4653_v17, 0  ;;  %v920_v19 = vunpack.c.l.bf16 %v904_v6  ;;  %vm1093_vm11 = vcmp.eq.s32.totalorder %v4724_v42, %v4795_v26  ;;  %v950_v4 = vadd.f32 %v949_v13, %v918_v14  ;;  %v3413_v6 = vld [vmem:[#allocation10 + $0x18] sm:$0xff] }
 0x10f   : > { %v927_v0 = vunpack.c.l.bf16 %v911_v34  ;;  %v974_v62 = vadd.f32 %v973_v57, %v922_v25  ;;  %vm4855_vm14 = vmpackc.low %vm1093_vm11, %vm1093_vm11  ;;  %v999_v37 = vrot.slane %v998_v15, 2  ;;  %v1161_v33 = vrot.slane %v1140_v46, 4 }
 0x110   : > { %v961_v56 = vrot.slane %v920_v19, 4  ;;  %v2048_v21 = vunpack.c.l.b16 %v4831_v49  ;;  %v2030_v26 = vperm.slane %v1035_v52, 0  ;;  %v1040_v1 = vpack.c.bf16 %v1014_v40, %v1014_v40 }
 0x111   : > { %v1003_v11 = vrot.slane %v927_v0, 4  ;;  %v1028_v59 = vpack.c.bf16 %v942_v53, %v942_v53  ;;  %v1125_v25 = vsel %vm4855_vm14, %v4597_v12, 0  ;;  %v2031_v34 = vperm.slane %v1036_v8, 0  ;;  %2478 = vmatpush.bf16.msra.mxu3 %v3413_v6 }
 0x112   : > { %v863_v39 = vpop.permute.xlu1 %862  ;;  %v839_v20 = vpop.permute.xlu0 %838  ;;  %v962_v58 = vadd.f32 %v961_v56, %v920_v19  ;;  %v951_v16 = vrot.slane %v950_v4, 2  ;;  %v2042_v60 = vunpack.c.l.b16 %v4849_v23  ;;  %v975_v5 = vrot.slane %v974_v62, 2 }
 0x113   : > { %vm881_vm9 = vcmp.eq.s32.totalorder %v4724_v42, %v863_v39  ;;  %vm873_vm10 = vcmp.eq.s32.totalorder %v4724_v42, %v839_v20  ;;  %v2040_v39 = vunpack.c.l.b16 %v4822_v24  ;;  %v1004_v54 = vadd.f32 %v1003_v11, %v927_v0 }
 0x114   : > { %vm4835_vm12 = vmpackc.low %vm881_vm9, %vm881_vm9  ;;  %v1000_v51 = vadd.f32 %v999_v37, %v998_v15  ;;  %v1162_v19 = vadd.f32 %v1161_v33, %v1140_v46  ;;  %v2022_v2 = vperm.slane %v1027_v29, 0  ;;  %v4878_v57 = vperm.slane %v1040_v1, 0 }
 0x115   : > { %v4839_v63 = vpop.permute.xlu2 %1053  ;;  %vm4845_vm13 = vmpackc.low %vm873_vm10, %vm873_vm10  ;;  %v913_v3 = vsel %vm4835_vm12, %v4659_v35, 0  ;;  %v1141_v12 = vunpack.c.l.bf16 %v1125_v25  ;;  %v2023_v48 = vperm.slane %v1028_v59, 0  ;;  %v963_v9 = vrot.slane %v962_v58, 2  ;;  %2479 = vmatpush.bf16.msra.mxu3 %v3412_v43 }
 0x116   : > { %v905_v28 = vsel %vm4845_vm13, %v5321_v44, 0  ;;  %v929_v14 = vunpack.c.l.bf16 %v913_v3  ;;  %v2047_v56 = vunpack.c.l.b16 %v2031_v34  ;;  %v952_v11 = vadd.f32 %v951_v16, %v950_v4  ;;  %v3440_v16 = vld [vmem:[#allocation10 + $0xf0] sm:$0xff] }
 0x117   : > { %v921_v31 = vunpack.c.l.bf16 %v905_v28  ;;  %v976_v15 = vadd.f32 %v975_v5, %v974_v62  ;;  %v1001_v46 = vrot.slane %v1000_v51, 1  ;;  %v1163_v29 = vrot.slane %v1162_v19, 2 }
 0x118   : > { %v1015_v52 = vrot.slane %v929_v14, 4  ;;  %v2046_v8 = vunpack.c.l.b16 %v2030_v26  ;;  %v2038_v20 = vunpack.c.l.b16 %v2022_v2  ;;  %v1167_v3 = vrot.slane %v1141_v12, 4 }
 0x119   : > { %v967_v27 = vrot.slane %v921_v31, 4  ;;  %v964_v33 = vadd.f32 %v963_v9, %v962_v58  ;;  %vm1094_vm10 = vcmp.eq.s32.totalorder %v4724_v42, %v4839_v63  ;;  %v2039_v62 = vunpack.c.l.b16 %v2023_v48  ;;  %v3411_v58 = vld [vmem:[#allocation10 + $0x8] sm:$0xff] }
 0x11a   : > { %v866_v38 = vpop.permute.xlu0 %865  ;;  %v1016_v1 = vadd.f32 %v1015_v52, %v929_v14  ;;  %v953_v59 = vrot.slane %v952_v11, 1  ;;  %v4897_v25 = vsel %vm1674_vm1, %v2047_v56, %v2046_v8  ;;  %v977_v63 = vrot.slane %v976_v15, 1  ;;  %vm4899_vm13 = vmpackc.low %vm1094_vm10, %vm1094_vm10  ;;  %2480 = vmatpush.bf16.msra.mxu3 %v3411_v58 }
 0x11b   : > { %v4829_v18 = vpop.permute.xlu1 %1044  ;;  %vm882_vm15 = vcmp.eq.s32.totalorder %v4724_v42, %v866_v38  ;;  %v1005_v38 = vrot.slane %v1004_v54, 2  ;;  %v968_v50 = vadd.f32 %v967_v27, %v921_v31  ;;  %v1002_v14 = vadd.f32 %v1001_v46, %v1000_v51 }
 0x11c   : > { %vm4867_vm0 = vmpackc.low %vm882_vm15, %vm882_vm15  ;;  %vm1091_vm8 = vcmp.eq.s32.totalorder %v4724_v42, %v4829_v18  ;;  %v2051_v18 = vunpack.c.l.b16 %v4878_v57  ;;  %v1164_v6 = vadd.f32 %v1163_v29, %v1162_v19  ;;  %v1168_v34 = vadd.f32 %v1167_v3, %v1141_v12  ;;  %v3410_v12 = vld [vmem:[#allocation10] sm:$0xff] }
 0x11d   : > { %v914_v32 = vsel %vm4867_vm0, %v5324_v7, 0  ;;  %v4880_v40 = vpop.permute.xlu2 %1080  ;;  %v1006_v28 = vadd.f32 %v1005_v38, %v1004_v54  ;;  %vm4887_vm11 = vmpackc.low %vm1091_vm8, %vm1091_vm8  ;;  %v3433_v54 = vld [vmem:[#allocation10 + $0xb8] sm:$0xff]  ;;  %v965_v5 = vrot.slane %v964_v33, 1  ;;  %v1017_v2 = vrot.slane %v1016_v1, 2 }
 0x11e   : > { %v930_v13 = vunpack.c.l.bf16 %v914_v32  ;;  %v1123_v31 = vsel %vm4887_vm11, %v4583_v41, 0  ;;  %2502 = vmatpush.bf16.msrb.mxu1 %v3433_v54  ;;  %v4911_v48 = vsel %vm1674_vm1, %v2039_v62, %v2038_v20  ;;  %v969_v9 = vrot.slane %v968_v50, 2  ;;  %2481 = vmatpush.bf16.msra.mxu3 %v3410_v12 }
 0x11f   : > { %vm1103_vm15 = vcmp.eq.s32.totalorder %v4724_v42, %v4880_v40  ;;  %v1038_v41 = vpack.c.bf16 %v1002_v14, %v1002_v14  ;;  %v1165_v38 = vrot.slane %v1164_v6, 1  ;;  %v1126_v52 = vsel %vm4899_vm13, %v4600_v36, 0 }
 0x120   : > { %v1021_v37 = vrot.slane %v930_v13, 4  ;;  %v1139_v43 = vunpack.c.l.bf16 %v1123_v31  ;;  %v1169_v27 = vrot.slane %v1168_v34, 2  ;;  %v4926_v8 = vadd.f32 %v977_v63, %v976_v15  ;;  %v3432_v15 = vld [vmem:[#allocation10 + $0xb0] sm:$0xff] }
 0x121   : > { %v966_v20 = vadd.f32 %v965_v5, %v964_v33  ;;  %v1018_v36 = vadd.f32 %v1017_v2, %v1016_v1  ;;  %v1142_v4 = vunpack.c.l.bf16 %v1126_v52  ;;  %v3441_v33 = vld [vmem:[#allocation10 + $0xf8] sm:$0xff]  ;;  %v4940_v1 = vperm.slane %v1038_v41, 0 }
 0x122   : > { %v1022_v32 = vadd.f32 %v1021_v37, %v930_v13  ;;  %v954_v13 = vadd.f32 %v953_v59, %v952_v11  ;;  %v970_v37 = vadd.f32 %v969_v9, %v968_v50  ;;  %v4942_v59 = vadd.f32 %v1165_v38, %v1164_v6  ;;  %2503 = vmatpush.bf16.msrb.mxu1 %v3432_v15  ;;  %v3431_v6 = vld [vmem:[#allocation10 + $0xa8] sm:$0xff] }
 0x123   : > { %v1072_v0 = vpop.permute.xlu1 %1071  ;;  %v1069_v53 = vpop.permute.xlu0 %1068  ;;  %v1155_v26 = vrot.slane %v1139_v43, 4  ;;  %v4951_v58 = vadd.f32 %v1169_v27, %v1168_v34  ;;  %2516 = vmatpush.bf16.msrb.mxu2 %v3441_v33  ;;  %v1032_v31 = vpack.c.bf16 %v966_v20, %v966_v20  ;;  %v1019_v5 = vrot.slane %v1018_v36, 1  ;;  %v3448_v34 = vld [vmem:[#allocation10 + $0x130] sm:$0xff] }
 0x124   : > { %vm1100_vm9 = vcmp.eq.s32.totalorder %v4724_v42, %v1072_v0  ;;  %vm1099_vm14 = vcmp.eq.s32.totalorder %v4724_v42, %v1069_v53  ;;  %v1007_v0 = vrot.slane %v1006_v28, 1  ;;  %v1023_v46 = vrot.slane %v1022_v32, 2 }
 0x125   : > { %vm4892_vm12 = vmpackc.low %vm1100_vm9, %vm1100_vm9  ;;  %v1063_v56 = vpop.permute.xlu2 %1062  ;;  %v1030_v40 = vpack.c.bf16 %v954_v13, %v954_v13  ;;  %v971_v2 = vrot.slane %v970_v37, 1  ;;  %v1156_v12 = vadd.f32 %v1155_v26, %v1139_v43  ;;  %v2049_v41 = vunpack.c.l.b16 %v4940_v1 }
 0x126   : > { %v1132_v51 = vsel %vm4892_vm12, %v4632_v30, 0  ;;  %vm4921_vm0 = vmpackc.low %vm1099_vm14, %vm1099_vm14  ;;  %v1008_v3 = vadd.f32 %v1007_v0, %v1006_v28  ;;  %v3449_v28 = vld [vmem:[#allocation10 + $0x138] sm:$0xff]  ;;  %vm1097_vm13 = vcmp.eq.s32.totalorder %v4724_v42, %v1063_v56  ;;  %v1171_v38 = vrot.slane %v4951_v58, 1  ;;  %2504 = vmatpush.bf16.msrb.mxu1 %v3431_v6 }
 0x127   : > { %v1148_v29 = vunpack.c.l.bf16 %v1132_v51  ;;  %vm4932_vm9 = vmpackc.low %vm1103_vm15, %vm1103_vm15  ;;  %v1131_v62 = vsel %vm4921_vm0, %v4624_v22, 0  ;;  %v1024_v22 = vadd.f32 %v1023_v46, %v1022_v32  ;;  %2530 = vmatpush.bf16.msrb.mxu3 %v3449_v28  ;;  %v1173_v51 = vrot.slane %v1142_v4, 4  ;;  %2517 = vmatpush.bf16.msrb.mxu2 %v3440_v16 }
 0x128   : > { %v1135_v54 = vsel %vm4932_vm9, %v4653_v17, 0  ;;  %v1147_v0 = vunpack.c.l.bf16 %v1131_v62  ;;  %v1039_v32 = vpack.c.bf16 %v1008_v3, %v1008_v3  ;;  %vm4971_vm14 = vmpackc.low %vm1097_vm13, %vm1097_vm13  ;;  %v1020_v43 = vadd.f32 %v1019_v5, %v1018_v36 }
 0x129   : > { %v1209_v63 = vrot.slane %v1148_v29, 4  ;;  %v1151_v13 = vunpack.c.l.bf16 %v1135_v54  ;;  %v1025_v52 = vrot.slane %v1024_v22, 1  ;;  %v972_v53 = vadd.f32 %v971_v2, %v970_v37 }
 0x12a   : > { %v1203_v27 = vrot.slane %v1147_v0, 4  ;;  %v4977_v3 = vperm.slane %v1039_v32, 0  ;;  %v1174_v62 = vadd.f32 %v1173_v51, %v1142_v4  ;;  %v1157_v15 = vrot.slane %v1156_v12, 2 }
 0x12b   : > { %v1075_v19 = vpop.permute.xlu1 %1074  ;;  %v1078_v11 = vpop.permute.xlu0 %1077  ;;  %v1210_v30 = vadd.f32 %v1209_v63, %v1148_v29  ;;  %2531 = vmatpush.bf16.msrb.mxu3 %v3448_v34  ;;  %v1227_v33 = vrot.slane %v1151_v13, 4  ;;  %v1129_v28 = vsel %vm4971_vm14, %v5321_v44, 0  ;;  %v1041_v26 = vpack.c.bf16 %v1020_v43, %v1020_v43 }
 0x12c   : > { %vm1101_vm8 = vcmp.eq.s32.totalorder %v4724_v42, %v1075_v19  ;;  %vm1102_vm10 = vcmp.eq.s32.totalorder %v4724_v42, %v1078_v11  ;;  %v4964_v19 = vperm.slane %v1030_v40, 0  ;;  %v1026_v40 = vadd.f32 %v1025_v52, %v1024_v22 }
 0x12d   : > { %vm4947_vm11 = vmpackc.low %vm1101_vm8, %vm1101_vm8  ;;  %v1090_v20 = vpop.permute.xlu2 %1089  ;;  %v1211_v36 = vrot.slane %v1210_v30, 2  ;;  %v1204_v50 = vadd.f32 %v1203_v27, %v1147_v0  ;;  %v1033_v22 = vpack.c.bf16 %v972_v53, %v972_v53  ;;  %v1175_v6 = vrot.slane %v1174_v62, 2 }
 0x12e   : > { %vm4956_vm12 = vmpackc.low %vm1102_vm10, %vm1102_vm10  ;;  %v1133_v17 = vsel %vm4947_vm11, %v4635_v45, 0  ;;  %v4975_v45 = vperm.slane %v1032_v31, 0  ;;  %vm1106_vm0 = vcmp.eq.s32.totalorder %v4724_v42, %v1090_v20  ;;  %v2041_v44 = vunpack.c.l.b16 %v4964_v19 }
 0x12f   : > { %v1134_v9 = vsel %vm4956_vm12, %v4638_v61, 0  ;;  %v1149_v46 = vunpack.c.l.bf16 %v1133_v17  ;;  %v4992_v16 = vadd.f32 %v1227_v33, %v1151_v13  ;;  %v4994_v31 = vunpack.c.l.bf16 %v1129_v28  ;;  %vm4996_vm11 = vmpackc.low %vm1106_vm0, %vm1106_vm0 }
 0x130   : > { %v1150_v29 = vunpack.c.l.bf16 %v1134_v9  ;;  %v2043_v63 = vunpack.c.l.b16 %v4975_v45  ;;  %v1158_v0 = vadd.f32 %v1157_v15, %v1156_v12  ;;  %v5000_v34 = vadd.f32 %v1211_v36, %v1210_v30 }
 0x131   : > { %v1215_v37 = vrot.slane %v1149_v46, 4  ;;  %v1042_v2 = vpack.c.bf16 %v1026_v40, %v1026_v40  ;;  %v2050_v51 = vunpack.c.l.b16 %v4977_v3  ;;  %v2036_v17 = vperm.slane %v1041_v26, 0 }
 0x132   : > { %v1221_v14 = vrot.slane %v1150_v29, 4  ;;  %v1205_v19 = vrot.slane %v1204_v50, 2  ;;  %v2028_v9 = vperm.slane %v1033_v22, 0  ;;  %v1138_v56 = vsel %vm4996_vm11, %v5324_v7, 0 }
 0x133   : > { %v1057_v11 = vpop.permute.xlu1 %1056  ;;  %v1060_v61 = vpop.permute.xlu0 %1059  ;;  %v1216_v13 = vadd.f32 %v1215_v37, %v1149_v46  ;;  %v1034_v12 = vpack.c.bf16 %v4926_v8, %v4926_v8  ;;  %v5011_v30 = vadd.f32 %v1175_v6, %v1174_v62  ;;  %v1159_v43 = vrot.slane %v1158_v0, 1 }
 0x134   : > { %vm1095_vm15 = vcmp.eq.s32.totalorder %v4724_v42, %v1057_v11  ;;  %vm1096_vm9 = vcmp.eq.s32.totalorder %v4724_v42, %v1060_v61  ;;  %v1222_v52 = vadd.f32 %v1221_v14, %v1150_v29  ;;  %v1229_v11 = vrot.slane %v4992_v16, 2 }
 0x135   : > { %vm1111_vm8 = vmpackc.low %vm1095_vm15, %vm1095_vm15  ;;  %v1213_v27 = vrot.slane %v5000_v34, 1  ;;  %v1191_v46 = vrot.slane %v4994_v31, 4  ;;  %v2037_v20 = vperm.slane %v1042_v2, 0  ;;  %v1206_v3 = vadd.f32 %v1205_v19, %v1204_v50 }
 0x136   : > { %v1127_v4 = vsel %vm1111_vm8, %v4606_v10, 0  ;;  %vm4986_vm10 = vmpackc.low %vm1096_vm9, %vm1096_vm9  ;;  %v1217_v53 = vrot.slane %v1216_v13, 2  ;;  %v1154_v29 = vunpack.c.l.bf16 %v1138_v56  ;;  %v2055_v7 = vsel %vm1676_vm2, %v2040_v39, %v4911_v48  ;;  %v3439_v56 = vld [vmem:[#allocation10 + $0xe8] sm:$0xff] }
 0x137   : > { %v1143_v10 = vunpack.c.l.bf16 %v1127_v4  ;;  %v1128_v32 = vsel %vm4986_vm10, %v4612_v47, 0  ;;  %v1223_v8 = vrot.slane %v1222_v52, 2  ;;  %v2029_v62 = vperm.slane %v1034_v12, 0  ;;  %2518 = vmatpush.bf16.msrb.mxu2 %v3439_v56 }
 0x138   : > { %v1144_v45 = vunpack.c.l.bf16 %v1128_v32  ;;  %v2044_v15 = vunpack.c.l.b16 %v2028_v9  ;;  %v2056_v33 = vsel %vm1678_vm3, %v2041_v44, %v2055_v7  ;;  %v2062_v26 = vsel %vm1676_vm2, %v2048_v21, %v4897_v25  ;;  %v3430_v9 = vld [vmem:[#allocation10 + $0xa0] sm:$0xff] }
 0x139   : > { %v1179_v47 = vrot.slane %v1143_v10, 4  ;;  %v2052_v50 = vunpack.c.l.b16 %v2036_v17  ;;  %v2053_v37 = vunpack.c.l.b16 %v2037_v20  ;;  %v2057_v24 = vsel %vm1680_vm4, %v2042_v60, %v2056_v33  ;;  %2505 = vmatpush.bf16.msrb.mxu1 %v3430_v9 }
 0x13a   : > { %v1185_v36 = vrot.slane %v1144_v45, 4  ;;  %v2063_v39 = vsel %vm1678_vm3, %v2049_v41, %v2062_v26  ;;  %v2058_v48 = vsel %vm1682_vm5, %v2043_v63, %v2057_v24  ;;  %v1207_v21 = vrot.slane %v1206_v3, 1 }
 0x13b   : > { %v1084_v61 = vpop.permute.xlu1 %1083  ;;  %v1087_v28 = vpop.permute.xlu0 %1086  ;;  %v1180_v40 = vadd.f32 %v1179_v47, %v1143_v10  ;;  %v2064_v4 = vsel %vm1680_vm4, %v2050_v51, %v2063_v39  ;;  %v1218_v25 = vadd.f32 %v1217_v53, %v1216_v13  ;;  %v2045_v54 = vunpack.c.l.b16 %v2029_v62  ;;  %v3429_v62 = vld [vmem:[#allocation10 + $0x98] sm:$0xff] }
 0x13c   : > { %vm1104_vm12 = vcmp.eq.s32.totalorder %v4724_v42, %v1084_v61  ;;  %vm1105_vm14 = vcmp.eq.s32.totalorder %v4724_v42, %v1087_v28  ;;  %v2059_v23 = vsel %vm1684_vm6, %v2044_v15, %v2058_v48  ;;  %v1186_v60 = vadd.f32 %v1185_v36, %v1144_v45 }
 0x13d   : > { %vm1120_vm13 = vmpackc.low %vm1104_vm12, %vm1104_vm12  ;;  %v2065_v1 = vsel %vm1682_vm5, %v2051_v18, %v2064_v4  ;;  %v1245_v63 = vrot.slane %v1154_v29, 4  ;;  %v1181_v22 = vrot.slane %v1180_v40, 2  ;;  %v1224_v6 = vadd.f32 %v1223_v8, %v1222_v52  ;;  %2506 = vmatpush.bf16.msrb.mxu1 %v3429_v62 }
 0x13e   : > { %v1136_v49 = vsel %vm1120_vm13, %v4656_v55, 0  ;;  %vm1121_vm15 = vmpackc.low %vm1105_vm14, %vm1105_vm14  ;;  %v2066_v55 = vsel %vm1684_vm6, %v2052_v50, %v2065_v1  ;;  %v2060_v5 = vsel %vm1686_vm7, %v2045_v54, %v2059_v23  ;;  %v1160_v2 = vadd.f32 %v1159_v43, %v1158_v0  ;;  %v3428_v54 = vld [vmem:[#allocation10 + $0x90] sm:$0xff]  ;;  %v3437_v23 = vld [vmem:[#allocation10 + $0xd8] sm:$0xff] }
 0x13f   : > { %v1152_v41 = vunpack.c.l.bf16 %v1136_v49  ;;  %v1137_v44 = vsel %vm1121_vm15, %v4659_v35, 0  ;;  %v2067_v10 = vsel %vm1686_vm7, %v2053_v37, %v2066_v55  ;;  %v1219_v51 = vrot.slane %v1218_v25, 1  ;;  %v3423_v55 = vld [vmem:[#allocation10 + $0x68] sm:$0xff] }
 0x140   : > { %v1153_v14 = vunpack.c.l.bf16 %v1137_v44  ;;  %v2068_v17 = vpack.c.b16 %v2067_v10, %v2060_v5  ;;  %v1214_v18 = vadd.f32 %v1213_v27, %v5000_v34  ;;  %v1192_v19 = vadd.f32 %v1191_v46, %v4994_v31  ;;  %v3425_v31 = vld [vmem:[#allocation10 + $0x78] sm:$0xff]  ;;  %v3447_v27 = vld [vmem:[#allocation10 + $0x128] sm:$0xff] }
 0x141   : > { %v1233_v32 = vrot.slane %v1152_v41, 4  ;;  %v1187_v35 = vrot.slane %v1186_v60, 2  ;;  %v5049_v52 = vadd.f32 %v1171_v38, %v4951_v58  ;;  %v1208_v12 = vadd.f32 %v1207_v21, %v1206_v3  ;;  %2488 = vmatpush.bf16.msrb.mxu0 %v3425_v31  ;;  %2532 = vmatpush.bf16.msrb.mxu3 %v3447_v27 }
 0x142   : > { %v1239_v57 = vrot.slane %v1153_v14, 4  ;;  %v1182_v47 = vadd.f32 %v1181_v22, %v1180_v40  ;;  %2482 = vmatmul.bf16.vlgmr.msra.gmra.mxu3 %v2068_v17  ;;  %v1177_v45 = vrot.slane %v5011_v30, 1  ;;  %v1225_v43 = vrot.slane %v1224_v6, 1  ;;  %2507 = vmatpush.bf16.msrb.mxu1 %v3428_v54  ;;  %v3133_v54 = vld [vmem:[%s732_s28] sm:$0xf] }
 0x143   : > { %v1234_v13 = vadd.f32 %v1233_v32, %v1152_v41  ;;  %v1246_v20 = vadd.f32 %v1245_v63, %v1154_v29  ;;  %v1251_v46 = vpack.c.bf16 %v1160_v2, %v1160_v2  ;;  %v1230_v61 = vadd.f32 %v1229_v11, %v4992_v16  ;;  %v3438_v29 = vld [vmem:[#allocation10 + $0xe0] sm:$0xff]  ;;  %v3424_v16 = vld [vmem:[#allocation10 + $0x70] sm:$0xff]  ;;  %v3670_v32 = vld [vmem:[%s4238_s18 + $0x1c] sm:$0xf]  ;;  %s5348_s18 = sld [smem:[#allocation36_spill]] }
 0x144   : > { %v1240_v0 = vadd.f32 %v1239_v57, %v1153_v14  ;;  %v1220_v58 = vadd.f32 %v1219_v51, %v1218_v25  ;;  %v1260_v3 = vpack.c.bf16 %v1214_v18, %v1214_v18  ;;  %v1193_v53 = vrot.slane %v1192_v19, 2  ;;  %2519 = vmatpush.bf16.msrb.mxu2 %v3438_v29  ;;  %v3446_v11 = vld [vmem:[#allocation10 + $0x120] sm:$0xff]  ;;  %v3445_v14 = vld [vmem:[#allocation10 + $0x118] sm:$0xff] }
 0x145   : > { %v1235_v34 = vrot.slane %v1234_v13, 2  ;;  %v1188_v7 = vadd.f32 %v1187_v35, %v1186_v60  ;;  %v1259_v15 = vpack.c.bf16 %v1208_v12, %v1208_v12  ;;  %v1183_v33 = vrot.slane %v1182_v47, 1  ;;  %2489 = vmatpush.bf16.msrb.mxu0 %v3424_v16  ;;  %2533 = vmatpush.bf16.msrb.mxu3 %v3446_v11 }
 0x146   : > { %v1241_v38 = vrot.slane %v1240_v0, 2  ;;  %v1252_v40 = vpack.c.bf16 %v4942_v59, %v4942_v59  ;;  %v1226_v36 = vadd.f32 %v1225_v43, %v1224_v6  ;;  %v1247_v26 = vrot.slane %v1246_v20, 2  ;;  %v1066_v59 = vpop.permute.xlu1 %1065  ;;  %v3444_v43 = vld [vmem:[#allocation10 + $0x110] sm:$0xff] }
 0x147   : > { %v1236_v8 = vadd.f32 %v1235_v34, %v1234_v13  ;;  %v1253_v37 = vpack.c.bf16 %v5049_v52, %v5049_v52  ;;  %v1178_v24 = vadd.f32 %v1177_v45, %v5011_v30  ;;  %v1231_v39 = vrot.slane %v1230_v61, 1  ;;  %v3422_v45 = vld [vmem:[#allocation10 + $0x60] sm:$0xff] }
 0x148   : > { %v1242_v28 = vadd.f32 %v1241_v38, %v1240_v0  ;;  %v1261_v48 = vpack.c.bf16 %v1220_v58, %v1220_v58  ;;  %v2086_v4 = vperm.slane %v1251_v46, 0  ;;  %v2095_v49 = vperm.slane %v1260_v3, 0  ;;  %2520 = vmatpush.bf16.msrb.mxu2 %v3437_v23  ;;  %v3426_v3 = vld [vmem:[#allocation10 + $0x80] sm:$0xff] }
 0x149   : > { %v1237_v50 = vrot.slane %v1236_v8, 1  ;;  %v1194_v21 = vadd.f32 %v1193_v53, %v1192_v19  ;;  %v1189_v25 = vrot.slane %v1188_v7, 1  ;;  %v2094_v60 = vperm.slane %v1259_v15, 0  ;;  %2490 = vmatpush.bf16.msrb.mxu0 %v3423_v55  ;;  %2534 = vmatpush.bf16.msrb.mxu3 %v3445_v14  ;;  %v3436_v19 = vld [vmem:[#allocation10 + $0xd0] sm:$0xff]  ;;  %v3435_v53 = vld [vmem:[#allocation10 + $0xc8] sm:$0xff] }
 0x14a   : > { %v1184_v1 = vadd.f32 %v1183_v33, %v1182_v47  ;;  %v1243_v41 = vrot.slane %v1242_v28, 1  ;;  %vm1098_vm0 = vcmp.eq.s32.totalorder %v4724_v42, %v1066_v59  ;;  %v2087_v44 = vperm.slane %v1252_v40, 0  ;;  %v3427_v42 = vld [vmem:[#allocation10 + $0x88] sm:$0xff]  ;;  %v3442_v59 = vld [vmem:[#allocation10 + $0x100] sm:$0xff] }
 0x14b   : > { %v1262_v63 = vpack.c.bf16 %v1226_v36, %v1226_v36  ;;  %v1248_v30 = vadd.f32 %v1247_v26, %v1246_v20  ;;  %v1238_v22 = vadd.f32 %v1237_v50, %v1236_v8  ;;  %vm1114_vm8 = vmpackc.low %vm1098_vm0, %vm1098_vm0  ;;  %v1254_v6 = vpack.c.bf16 %v1178_v24, %v1178_v24  ;;  %2508 = vmatpush.bf16.msrb.mxu1 %v3427_v42  ;;  %v3421_v36 = vld [vmem:[#allocation10 + $0x58] sm:$0xff]  ;;  %v3443_v26 = vld [vmem:[#allocation10 + $0x108] sm:$0xff] }
 0x14c   : > { %v1232_v5 = vadd.f32 %v1231_v39, %v1230_v61  ;;  %v2096_v10 = vperm.slane %v1261_v48, 0  ;;  %v1130_v2 = vsel %vm1114_vm8, %v3670_v32, 0  ;;  %v2102_v51 = vunpack.c.l.b16 %v2086_v4  ;;  %2521 = vmatpush.bf16.msrb.mxu2 %v3436_v19  ;;  %v3434_v48 = vld [vmem:[#allocation10 + $0xc0] sm:$0xff]  ;;  %v3135_v14 = vld [vmem:[%s732_s28 + $0x8] sm:$0xf0] }
 0x14d   : > { %v1195_v17 = vrot.slane %v1194_v21, 1  ;;  %v1190_v57 = vadd.f32 %v1189_v25, %v1188_v7  ;;  %v1146_v18 = vunpack.c.l.bf16 %v1130_v2  ;;  %v2111_v35 = vunpack.c.l.b16 %v2095_v49  ;;  %2491 = vmatpush.bf16.msrb.mxu0 %v3422_v45  ;;  %2535 = vmatpush.bf16.msrb.mxu3 %v3444_v43  ;;  %v3420_v25 = vld [vmem:[#allocation10 + $0x50] sm:$0xff]  ;;  %v3419_v32 = vld [vmem:[#allocation10 + $0x48] sm:$0xff] }
 0x14e   : > { %v2110_v13 = vunpack.c.l.b16 %v2094_v60  ;;  %v1255_v9 = vpack.c.bf16 %v1184_v1, %v1184_v1  ;;  %v1244_v56 = vadd.f32 %v1243_v41, %v1242_v28  ;;  %v2097_v52 = vperm.slane %v1262_v63, 0  ;;  %v3408_v63 = vld [vmem:[%s732_s28 + $0x4] sm:$0xf] }
 0x14f   : > { %v1249_v12 = vrot.slane %v1248_v30, 1  ;;  %v1264_v47 = vpack.c.bf16 %v1238_v22, %v1238_v22  ;;  %v1197_v0 = vrot.slane %v1146_v18, 4  ;;  %v2103_v20 = vunpack.c.l.b16 %v2087_v44  ;;  %2509 = vmatpush.bf16.msrb.mxu1 %v3426_v3  ;;  %v3409_v44 = vld [vmem:[%s732_s28 + $0x4] sm:$0xf0]  ;;  %s5346_s28 = sld [smem:[#allocation33_spill]] }
 0x150   : > { %v2088_v34 = vperm.slane %v1253_v37, 0  ;;  %v1263_v31 = vpack.c.bf16 %v1232_v5, %v1232_v5  ;;  %v2112_v27 = vunpack.c.l.b16 %v2096_v10  ;;  %v2089_v46 = vperm.slane %v1254_v6, 0  ;;  %2522 = vmatpush.bf16.msrb.mxu2 %v3435_v53  ;;  %v1969_v19 = vpop.f32.mrf.mxu0 }
 0x151   : > { %v1196_v61 = vadd.f32 %v1195_v17, %v1194_v21  ;;  %v1256_v58 = vpack.c.bf16 %v1190_v57, %v1190_v57  ;;  %v1198_v38 = vadd.f32 %v1197_v0, %v1146_v18  ;;  %v2118_v7 = vsel %vm1674_vm1, %v2103_v20, %v2102_v51  ;;  %2492 = vmatpush.bf16.msrb.mxu0 %v3421_v36 }
 0x152   : > { %v2125_v8 = vsel %vm1674_vm1, %v2111_v35, %v2110_v13  ;;  %v2090_v62 = vperm.slane %v1255_v9, 0  ;;  %v1265_v29 = vpack.c.bf16 %v1244_v56, %v1244_v56  ;;  %v2113_v15 = vunpack.c.l.b16 %v2097_v52  ;;  %2536 = vmatpush.bf16.msrb.mxu3 %v3443_v26  ;;  %v3663_v9 = vld [vmem:[%s5211_s6] ss:$0 sm:$0xff] }
 0x153   : > { %v1250_v33 = vadd.f32 %v1249_v12, %v1248_v30  ;;  %v2099_v28 = vperm.slane %v1264_v47, 0  ;;  %v1199_v40 = vrot.slane %v1198_v38, 2  ;;  %v2104_v50 = vunpack.c.l.b16 %v2088_v34  ;;  %v3418_v52 = vld [vmem:[#allocation10 + $0x40] sm:$0xff] }
 0x154   : > { %v2098_v16 = vperm.slane %v1263_v31, 0  ;;  %v2126_v11 = vsel %vm1676_vm2, %v2112_v27, %v2125_v8  ;;  %v2105_v37 = vunpack.c.l.b16 %v2089_v46  ;;  %v2091_v24 = vperm.slane %v1256_v58, 0  ;;  %2523 = vmatpush.bf16.msrb.mxu2 %v3434_v48  ;;  %v1997_v31 = vpop.f32.mrf.mxu2  ;;  %v3465_v48 = vld [vmem:[%s5345_s20 + $0x38] sm:$0xff] }
 0x155   : > { %v1200_v39 = vadd.f32 %v1199_v40, %v1198_v38  ;;  %v1257_v4 = vpack.c.bf16 %v1196_v61, %v1196_v61  ;;  %v2106_v49 = vunpack.c.l.b16 %v2090_v62  ;;  %v2100_v21 = vperm.slane %v1265_v29, 0  ;;  %2493 = vmatpush.bf16.msrb.mxu0 %v3420_v25  ;;  %2707 = vmatpush.bf16.msra.mxu1 %v3465_v48 }
 0x156   : > { %v2119_v23 = vsel %vm1676_vm2, %v2104_v50, %v2118_v7  ;;  %v1266_v60 = vpack.c.bf16 %v1250_v33, %v1250_v33  ;;  %v2115_v1 = vunpack.c.l.b16 %v2099_v28  ;;  %v2127_v30 = vsel %vm1678_vm3, %v2113_v15, %v2126_v11  ;;  %2537 = vmatpush.bf16.msrb.mxu3 %v3442_v59  ;;  %v3457_v50 = vld [vmem:[%s5214_s9 + $0x38] sm:$0xff]  ;;  %v3455_v11 = vld [vmem:[%s5214_s9 + $0x28] sm:$0xff] }
 0x157   : > { %v1201_v41 = vrot.slane %v1200_v39, 1  ;;  %v2114_v22 = vunpack.c.l.b16 %v2098_v16  ;;  %v3134_v55 = vor.u32 %v3409_v44, %v3133_v54  ;;  %v2107_v6 = vunpack.c.l.b16 %v2091_v24  ;;  %v3456_v16 = vld [vmem:[%s5214_s9 + $0x30] sm:$0xff]  ;;  %v3451_v54 = vld [vmem:[%s5214_s9 + $0x8] sm:$0xff]  ;;  %v3462_v44 = vld [vmem:[%s5345_s20 + $0x20] sm:$0xff] }
 0x158   : > { %v3138_v10 = vor.u32 %v3408_v63, %v3135_v14  ;;  %v2120_v2 = vsel %vm1678_vm3, %v2105_v37, %v2119_v23  ;;  %v2092_v51 = vperm.slane %v1257_v4, 0  ;;  %v2116_v17 = vunpack.c.l.b16 %v2100_v21  ;;  %v1971_v3 = vpop.f32.mrf.mxu0  ;;  %v3454_v37 = vld [vmem:[%s5214_s9 + $0x20] sm:$0xff]  ;;  %v3452_v4 = vld [vmem:[%s5214_s9 + $0x10] sm:$0xff] }
 0x159   : > { %v1202_v5 = vadd.f32 %v1201_v41, %v1200_v39  ;;  %2524 = vmatmul.bf16.vlgmr.msrb.gmra.mxu2 %v3134_v55  ;;  %v2121_v57 = vsel %vm1680_vm4, %v2106_v49, %v2120_v2  ;;  %v2128_v18 = vsel %vm1680_vm4, %v2114_v22, %v2127_v30  ;;  %v2101_v42 = vperm.slane %v1266_v60, 0  ;;  %2494 = vmatpush.bf16.msrb.mxu0 %v3419_v32  ;;  %v3453_v39 = vld [vmem:[%s5214_s9 + $0x18] sm:$0xff]  ;;  %v3664_v49 = vld [vmem:[%s5346_s28] ss:$0 sm:$0xff]  ;;  %v3464_v21 = vld [vmem:[%s5345_s20 + $0x30] sm:$0xff]  ;;  %s3865_s28 = sshra.s32 %s2804_s29, 4  ;;  %s3866_s28 = int_to_ptr.hbm [resolvable:$true] %s3865_s28 }
 0x15a   : > { %v2129_v13 = vsel %vm1682_vm5, %v2115_v1, %v2128_v18  ;;  %2538 = vmatmul.bf16.vlgmr.msrb.gmra.mxu3 %v3138_v10  ;;  %v2122_v12 = vsel %vm1682_vm5, %v2107_v6, %v2121_v57  ;;  %v2108_v47 = vunpack.c.l.b16 %v2092_v51  ;;  %v1970_v20 = vadd.f32 %v3663_v9, %v1969_v19  ;;  %2708 = vmatpush.bf16.msra.mxu1 %v3464_v21  ;;  %v3463_v60 = vld [vmem:[%s5345_s20 + $0x28] sm:$0xff]  ;;  %v3450_v41 = vld [vmem:[%s5214_s9] sm:$0xff]  ;;  %s3867_s30 = scalar_lea.hbm %s3866_s28, 8  ;;  %p3872_p11 = scmp.lt.s32.totalorder %s3866_s28, %s5350_s8 }
 0x15b   : > { %v1258_v35 = vpack.c.bf16 %v1202_v5, %v1202_v5  ;;  %v2130_v0 = vsel %vm1684_vm6, %v2116_v17, %v2129_v13  ;;  %v2117_v43 = vunpack.c.l.b16 %v2101_v42  ;;  %v1972_v7 = vadd.f32 %v3663_v9, %v1971_v3  ;;  %v3466_v3 = vld [vmem:[#allocation11] sm:$0xff]  ;;  %p3868_p3 = scmp.ne.s32.totalorder %s3866_s28, %s3867_s30  ;;  %p3873_p10 = scmp.lt.s32.totalorder %s3871_s25, %s3867_s30 }
 0x15c   : > { %v2123_v34 = vsel %vm1684_vm6, %v2108_v47, %v2122_v12  ;;  %v1999_v62 = vpop.f32.mrf.mxu2  ;;  %v3461_v12 = vld [vmem:[%s5345_s20 + $0x18] sm:$0xff]  ;;  %v3460_v47 = vld [vmem:[%s5345_s20 + $0x10] sm:$0xff]  ;;  %vm2744_vm1 = vcmask 261120  }
 0x15d   : > { %v2093_v56 = vperm.slane %v1258_v35, 0  ;;  %2495 = vmatpush.bf16.msrb.mxu0 %v3418_v52  ;;  %v2131_v46 = vsel %vm1686_vm7, %v2117_v43, %v2130_v0  ;;  %v3459_v0 = vld [vmem:[%s5345_s20 + $0x8] sm:$0xff]  ;;  %p3869_p1 = pnand %p3868_p3, %p4133_p5  ;;  %p3874_p12 = por %p3873_p10, %p3872_p11 }
 0x15e   : > { %2709 = vmatpush.bf16.msra.mxu1 %v3463_v60  ;;  %v3467_v43 = vld [vmem:[#allocation11 + $0x8] sm:$0xff] }
 0x15f   : > { %v2109_v45 = vunpack.c.l.b16 %v2093_v56  ;;  %2754 = vmatpush.bf16.msra.mxu2 %v3467_v43  ;;  %p3870_p2 = pneg %p3869_p1 }
 0x161   : > { %v2124_v27 = vsel %vm1686_vm7, %v2109_v45, %v2123_v34  ;;  %2622 = vmatpush.bf16.msra.mxu0 %v3457_v50  ;;  %v3458_v45 = vld [vmem:[%s5345_s20] sm:$0xff]  ;;  %p3875_p13 = pnand %p3874_p12, %p3870_p2 }
 0x162   : > { %v2132_v61 = vpack.c.b16 %v2131_v46, %v2124_v27  ;;  %2710 = vmatpush.bf16.msra.mxu1 %v3462_v44  ;;  %v3665_v34 = vld [vmem:[%s5347_s12] ss:$0 sm:$0xff] }
 0x163   : > { %2755 = vmatpush.bf16.msra.mxu2 %v3466_v3 }
 0x164   : > { %2496 = vmatmul.bf16.vlgmr.msrb.gmra.mxu0 %v2132_v61 }
 0x165   : > { %2623 = vmatpush.bf16.msra.mxu0 %v3456_v16 }
 0x166   : > { %2711 = vmatpush.bf16.msra.mxu1 %v3461_v12 }
 0x169   : > { %2624 = vmatpush.bf16.msra.mxu0 %v3455_v11 }
 0x16a   : > { %2712 = vmatpush.bf16.msra.mxu1 %v3460_v47 }
 0x16d   : > { %2625 = vmatpush.bf16.msra.mxu0 %v3454_v37 }
 0x16e   : > { %2713 = vmatpush.bf16.msra.mxu1 %v3459_v0 }
 0x171   : > { %2626 = vmatpush.bf16.msra.mxu0 %v3453_v39 }
 0x172   : > { %2714 = vmatpush.bf16.msra.mxu1 %v3458_v45 }
 0x174   : > { %v1983_v58 = vpop.f32.mrf.mxu1 }
 0x175   : > { %v1984_v38 = vadd.f32 %v1983_v58, %v1970_v20  ;;  %2627 = vmatpush.bf16.msra.mxu0 %v3452_v4 }
 0x177   : > { %v1998_v53 = vadd.f32 %v1997_v31, %v1984_v38 }
 0x179   : > { %v2002_v29 = vpack.c.bf16 %v1998_v53, %v1998_v53  ;;  %2628 = vmatpush.bf16.msra.mxu0 %v3451_v54 }
 0x17b   : > { %v2136_v28 = vunpack.c.l.b16 %v2002_v29 }
 0x17c   : > { %v1985_v8 = vpop.f32.mrf.mxu1 }
 0x17d   : > { %v1986_v15 = vadd.f32 %v1985_v8, %v1972_v7  ;;  %2629 = vmatpush.bf16.msra.mxu0 %v3450_v41  ;;  %v3666_v7 = vld [vmem:[%s5348_s18] ss:$0 sm:$0xff] }
 0x17f   : > { %v2000_v33 = vadd.f32 %v1999_v62, %v1986_v15 }
 0x181   : > { %v2003_v40 = vpack.c.bf16 %v2000_v33, %v2000_v33 }
 0x183   : > { %v2137_v36 = vunpack.c.l.b16 %v2003_v40 }
 0x185   : > { %v2138_v26 = vpack.c.b16 %v2137_v36, %v2136_v28 }
 0x187   : > { %2510 = vmatmul.bf16.vlgmr.msrb.gmra.mxu1 %v2138_v26 }
 0x1c5   : > { %v2483_v24 = vpop.f32.mrf.mxu3 }
 0x1c6   : > { %v2484_v23 = vadd.f32 %v3664_v49, %v2483_v24 }
 0x1cd   : > { %v2485_v59 = vpop.f32.mrf.mxu3 }
 0x1ce   : > { %v2486_v6 = vadd.f32 %v3664_v49, %v2485_v59 }
 0x1dc   : > { %v2525_v30 = vpop.f32.mrf.mxu2 }
 0x1dd   : > { %v2539_v55 = vpop.f32.mrf.mxu3 }
 0x1e1   : > { %v2497_v25 = vpop.f32.mrf.mxu0 }
 0x1e2   : > { %v2498_v1 = vadd.f32 %v2497_v25, %v2484_v23 }
 0x1e4   : > { %v2527_v17 = vpop.f32.mrf.mxu2 }
 0x1e5   : > { %v2541_v18 = vpop.f32.mrf.mxu3 }
 0x1e9   : > { %v2499_v14 = vpop.f32.mrf.mxu0 }
 0x1ea   : > { %v2500_v10 = vadd.f32 %v2499_v14, %v2486_v6 }
 0x204   : > { %v2511_v63 = vpop.f32.mrf.mxu1 }
 0x205   : > { %v2512_v22 = vadd.f32 %v2511_v63, %v2498_v1 }
 0x207   : > { %v2526_v5 = vadd.f32 %v2525_v30, %v2512_v22 }
 0x209   : > { %v2540_v2 = vadd.f32 %v2539_v55, %v2526_v5 }
 0x20b   : > { %v2544_v42 = vpack.c.bf16 %v2540_v2, %v2540_v2 }
 0x20c   : > { %v2513_v32 = vpop.f32.mrf.mxu1 }
 0x20d   : > { %v2514_v51 = vadd.f32 %v2513_v32, %v2500_v10  ;;  %v2570_v9 = vunpack.c.l.b16 %v2544_v42 }
 0x20f   : > { %v2528_v57 = vadd.f32 %v2527_v17, %v2514_v51 }
 0x211   : > { %v2542_v19 = vadd.f32 %v2541_v18, %v2528_v57 }
 0x213   : > { %v2545_v35 = vpack.c.bf16 %v2542_v19, %v2542_v19  ;;  %v3537_v13 = vpack.c.bf16 %v2542_v19, %v2540_v2 }
 0x215   : > { %v2571_v56 = vunpack.c.l.b16 %v2545_v35  ;;  %3538 = vst [vmem:[%s5126_s21] sm:$0xff] %v3537_v13  }
 0x217   : > { %v2572_v52 = vpack.c.b16 %v2571_v56, %v2570_v9 }
 0x219   : > { %2630 = vmatmul.bf16.vlgmr.msra.gmra.mxu0 %v2572_v52 }
 0x296   : > { %v2631_v20 = vpop.f32.mrf.mxu0 }
 0x297   : > { %v2632_v31 = vadd.f32 %v3665_v34, %v2631_v20 }
 0x299   : > { %v2636_v61 = vmax.f32 %v2632_v31, 0.0 }
 0x29e   : > { %v2633_v27 = vpop.f32.mrf.mxu0 }
 0x29f   : > { %v2634_v46 = vadd.f32 %v3665_v34, %v2633_v27 }
 0x2a1   : > { %v2637_v58 = vmax.f32 %v2634_v46, 0.0 }
 0x2a3   : > { %v2638_v38 = vpack.c.bf16 %v2637_v58, %v2636_v61 }
 0x2a5   : > { %2715 = vmatmul.bf16.vlgmr.msra.gmra.mxu1 %v2638_v38 }
 0x322   : > { %v2716_v53 = vpop.f32.mrf.mxu1 }
 0x323   : > { %v2717_v8 = vadd.f32 %v3666_v7, %v2716_v53 }
 0x325   : > { %v2721_v15 = vmax.f32 %v2717_v8, 0.0 }
 0x32a   : > { %v2718_v62 = vpop.f32.mrf.mxu1 }
 0x32b   : > { %v2719_v29 = vadd.f32 %v3666_v7, %v2718_v62 }
 0x32d   : > { %v2722_v33 = vmax.f32 %v2719_v29, 0.0 }
 0x32f   : > { %v2723_v28 = vpack.c.bf16 %v2722_v33, %v2721_v15 }
 0x331   : > { %3371 = vmatmul.msk.bf16.vlgmr.msra.gmra.mxu2 %vm2744_vm1, %v2723_v28 }
 0x332   : > { %3878 = shalt.err (!%p3875_p13)
}
 0x333   : > { %s3971_s21 = smov 64   ;;  %s3972_s2 = smov 4  }
 0x334   : > { %3577 = dma.vmem_to_hbm [thread:$0]  (%p4133_p5), %s2802_s24, 128, %s2804_s29, %s2772_s26, %s3971_s21, %s3971_s21, %s3972_s2  }
 0x335   : > { %s5351_s27 = sld [smem:[#allocation37_spill]]  ;;  %s710_s11 = scalar_lea.vmem [#allocation13], %s3028_s15 }
 0x336   : > { %s5352_s30 = sld [smem:[#allocation38_spill]]  ;;  %s2784_s25 = sshll.u32 %s710_s11, 4  ;;  %s2785_s25 = int_to_ptr.vmem [resolvable:$true] %s2784_s25 }
 0x337   : > { %s2767_s24 = scalar_lea.sflag [#allocation4], %s4234_s14 }
 0x33b   : > { %v3667_v36 = vld [vmem:[%s5351_s27] ss:$0 sm:$0xff] }
 0x33c   : > { %s2783_s5 = scalar_lea.hbm %s5352_s30, %s3468_s17  ;;  %s3899_s15 = scalar_lea.hbm %s5352_s30, 32 }
 0x33d   : > { %s2786_s12 = sshll.u32 %s2783_s5, 4  ;;  %s2787_s12 = int_to_ptr.hbm [resolvable:$true] %s2786_s12 }
 0x33e   : > { %s3893_s29 = sshra.s32 %s2787_s12, 4  ;;  %s3894_s29 = int_to_ptr.hbm [resolvable:$true] %s3893_s29 }
 0x33f   : > { %s3895_s26 = scalar_lea.hbm %s3894_s29, 8  ;;  %p3900_p0 = scmp.lt.s32.totalorder %s3894_s29, %s5352_s30 }
 0x340   : > { %p3896_p8 = scmp.ne.s32.totalorder %s3894_s29, %s3895_s26  ;;  %p3901_p4 = scmp.lt.s32.totalorder %s3899_s15, %s3895_s26 }
 0x342   : > { %p3897_p7 = pnand %p3896_p8, %p4133_p5  ;;  %p3902_p3 = por %p3901_p4, %p3900_p0 }
 0x344   : > { %p3898_p9 = pneg %p3897_p7 }
 0x346   : > { %p3903_p1 = pnand %p3902_p3, %p3898_p9 }
 0x3b4   : > { %v2757_v40 = vpop.f32.mrf.mxu2 }
 0x3b5   : > { %v2758_v50 = vadd.f32 %v3667_v36, %v2757_v40 }
 0x3bc   : > { %v2759_v26 = vpop.f32.mrf.mxu2 }
 0x3bd   : > { %v2760_v16 = vadd.f32 %v3667_v36, %v2759_v26 }
 0x3bf   : > { %v3542_v11 = vpack.c.bf16 %v2760_v16, %v2758_v50 }
 0x3c1   : > { %3543 = vst [vmem:[%s710_s11] sm:$0xff] %v3542_v11  }
 0x3c2   : > { %3906 = shalt.err (!%p3903_p1)
}
 0x3c3   : > { %3576 = dma.vmem_to_hbm [thread:$0]  (%p4133_p5), %s2785_s25, 128, %s2787_s12, %s2767_s24, %s3971_s21, %s3971_s21, %s3972_s2  }
 0x3c4 PF: > { %s5353_s14 = sld [smem:[#allocation23_spill]] }
 0x3c5   : > { %s5354_s27 = sld [smem:[#allocation22_spill]] }
 0x3ca   : > { %p3614_p2 = scmp.ge.s32.totalorder %s5353_s14, 2 }
 0x3cb   : > { %s2818_s28 = sand.u32 1, %s5354_s27  }
 0x3cc   : > { %p3601_p11 = pnand %p3614_p2, %p4093_p6  ;;  %s2819_s5 = scalar_lea.sflag [#allocation4], %s2818_s28 }
 0x3ce   : > { %p3602_p10 = pneg %p3601_p11 }
 0x3d0   : > { %3940 = dma.done.wait (%p3602_p10), %s2819_s5, 128  }
 0x3d1   : > { %3942 = vsyncadd (%p3602_p10), %s2819_s5, 4294967168  ;;  %s2829_s11 = scalar_lea.sflag [#allocation15], %s2818_s28 }
 0x3d2   : > { %3944 = dma.done.wait (%p3602_p10), %s2829_s11, 128  }
 0x3d3   : > { %3946 = vsyncadd (%p3602_p10), %s2829_s11, 4294967168  ;;  %s5356_s24 = sld [smem:[#allocation25_spill]]  ;;  %s5358_s21 = smov %s3953_s22 }
 0x3d4   : > { %s5357_s10 = sld [smem:[#allocation26_spill]]  ;;  %s5359_s22 = smov %s3957_s23 }
 0x3d9   : > { %p38_p5 = scmp.ge.s32.totalorder %s5356_s24, 6  }
 0x3da   : > { %s5360_s23 = smov %s5357_s10 }
 0x3db   :  { %40 = sbr.rel (!%p38_p5) target bundleno = 22 (0x16), region = 184 }
 0x3e0   :  { %2835 = vsyncpa [#allocation3], 1 }
 0x3e1   :  { %2837 = vsyncpa [#allocation3 + $0x1], 1 }
 0x3e2   :  { %2838 = vsyncpa [#allocation6], 1 }
 0x3e3   :  { %2840 = vsyncpa [#allocation6 + $0x1], 1 }
 0x3e4   :  { %2841 = vsyncpa [#allocation9], 1 }
 0x3e5   :  { %2842 = vsyncpa [#allocation12], 1 }
 0x3e6   :  { %2843 = vsyncpa [#allocation4], 1 }
 0x3e7   :  { %2845 = vsyncpa [#allocation4 + $0x1], 1 }
 0x3e8   :  { %2846 = vsyncpa [#allocation15], 1 }
 0x3e9   :  { %2848 = vsyncpa [#allocation15 + $0x1], 1 }

// kernel: tpu_custom_call.1
= control target key start
LH: loop header
LB: loop body
LE: loop exit
PB: predicated region body
PF: predicated region fallthrough
CT: control target
= control target key end

     0   :  { %s5205_s0 = inlined_call_operand.vmem [shape: s32[64,2], index: 0, kind: input, shape index: {}]   ;;  %s5206_s1 = inlined_call_operand.hbm [shape: bf16[64,8,128], index: 1, kind: input, shape index: {}]   ;;  %s5207_s2 = inlined_call_operand.hbm [shape: bf16[64,8,128], index: 2, kind: input, shape index: {}]   ;;  %s5208_s3 = inlined_call_operand.hbm [shape: bf16[64,8,128], index: 3, kind: input, shape index: {}]   ;;  %s5209_s4 = inlined_call_operand.vmem [shape: bf16[64,256], index: 4, kind: input, shape index: {}]   ;;  %s5210_s5 = inlined_call_operand.hbm [shape: bf16[384,128], index: 5, kind: input, shape index: {}]   ;;  %s5211_s6 = inlined_call_operand.vmem [shape: f32[1,128], index: 6, kind: input, shape index: {}]   ;;  %s5212_s7 = inlined_call_operand.hbm [shape: bf16[640,128], index: 7, kind: input, shape index: {}]   ;;  %s5213_s8 = inlined_call_operand.vmem [shape: f32[1,128], index: 8, kind: input, shape index: {}]   ;;  %s5214_s9 = inlined_call_operand.vmem [shape: bf16[128,128], index: 9, kind: input, shape index: {}]   ;;  %s5215_s10 = inlined_call_operand.vmem [shape: f32[1,128], index: 10, kind: input, shape index: {}]   ;;  %s5216_s11 = inlined_call_operand.vmem [shape: bf16[128,32], index: 11, kind: input, shape index: {}]   ;;  %s5217_s12 = inlined_call_operand.vmem [shape: f32[1,32], index: 12, kind: input, shape index: {}]   ;;  %s5218_s13 = inlined_call_operand.hbm [shape: bf16[32,128], index: 13, kind: input, shape index: {}]   ;;  %s5219_s14 = inlined_call_operand.vmem [shape: f32[1,128], index: 14, kind: input, shape index: {}]   ;;  %s5220_s15 = inlined_call_operand.hbm [shape: bf16[64,128], index: 15, kind: output, shape index: {0}]   ;;  %s5221_s16 = inlined_call_operand.hbm [shape: bf16[64,128], index: 16, kind: output, shape index: {1}]  }
   0x1   :  { %5244 = sst [smem:[#allocation30_spill]] %s5205_s0 }
   0x2   :  { %5245 = sst [smem:[#allocation31_spill]] %s5207_s2 }
   0x3   :  { %5246 = sst [smem:[#allocation32_spill]] %s5210_s5 }
   0x4   :  { %5247 = sst [smem:[#allocation33_spill]] %s5213_s8 }
   0x5   :  { %5248 = sst [smem:[#allocation34_spill]] %s5215_s10 }
   0x6   :  { %5249 = sst [smem:[#allocation35_spill]] %s5216_s11 }
   0x7   :  { %5250 = sst [smem:[#allocation36_spill]] %s5217_s12 }
   0x8   :  { %5251 = sst [smem:[#allocation37_spill]] %s5219_s14 }
   0x9   :  { %5252 = sst [smem:[#allocation38_spill]] %s5220_s15 }
   0xa   :  { %5253 = sst [smem:[#allocation39_spill]] %s5221_s16 }
   0xb   :  { %22 = vsyncpa [#allocation3], 0 }
   0xc   :  { %24 = vsyncpa [#allocation3 + $0x1], 0 }
   0xd   :  { %25 = vsyncpa [#allocation6], 0 }
   0xe   :  { %27 = vsyncpa [#allocation6 + $0x1], 0 }
   0xf   :  { %28 = vsyncpa [#allocation9], 0 }
  0x10   :  { %29 = vsyncpa [#allocation12], 0 }
  0x11   :  { %30 = vsyncpa [#allocation4], 0 }
  0x12   :  { %32 = vsyncpa [#allocation4 + $0x1], 0 }
  0x13   :  { %33 = vsyncpa [#allocation15], 0 }
  0x14   :  { %35 = vsyncpa [#allocation15 + $0x1], 0  ;;  %s4058_s21 = smov 0   ;;  %s4060_s22 = smov 0  }
  0x15   :  { %s4062_s23 = smov 0   ;;  %s4064_s24 = smov 0  }
  0x16 LB: > { %5254 = sst [smem:[#allocation22_spill]] %s3949_s21  ;;  %s4079_s25 = sadd.s32 4294967295, %s3961_s24   ;;  %s3961_s24 = sphi %s4064_s24, %s5356_s24   ;;  %s3957_s23 = sphi %s4062_s23, %s5360_s23   ;;  %s3953_s22 = sphi %s4060_s22, %s5359_s22   ;;  %s3949_s21 = sphi %s4058_s21, %s5358_s21  }
  0x17   : > { %5255 = sst [smem:[#allocation23_spill]] %s3961_s24  ;;  %s3006_s26 = sadd.s32 4294967294, %s3961_s24  }
  0x18   : > { %p87_p0 = scmp.ne.s32.totalorder %s3953_s22, %s3949_s21  ;;  %p5237_p1 = scmp.eq.s32.totalorder %s4079_s25, 0 }
  0x19   : > { %p399_p2 = scmp.eq.s32.totalorder %s4079_s25, 3  ;;  %p405_p3 = scmp.eq.s32.totalorder %s3006_s26, 3 }
  0x1a   : > { %p4088_p4 = por %p5237_p1, %p87_p0  ;;  %p3007_p5 = scmp.ge.s32.totalorder %s3961_s24, 1 }
  0x1b   : > { %p4093_p6 = por %p405_p3, %p87_p0  ;;  %p438_p7 = scmp.lt.s32.totalorder %s3961_s24, 5 }
  0x1c   : > { %s5259_s5 = sld [smem:[#allocation32_spill]]  ;;  %s3963_s18 = smov [#allocation8]  }
  0x1d   : > { %s5257_s28 = scalar_select %p4093_p6, 1, 0 }
  0x1e   : > { %p4101_p8 = pnand %p3007_p5, %p438_p7  ;;  %s451_s19 = sshll.u32 %s3963_s18, 4  ;;  %s452_s19 = int_to_ptr.vmem [resolvable:$true] %s451_s19 }
  0x1f   : > { %5258 = sst [smem:[#allocation24_spill]] %s5257_s28  ;;  %s4114_s26 = sadd.s32 1, %s3961_s24  }
  0x20   : > { %p3580_p9 = pneg %p4101_p8  ;;  %5262 = sst [smem:[#allocation25_spill]] %s4114_s26 }
  0x21   : > { %s5225_s29 = smov 64   ;;  %s5227_s30 = smov 4  }
  0x22   : > { %s449_s0 = sshll.u32 %s5259_s5, 4  ;;  %p4109_p10 = pnand %p3580_p9, %p5237_p1  ;;  %s450_s0 = int_to_ptr.hbm [resolvable:$true] %s449_s0 }
  0x23   : > { %s71_s18 = ssub.s32 %s3961_s24, %s4114_s26  ;;  %s74_s5 = sadd.s32 1, %s3957_s23 }
  0x24   : > { %3583 = dma.hbm_to_vmem [thread:$0]  (!%p4109_p10), %s450_s0, 3072, %s452_s19, [#allocation9], %s5225_s29, %s5225_s29, %s5227_s30  }
  0x25   : > { %p72_p11 = scmp.eq.s32.totalorder %s71_s18, 0  ;;  %p81_p12 = scmp.ne.s32.totalorder %s3957_s23, %s3953_s22 }
  0x26   : > { %p82_p13 = scmp.eq.s32.totalorder %s3961_s24, 0  ;;  %p3610_p0 = scmp.lt.s32.totalorder %s3961_s24, 4 }
  0x27   : > { %s4129_s28 = scalar_select %p72_p11, %s3957_s23, %s74_s5  }
  0x28   : > { %p83_p3 = por %p82_p13, %p81_p12  ;;  %p4133_p5 = por %p399_p2, %p81_p12 }
  0x29   : > { %5263 = sst [smem:[#allocation26_spill]] %s4129_s28  ;;  %s5234_s15 = sand.u32 1, %s3957_s23  }
  0x2a   : > { %s5264_s21 = scalar_select %p4133_p5, 1, 0 }
  0x2b   : > { %s4139_s14 = sshll.u32 %s3961_s24, 6  ;;  %s4143_s0 = sshll.u32 %s5234_s15, 6 }
  0x2c   : > { %5265 = sst [smem:[#allocation27_spill]] %s5264_s21  ;;  %p4145_p7 = pnand %p3610_p0, %p83_p3 }
  0x2d   : > { %s545_s5 = sand.u32 1, %s3961_s24   ;;  %s5267_s2 = sld [smem:[#allocation31_spill]] }
  0x2e   : > { %s549_s28 = scalar_lea.vmem [#allocation5], %s4143_s0  ;;  %s466_s12 = sshll.u32 %s5212_s7, 4  ;;  %s467_s12 = int_to_ptr.hbm [resolvable:$true] %s466_s12 }
  0x2f   : > { %s557_s26 = sshll.u32 %s549_s28, 4  ;;  %s4158_s10 = scalar_lea.sflag [#allocation6], %s545_s5  ;;  %s558_s26 = int_to_ptr.vmem [resolvable:$true] %s557_s26 }
  0x30   : > { %p3705_p9 = pneg %p4145_p7 }
  0x33   : > { %s554_s30 = scalar_lea.hbm %s5267_s2, %s4139_s14 }
  0x34   : > { %s555_s16 = sshll.u32 %s554_s30, 4  ;;  %s3708_s30 = scalar_lea.hbm %s5267_s2, 256  ;;  %s556_s16 = int_to_ptr.hbm [resolvable:$true] %s555_s16 }
  0x35   : > { %s3701_s8 = sshra.s32 %s556_s16, 4  ;;  %s3702_s8 = int_to_ptr.hbm [resolvable:$true] %s3701_s8 }
  0x36   : > { %s3703_s11 = scalar_lea.hbm %s3702_s8, 64  ;;  %p3709_p13 = scmp.lt.s32.totalorder %s3702_s8, %s5267_s2 }
  0x37   : > { %p3704_p2 = scmp.ne.s32.totalorder %s3702_s8, %s3703_s11  ;;  %p3710_p0 = scmp.lt.s32.totalorder %s3708_s30, %s3703_s11 }
  0x39   : > { %p3706_p11 = pnand %p3705_p9, %p3704_p2  ;;  %p3711_p3 = por %p3710_p0, %p3709_p13 }
  0x3b   : > { %p3707_p12 = pneg %p3706_p11 }
  0x3d   : > { %p3712_p1 = pnand %p3711_p3, %p3707_p12 }
  0x3f   : > { %3715 = shalt.err (!%p3712_p1)
}
  0x40   : > { %s5268_s15 = smov 4   ;;  %s5269_s21 = smov 64  }
  0x41   : > { %3596 = dma.hbm_to_vmem [thread:$0]  (!%p4145_p7), %s556_s16, 1024, %s558_s26, %s4158_s10, %s5269_s21, %s5269_s21, %s5268_s15  }
  0x42   : > { %s3966_s5 = smov [#allocation10]   ;;  %s495_s28 = sshll.u32 %s5218_s13, 4  ;;  %s496_s28 = int_to_ptr.hbm [resolvable:$true] %s495_s28 }
  0x43   : > { %s468_s24 = sshll.u32 %s3966_s5, 4  ;;  %s3967_s29 = smov [#allocation11]   ;;  %s469_s24 = int_to_ptr.vmem [resolvable:$true] %s468_s24 }
  0x44   : > { %3586 = dma.hbm_to_vmem [thread:$0]  (!%p4109_p10), %s467_s12, 5120, %s469_s24, [#allocation9], %s5269_s21, %s5269_s21, %s5268_s15  }
  0x45   : > { %s497_s30 = sshll.u32 %s3967_s29, 4  ;;  %s532_s18 = scalar_lea.hbm %s5206_s1, %s4139_s14  ;;  %s498_s30 = int_to_ptr.vmem [resolvable:$true] %s497_s30 }
  0x46   : > { %3589 = dma.hbm_to_vmem [thread:$0]  (!%p4109_p10), %s496_s28, 256, %s498_s30, [#allocation12], %s5269_s21, %s5269_s21, %s5268_s15  }
  0x47   : > { %s533_s5 = sshll.u32 %s532_s18, 4  ;;  %s527_s8 = scalar_lea.vmem [#allocation2], %s4143_s0  ;;  %s534_s5 = int_to_ptr.hbm [resolvable:$true] %s533_s5 }
  0x48   : > { %s535_s11 = sshll.u32 %s527_s8, 4  ;;  %s5270_s2 = sand.u32 1, %s3957_s23   ;;  %s536_s11 = int_to_ptr.vmem [resolvable:$true] %s535_s11 }
  0x49   : > { %s524_s12 = scalar_lea.sflag [#allocation3], %s5270_s2  ;;  %s3791_s24 = sshra.s32 %s534_s5, 4  ;;  %s3792_s24 = int_to_ptr.hbm [resolvable:$true] %s3791_s24 }
  0x4a   : > { %s3793_s29 = scalar_lea.hbm %s3792_s24, 64  ;;  %s3798_s26 = scalar_lea.hbm %s5206_s1, 256 }
  0x4b   : > { %p3794_p1 = scmp.ne.s32.totalorder %s3792_s24, %s3793_s29  ;;  %p3799_p10 = scmp.lt.s32.totalorder %s3792_s24, %s5206_s1 }
  0x4c   : > { %p3800_p12 = scmp.lt.s32.totalorder %s3798_s26, %s3793_s29 }
  0x4d   : > { %p3796_p2 = pnand %p3794_p1, %p3705_p9 }
  0x4e   : > { %p3801_p13 = por %p3800_p12, %p3799_p10 }
  0x4f   : > { %p3797_p11 = pneg %p3796_p2 }
  0x51   : > { %p3802_p0 = pnand %p3801_p13, %p3797_p11 }
  0x53   : > { %3805 = shalt.err (!%p3802_p0)
}
  0x54   : > { %3593 = dma.hbm_to_vmem [thread:$0]  (!%p4145_p7), %s534_s5, 1024, %s536_s11, %s524_s12, %s5269_s21, %s5269_s21, %s5268_s15  }
  0x55   : > { %s576_s8 = scalar_lea.hbm %s5208_s3, %s4139_s14  ;;  %s571_s16 = scalar_lea.vmem [#allocation7], %s4143_s0 }
  0x56   : > { %s577_s20 = sshll.u32 %s576_s8, 4  ;;  %s579_s24 = sshll.u32 %s571_s16, 4  ;;  %s578_s20 = int_to_ptr.hbm [resolvable:$true] %s577_s20  ;;  %s580_s24 = int_to_ptr.vmem [resolvable:$true] %s579_s24 }
  0x57   : > { %s3821_s29 = sshra.s32 %s578_s20, 4  ;;  %s3828_s5 = scalar_lea.hbm %s5208_s3, 256  ;;  %s3822_s29 = int_to_ptr.hbm [resolvable:$true] %s3821_s29 }
  0x58   : > { %s3823_s26 = scalar_lea.hbm %s3822_s29, 64  ;;  %p3829_p11 = scmp.lt.s32.totalorder %s3822_s29, %s5208_s3 }
  0x59   : > { %p3824_p3 = scmp.ne.s32.totalorder %s3822_s29, %s3823_s26  ;;  %p3830_p10 = scmp.lt.s32.totalorder %s3828_s5, %s3823_s26 }
  0x5b   : > { %p3826_p1 = pnand %p3824_p3, %p3705_p9  ;;  %p3831_p12 = por %p3830_p10, %p3829_p11 }
  0x5d   : > { %p3827_p2 = pneg %p3826_p1 }
  0x5f   : > { %p3832_p13 = pnand %p3831_p12, %p3827_p2 }
  0x61   : > { %3835 = shalt.err (!%p3832_p13)
}
  0x62   : > { %3599 = dma.hbm_to_vmem [thread:$0]  (!%p4145_p7), %s578_s20, 1024, %s580_s24, %s4158_s10, %s5269_s21, %s5269_s21, %s5268_s15  }
  0x63   : > { %601 = sbr.rel (%p4101_p8) target bundleno = 964 (0x3c4), region = 80 }
  0x68   : > { %s4234_s14 = sand.u32 1, %s3953_s22  }
  0x69   : > { %s3022_s0 = sshll.u32 %s4234_s14, 6  ;;  %s604_s2 = scalar_lea.sflag [#allocation3], %s4234_s14 }
  0x6a   : > { %s4238_s18 = scalar_lea.vmem [#allocation2], %s3022_s0 }
  0x6b   : > { %3924 = dma.done.wait (%p4088_p4), %s604_s2, 1024  }
  0x6c   : > { %3926 = vsyncadd (%p4088_p4), %s604_s2, 4294966272  ;;  %s613_s10 = sand.u32 1, %s4079_s25   ;;  %s4245_s19 = scalar_lea.vmem [#allocation5], %s3022_s0 }
  0x6d   : > { %s614_s17 = scalar_lea.sflag [#allocation6], %s613_s10 }
  0x6e   : > { %3928 = dma.done.wait (%p4088_p4), %s614_s17, 2048  }
  0x6f   : > { %3930 = vsyncadd (%p4088_p4), %s614_s17, 4294965248  ;;  %s4251_s15 = scalar_lea.vmem [#allocation7], %s3022_s0  ;;  %p5271_p8 = scmp.eq.s32.totalorder %s4079_s25, 0 }
  0x71   : > { %3932 = dma.done.wait (%p5271_p8), [#allocation9], 8192   ;;  %p5272_p7 = pmov %p5271_p8 }
  0x73   : > { %3934 = vsyncadd (%p5272_p7), [#allocation9], 4294959104  ;;  %p5273_p9 = pmov %p5272_p7 }
  0x74   : > { %p5274_p0 = pmov %p5272_p7 }
  0x75   : > { %3936 = dma.done.wait (%p5273_p9), [#allocation12], 256  }
  0x76   : > { %3938 = vsyncadd (%p5274_p0), [#allocation12], 4294967040  ;;  %s3030_s21 = sshll.u32 %s4079_s25, 1  ;;  %v3968_v0 = vmov 0   ;;  %s5275_s16 = sld [smem:[#allocation30_spill]]  ;;  %v3407_v3 = vld [vmem:[#allocation8 + $0xb8] sm:$0xff] }
  0x77   : > { %3658 = vset.pattern.permute.xlu1 %v3968_v0  ;;  %3657 = vset.pattern.permute.xlu0 %v3968_v0  ;;  %p719_p4 = scmp.lt.s32.totalorder %s3030_s21, 7  ;;  %v3391_v7 = vld [vmem:[#allocation8 + $0x38] sm:$0xff]  ;;  %v3406_v12 = vld [vmem:[#allocation8 + $0xb0] sm:$0xff]  ;;  %v3405_v24 = vld [vmem:[#allocation8 + $0xa8] sm:$0xff]  ;;  %vm1674_vm1 = vcmask 1041409   ;;  %vm1676_vm2 = vcmask 1042434  }
  0x78   : > { %3659 = vset.pattern.permute.xlu2 %v3968_v0  ;;  %1988 = vmatpush.bf16.msra.mxu2 %v3407_v3  ;;  %v3399_v11 = vld [vmem:[#allocation8 + $0x78] sm:$0xff]  ;;  %v3390_v18 = vld [vmem:[#allocation8 + $0x30] sm:$0xff]  ;;  %v3471_v25 = vld [vmem:[%s4245_s19] sm:$0xff]   ;;  %vm1678_vm3 = vcmask 1043459   ;;  %vm1680_vm4 = vcmask 1044484   ;;  %vm1682_vm5 = vcmask 1045509  }
  0x79   : > { %s5362_s21 = smov (!%p719_p4, %s3030_s21), 7  ;;  %1960 = vmatpush.bf16.msra.mxu0 %v3391_v7  ;;  %1974 = vmatpush.bf16.msra.mxu1 %v3399_v11  ;;  %v3398_v19 = vld [vmem:[#allocation8 + $0x70] sm:$0xff]  ;;  %v3544_v30 = vld [vmem:[%s4245_s19 + $0x8] sm:$0xff]   ;;  %v3472_v35 = vunpack.c.l.bf16 %v3471_v25  ;;  %v3473_v37 = vunpack.c.h.bf16 %v3471_v25  ;;  %v4313_v41 = vld [vmem:[%s4245_s19 + $0x20] sm:$0xff]   ;;  %vm1684_vm6 = vcmask 1046534   ;;  %vm1686_vm7 = vcmask 1047559  }
  0x7a   : > { %s3031_s27 = sshll.u32 %s5362_s21, 3  ;;  %v3389_v34 = vld [vmem:[#allocation8 + $0x28] sm:$0xff]  ;;  %v3545_v36 = vld [vmem:[%s4245_s19 + $0x10] sm:$0xff]   ;;  %v3476_v38 = vunpack.c.l.bf16 %v3544_v30  ;;  %v3477_v39 = vunpack.c.h.bf16 %v3544_v30  ;;  %v3404_v45 = vld [vmem:[#allocation8 + $0xa0] sm:$0xff]  ;;  %v3488_v55 = vunpack.c.l.bf16 %v4313_v41  ;;  %s5345_s20 = sld [smem:[#allocation35_spill]] }
  0x7b   : > { %v3480_v40 = vunpack.c.l.bf16 %v3545_v36  ;;  %v3397_v44 = vld [vmem:[#allocation8 + $0x68] sm:$0xff]  ;;  %v3481_v46 = vunpack.c.h.bf16 %v3545_v36  ;;  %v3546_v47 = vld [vmem:[%s4245_s19 + $0x18] sm:$0xff]   ;;  %v3388_v53 = vld [vmem:[#allocation8 + $0x20] sm:$0xff]  ;;  %v1283_v56 = vrot.slane %v3472_v35, 4  ;;  %v1289_v57 = vrot.slane %v3473_v37, 4  ;;  %s732_s28 = scalar_lea.vmem %s5209_s4, %s3031_s27  ;;  %s5347_s12 = sld [smem:[#allocation34_spill]] }
  0x7c   : > { %s722_s24 = scalar_lea.vmem %s5275_s16, %s3031_s27  ;;  %1989 = vmatpush.bf16.msra.mxu2 %v3406_v12  ;;  %v3484_v51 = vunpack.c.l.bf16 %v3546_v47  ;;  %v3485_v54 = vunpack.c.h.bf16 %v3546_v47  ;;  %v1295_v58 = vrot.slane %v3476_v38, 4  ;;  %v1301_v59 = vrot.slane %v3477_v39, 4  ;;  %v3396_v61 = vld [vmem:[#allocation8 + $0x60] sm:$0xff]  ;;  %v3403_v62 = vld [vmem:[#allocation8 + $0x98] sm:$0xff]  ;;  %v3548_v30 = vld [vmem:[%s4245_s19 + $0x28] sm:$0xff]   ;;  %s3468_s17 = sshll.u32 %s4079_s25, 3 }
  0x7d   : > { %v4270_v1 = vld [vmem:[%s722_s24 + $0x8] sm:$0xff]  ;;  %v4272_v2 = vld [vmem:[%s722_s24] sm:$0xff]  ;;  %1961 = vmatpush.bf16.msra.mxu0 %v3390_v18  ;;  %1975 = vmatpush.bf16.msra.mxu1 %v3398_v19  ;;  %v1307_v60 = vrot.slane %v3480_v40, 4  ;;  %v1284_v63 = vadd.f32 %v3472_v35, %v1283_v56  ;;  %v1313_v0 = vrot.slane %v3481_v46, 4  ;;  %v1290_v7 = vadd.f32 %v3473_v37, %v1289_v57  ;;  %v3387_v11 = vld [vmem:[#allocation8 + $0x18] sm:$0xff]  ;;  %s5350_s8 = sld [smem:[#allocation39_spill]] }
  0x7e   : > { %v5238_v4 = vperm.slane %v4270_v1, 0  ;;  %v803_v5 = vperm.slane %v4272_v2, 0  ;;  %v790_v6 = vrot.slane %v4272_v2, 2  ;;  %v796_v8 = vrot.slane %v4270_v1, 1  ;;  %v3549_v35 = vld [vmem:[%s4245_s19 + $0x30] sm:$0xff]   ;;  %v4339_v36 = vld [vmem:[%s4245_s19 + $0x38] sm:$0xff]  }
  0x7f   : > { %v789_v9 = vrot.slane %v4272_v2, 1  ;;  %v797_v10 = vrot.slane %v4270_v1, 2  ;;  %v798_v14 = vrot.slane %v4270_v1, 3  ;;  %v791_v15 = vrot.slane %v4272_v2, 3  ;;  %v3394_v56 = vld [vmem:[#allocation8 + $0x50] sm:$0xff]  ;;  %v3401_v57 = vld [vmem:[#allocation8 + $0x88] sm:$0xff] }
  0x80   : > { %844 = vperm.xlu1 %3658, %v5238_v4   ;;  %820 = vperm.xlu0 %3657, %v803_v5   ;;  %v4284_v13 = vperm.slane %v790_v6, 0  ;;  %v792_v16 = vrot.slane %v4272_v2, 4  ;;  %v793_v17 = vrot.slane %v4272_v2, 5  ;;  %v4291_v20 = vperm.slane %v796_v8, 0  ;;  %s2772_s26 = scalar_lea.sflag [#allocation15], %s4234_s14 }
  0x81   : > { %v4293_v21 = vperm.slane %v789_v9, 0  ;;  %v4295_v22 = vperm.slane %v797_v10, 0  ;;  %v799_v23 = vrot.slane %v4270_v1, 4  ;;  %v4299_v26 = vperm.slane %v798_v14, 0  ;;  %1990 = vmatpush.bf16.msra.mxu2 %v3405_v24  ;;  %1962 = vmatpush.bf16.msra.mxu0 %v3389_v34 }
  0x82   : > { %826 = vperm.xlu2 %3659, %v4284_v13   ;;  %v4301_v27 = vperm.slane %v791_v15, 0  ;;  %v800_v28 = vrot.slane %v4270_v1, 5  ;;  %v801_v29 = vrot.slane %v4270_v1, 6  ;;  %v4306_v31 = vperm.slane %v792_v16, 0  ;;  %1976 = vmatpush.bf16.msra.mxu1 %v3397_v44 }
  0x83   : > { %v4308_v32 = vperm.slane %v793_v17, 0  ;;  %v794_v33 = vrot.slane %v4272_v2, 6  ;;  %v4315_v42 = vperm.slane %v799_v23, 0  ;;  %v795_v43 = vrot.slane %v4272_v2, 7  ;;  %s2800_s16 = scalar_lea.hbm %s5350_s8, %s3468_s17  ;;  %s3871_s25 = scalar_lea.hbm %s5350_s8, 32 }
  0x84   : > { %v4321_v48 = vperm.slane %v800_v28, 0  ;;  %v4323_v49 = vperm.slane %v801_v29, 0  ;;  %v802_v50 = vrot.slane %v4270_v1, 7  ;;  %v1319_v3 = vrot.slane %v3484_v51, 4  ;;  %v3395_v28 = vld [vmem:[#allocation8 + $0x58] sm:$0xff]  ;;  %v3402_v29 = vld [vmem:[#allocation8 + $0x90] sm:$0xff] }
  0x85   : > { %v4326_v52 = vperm.slane %v794_v33, 0  ;;  %1991 = vmatpush.bf16.msra.mxu2 %v3404_v45  ;;  %v1325_v6 = vrot.slane %v3485_v54, 4  ;;  %v1296_v8 = vadd.f32 %v3476_v38, %v1295_v58  ;;  %v1302_v9 = vadd.f32 %v3477_v39, %v1301_v59  ;;  %1963 = vmatpush.bf16.msra.mxu0 %v3388_v53  ;;  %s2803_s29 = sshll.u32 %s2800_s16, 4  ;;  %s2804_s29 = int_to_ptr.hbm [resolvable:$true] %s2803_s29 }
  0x86   : > { %v1308_v10 = vadd.f32 %v3480_v40, %v1307_v60  ;;  %1977 = vmatpush.bf16.msra.mxu1 %v3396_v61  ;;  %v1285_v12 = vrot.slane %v1284_v63, 2  ;;  %v1314_v14 = vadd.f32 %v3481_v46, %v1313_v0  ;;  %v1320_v15 = vadd.f32 %v3484_v51, %v1319_v3 }
  0x87   : > { %v1326_v16 = vadd.f32 %v3485_v54, %v1325_v6  ;;  %v1291_v17 = vrot.slane %v1290_v7, 2  ;;  %v1297_v18 = vrot.slane %v1296_v8, 2  ;;  %v1303_v19 = vrot.slane %v1302_v9, 2  ;;  %v3385_v6 = vld [vmem:[#allocation8 + $0x8] sm:$0xff] }
  0x88   : > { %847 = vperm.xlu1 %3658, %v4291_v20   ;;  %823 = vperm.xlu0 %3657, %v4293_v21   ;;  %v1309_v23 = vrot.slane %v1308_v10, 2  ;;  %v4330_v24 = vperm.slane %v795_v43, 0  ;;  %v4332_v25 = vperm.slane %v802_v50, 0  ;;  %v1286_v33 = vadd.f32 %v1285_v12, %v1284_v63  ;;  %v3386_v43 = vld [vmem:[#allocation8 + $0x10] sm:$0xff] }
  0x89   : > { %1992 = vmatpush.bf16.msra.mxu2 %v3403_v62  ;;  %v1315_v34 = vrot.slane %v1314_v14, 2  ;;  %v4341_v37 = vadd.f32 %v1291_v17, %v1290_v7  ;;  %v4343_v38 = vadd.f32 %v1297_v18, %v1296_v8  ;;  %v4345_v39 = vadd.f32 %v1303_v19, %v1302_v9  ;;  %1964 = vmatpush.bf16.msra.mxu0 %v3387_v11  ;;  %v3393_v7 = vld [vmem:[#allocation8 + $0x48] sm:$0xff] }
  0x8a   : > { %850 = vperm.xlu2 %3659, %v4295_v22   ;;  %5276 = vst [vmem:[#allocation28_spill] sm:$0xff] %v4332_v25  ;;  %v1321_v40 = vrot.slane %v1320_v15, 2  ;;  %1978 = vmatpush.bf16.msra.mxu1 %v3395_v28  ;;  %v3489_v44 = vunpack.c.h.bf16 %v4313_v41  ;;  %v1287_v45 = vrot.slane %v1286_v33, 1  ;;  %v4348_v46 = vadd.f32 %v1309_v23, %v1308_v10  ;;  %v3384_v41 = vld [vmem:[#allocation8] sm:$0xff] }
  0x8b   : > { %v1327_v47 = vrot.slane %v1326_v16, 2  ;;  %v3492_v50 = vunpack.c.l.bf16 %v3548_v30  ;;  %v3493_v51 = vunpack.c.h.bf16 %v3548_v30  ;;  %v4351_v53 = vadd.f32 %v1315_v34, %v1314_v14 }
  0x8c   : > { %v1331_v54 = vrot.slane %v3488_v55, 4  ;;  %v3496_v58 = vunpack.c.l.bf16 %v3549_v35  ;;  %v3497_v59 = vunpack.c.h.bf16 %v3549_v35  ;;  %v3500_v60 = vunpack.c.l.bf16 %v4339_v36 }
  0x8d   : > { %1993 = vmatpush.bf16.msra.mxu2 %v3402_v29  ;;  %v3501_v61 = vunpack.c.h.bf16 %v4339_v36  ;;  %v1293_v62 = vrot.slane %v4341_v37, 1  ;;  %v1299_v63 = vrot.slane %v4343_v38, 1  ;;  %v1305_v0 = vrot.slane %v4345_v39, 1  ;;  %1965 = vmatpush.bf16.msra.mxu0 %v3386_v43 }
  0x8e   : > { %v4360_v3 = vadd.f32 %v1321_v40, %v1320_v15  ;;  %1979 = vmatpush.bf16.msra.mxu1 %v3394_v56  ;;  %v4362_v8 = vadd.f32 %v1287_v45, %v1286_v33  ;;  %v1311_v9 = vrot.slane %v4348_v46, 1  ;;  %v4365_v10 = vadd.f32 %v1327_v47, %v1326_v16  ;;  %v3400_v15 = vld [vmem:[#allocation8 + $0x80] sm:$0xff] }
  0x8f   : > { %v1337_v11 = vrot.slane %v3489_v44, 4  ;;  %v1317_v12 = vrot.slane %v4351_v53, 1  ;;  %v1332_v14 = vadd.f32 %v3488_v55, %v1331_v54  ;;  %v1343_v17 = vrot.slane %v3492_v50, 4 }
  0x90   : > { %853 = vperm.xlu1 %3658, %v4299_v26   ;;  %829 = vperm.xlu0 %3657, %v4301_v27   ;;  %v1349_v18 = vrot.slane %v3493_v51, 4  ;;  %v1355_v23 = vrot.slane %v3496_v58, 4  ;;  %v1361_v28 = vrot.slane %v3497_v59, 4  ;;  %v1367_v29 = vrot.slane %v3500_v60, 4 }
  0x91   : > { %1994 = vmatpush.bf16.msra.mxu2 %v3401_v57  ;;  %v1338_v19 = vadd.f32 %v3489_v44, %v1337_v11  ;;  %v1333_v16 = vrot.slane %v1332_v14, 2  ;;  %v1344_v30 = vadd.f32 %v3492_v50, %v1343_v17  ;;  %v1373_v34 = vrot.slane %v3501_v61, 4  ;;  %1966 = vmatpush.bf16.msra.mxu0 %v3385_v6  ;;  %v3392_v17 = vld [vmem:[#allocation8 + $0x40] sm:$0xff] }
  0x92   : > { %832 = vperm.xlu2 %3659, %v4306_v31   ;;  %v1350_v33 = vadd.f32 %v3493_v51, %v1349_v18  ;;  %1980 = vmatpush.bf16.msra.mxu1 %v3393_v7  ;;  %v1356_v35 = vadd.f32 %v3496_v58, %v1355_v23  ;;  %v1362_v36 = vadd.f32 %v3497_v59, %v1361_v28  ;;  %v1323_v51 = vrot.slane %v4360_v3, 1 }
  0x93   : > { %v1339_v55 = vrot.slane %v1338_v19, 2  ;;  %v1368_v40 = vadd.f32 %v3500_v60, %v1367_v29  ;;  %v1334_v43 = vadd.f32 %v1333_v16, %v1332_v14  ;;  %v1345_v44 = vrot.slane %v1344_v30, 2 }
  0x94   : > { %v1351_v45 = vrot.slane %v1350_v33, 2  ;;  %v1374_v47 = vadd.f32 %v3501_v61, %v1373_v34  ;;  %v1357_v56 = vrot.slane %v1356_v35, 2  ;;  %v1363_v57 = vrot.slane %v1362_v36, 2 }
  0x95   : > { %1995 = vmatpush.bf16.msra.mxu2 %v3400_v15  ;;  %v1340_v54 = vadd.f32 %v1339_v55, %v1338_v19  ;;  %v1369_v50 = vrot.slane %v1368_v40, 2  ;;  %v1346_v6 = vadd.f32 %v1345_v44, %v1344_v30  ;;  %1967 = vmatpush.bf16.msra.mxu0 %v3384_v41  ;;  %v4375_v58 = vadd.f32 %v1293_v62, %v4341_v37  ;;  %v4422_v44 = vld [vmem:[%s4251_s15 + $0x20] sm:$0xff]  }
  0x96   : > { %v1352_v7 = vadd.f32 %v1351_v45, %v1350_v33  ;;  %v1375_v11 = vrot.slane %v1374_v47, 2  ;;  %v1358_v59 = vadd.f32 %v1357_v56, %v1356_v35  ;;  %v1364_v60 = vadd.f32 %v1363_v57, %v1362_v36  ;;  %1981 = vmatpush.bf16.msra.mxu1 %v3392_v17  ;;  %v3503_v35 = vld [vmem:[%s4251_s15] sm:$0xff]   ;;  %v4432_v56 = vld [vmem:[%s4251_s15 + $0x30] sm:$0xff]  }
  0x97   : > { %v1370_v14 = vadd.f32 %v1369_v50, %v1368_v40  ;;  %v1329_v61 = vrot.slane %v4365_v10, 1  ;;  %v1335_v18 = vrot.slane %v1334_v43, 1  ;;  %v1341_v15 = vrot.slane %v1340_v54, 1 }
  0x98   : > { %835 = vperm.xlu1 %3658, %v4308_v32   ;;  %856 = vperm.xlu0 %3657, %v4315_v42   ;;  %v1376_v19 = vadd.f32 %v1375_v11, %v1374_v47  ;;  %v1347_v23 = vrot.slane %v1346_v6, 1  ;;  %v1353_v28 = vrot.slane %v1352_v7, 1  ;;  %v1359_v29 = vrot.slane %v1358_v59, 1 }
  0x99   : > { %v1365_v16 = vrot.slane %v1364_v60, 1  ;;  %v4383_v37 = vadd.f32 %v1299_v63, %v4343_v38  ;;  %v1371_v62 = vrot.slane %v1370_v14, 1  ;;  %v4388_v33 = vadd.f32 %v1305_v0, %v4345_v39  ;;  %v3552_v0 = vld [vmem:[%s4251_s15 + $0x10] sm:$0xff]  }
  0x9a   : > { %859 = vperm.xlu2 %3659, %v4321_v48   ;;  %v1377_v30 = vrot.slane %v1376_v19, 1  ;;  %v4391_v34 = vadd.f32 %v1311_v9, %v4348_v46  ;;  %v4394_v41 = vadd.f32 %v1317_v12, %v4351_v53  ;;  %v3969_v55 = vmov 8.0   ;;  %v3551_v53 = vld [vmem:[%s4251_s15 + $0x8] sm:$0xff]  }
  0x9b   : > { %3668 = vrcp.f32 %v3969_v55  ;;  %v4399_v38 = vadd.f32 %v1323_v51, %v4360_v3  ;;  %v4402_v39 = vadd.f32 %v1329_v61, %v4365_v10  ;;  %v4404_v46 = vadd.f32 %v1335_v18, %v1334_v43  ;;  %v4419_v3 = vld [vmem:[%s4251_s15 + $0x18] sm:$0xff]  }
  0x9c   : > { %v4406_v63 = vadd.f32 %v1341_v15, %v1340_v54  ;;  %v4410_v9 = vadd.f32 %v1347_v23, %v1346_v6  ;;  %v4412_v12 = vadd.f32 %v1353_v28, %v1352_v7  ;;  %v4414_v36 = vadd.f32 %v1359_v29, %v1358_v59  ;;  %v4429_v54 = vld [vmem:[%s4251_s15 + $0x28] sm:$0xff]  }
  0x9d   : > { %v4416_v40 = vadd.f32 %v1365_v16, %v1364_v60  ;;  %v4424_v10 = vadd.f32 %v1371_v62, %v1370_v14  ;;  %v4426_v43 = vadd.f32 %v1377_v30, %v1376_v19  ;;  %v3504_v45 = vunpack.c.l.bf16 %v3503_v35 }
  0x9e   : > { %v3505_v47 = vunpack.c.h.bf16 %v3503_v35  ;;  %v3508_v57 = vunpack.c.l.bf16 %v3551_v53  ;;  %v3509_v50 = vunpack.c.h.bf16 %v3551_v53  ;;  %v3512_v51 = vunpack.c.l.bf16 %v3552_v0 }
  0x9f   : > { %v3513_v6 = vunpack.c.h.bf16 %v3552_v0  ;;  %v3516_v7 = vunpack.c.l.bf16 %v4419_v3  ;;  %v3970_v19 = vmov 1   ;;  %v1418_v28 = vrot.slane %v3504_v45, 4 }
  0xa0   : > { %862 = vperm.xlu1 %3658, %v4323_v49   ;;  %838 = vperm.xlu0 %3657, %v4326_v52   ;;  %v1424_v29 = vrot.slane %v3505_v47, 4  ;;  %v1430_v16 = vrot.slane %v3508_v57, 4  ;;  %v1436_v62 = vrot.slane %v3509_v50, 4  ;;  %v1442_v30 = vrot.slane %v3512_v51, 4 }
  0xa1   : > { %v3669_v14 = vpop.eup %3668  ;;  %v1448_v55 = vrot.slane %v3513_v6, 4  ;;  %v1419_v53 = vadd.f32 %v3504_v45, %v1418_v28  ;;  %v1454_v15 = vrot.slane %v3516_v7, 4 }
  0xa2   : > { %841 = vperm.xlu2 %3659, %v4330_v24   ;;  %v1380_v23 = vmul.f32 8.0, %v3669_v14  ;;  %vm1384_vm0 = vweird.f32 %v3669_v14  ;;  %v1425_v0 = vadd.f32 %v3505_v47, %v1424_v29  ;;  %v1431_v18 = vadd.f32 %v3508_v57, %v1430_v16 }
  0xa3   : > { %v1437_v61 = vadd.f32 %v3509_v50, %v1436_v62  ;;  %v1443_v17 = vadd.f32 %v3512_v51, %v1442_v30  ;;  %v1449_v60 = vadd.f32 %v3513_v6, %v1448_v55  ;;  %v1420_v59 = vrot.slane %v1419_v53, 2 }
  0xa4   : > { %v1381_v35 = vsub.f32 1.0, %v1380_v23  ;;  %v1426_v11 = vrot.slane %v1425_v0, 2  ;;  %v1455_v4 = vadd.f32 %v3516_v7, %v1454_v15  ;;  %v1432_v23 = vrot.slane %v1431_v18, 2 }
  0xa5   : > { %v1444_v45 = vrot.slane %v1443_v17, 2  ;;  %v1450_v47 = vrot.slane %v1449_v60, 2 }
  0xa6   : > { %v1382_v2 = vmul.f32 %v3669_v14, %v1381_v35  ;;  %v1427_v29 = vadd.f32 %v1426_v11, %v1425_v0  ;;  %v1456_v57 = vrot.slane %v1455_v4, 2  ;;  %v1433_v6 = vadd.f32 %v1432_v23, %v1431_v18 }
  0xa7   : > { %v1445_v62 = vadd.f32 %v1444_v45, %v1443_v17  ;;  %v4454_v30 = vadd.f32 %v1450_v47, %v1449_v60  ;;  %v5277_v11 = vperm.slane %v4270_v1, 0  ;;  %v5278_v47 = vunpack.c.h.bf16 %v4419_v3 }
  0xa8   : > { %3660 = vset.pattern.permute.xlu1 %v3970_v19  ;;  %865 = vperm.xlu0 %3657, %v4332_v25   ;;  %v1438_v25 = vrot.slane %v1437_v61, 2  ;;  %v1383_v28 = vadd.f32 %v3669_v14, %v1382_v2  ;;  %v4463_v18 = vadd.f32 %v1456_v57, %v1455_v4  ;;  %v1434_v1 = vrot.slane %v1433_v6, 1 }
  0xa9   : > { %1044 = vperm.xlu1 %3660, %v803_v5   ;;  %v4447_v5 = vld [vmem:[%s4251_s15 + $0x38] sm:$0xff]   ;;  %v1446_v35 = vrot.slane %v1445_v62, 1  ;;  %v1452_v45 = vrot.slane %v4454_v30, 1  ;;  %v5285_v3 = vunpack.c.h.bf16 %v4432_v56  ;;  %s3028_s15 = sshll.u32 %s4234_s14, 3 }
  0xaa   : > { %3661 = vset.pattern.permute.xlu2 %v3970_v19  ;;  %v3532_v50 = vunpack.c.l.bf16 %v4447_v5  ;;  %v3533_v51 = vunpack.c.h.bf16 %v4447_v5  ;;  %v1439_v16 = vadd.f32 %v1438_v25, %v1437_v61  ;;  %v4452_v7 = vsel %vm1384_vm0, %v3669_v14, %v1383_v28  ;;  %s5126_s21 = scalar_lea.vmem [#allocation14], %s3028_s15 }
  0xab   : > { %1047 = vperm.xlu2 %3661, %v4293_v21   ;;  %v1421_v21 = vadd.f32 %v1420_v59, %v1419_v53  ;;  %v1386_v59 = vmul.f32 %v4452_v7, %v4362_v8  ;;  %v1387_v25 = vmul.f32 %v4452_v7, %v4375_v58  ;;  %v1428_v61 = vrot.slane %v1427_v29, 1  ;;  %s2801_s24 = sshll.u32 %s5126_s21, 4  ;;  %s2802_s24 = int_to_ptr.vmem [resolvable:$true] %s2801_s24 }
  0xac   : > { %v1388_v14 = vmul.f32 %v4452_v7, %v4383_v37  ;;  %v1389_v60 = vmul.f32 %v4452_v7, %v4388_v33  ;;  %v1391_v8 = vmul.f32 %v4452_v7, %v4394_v41  ;;  %v1394_v58 = vmul.f32 %v4452_v7, %v4404_v46 }
  0xad   : > { %v1422_v15 = vrot.slane %v1421_v21, 1  ;;  %v1395_v4 = vmul.f32 %v4452_v7, %v4406_v63  ;;  %v1396_v37 = vmul.f32 %v4452_v7, %v4410_v9  ;;  %v1392_v33 = vmul.f32 %v4452_v7, %v4399_v38 }
  0xae   : > { %v1398_v41 = vmul.f32 %v4452_v7, %v4414_v36  ;;  %v1399_v46 = vmul.f32 %v4452_v7, %v4416_v40  ;;  %v1400_v63 = vmul.f32 %v4452_v7, %v4424_v10  ;;  %v1745_v9 = vsel %vm1674_vm1, %v1387_v25, %v1386_v59 }
  0xaf   : > { %v1752_v17 = vsel %vm1674_vm1, %v1395_v4, %v1394_v58  ;;  %v1401_v38 = vmul.f32 %v4452_v7, %v4426_v43  ;;  %v1440_v55 = vrot.slane %v1439_v16, 1  ;;  %v4504_v0 = vadd.f32 %v1428_v61, %v1427_v29 }
  0xb0   : > { %3662 = vset.pattern.permute.xlu0 %v3970_v19  ;;  %v4498_v19 = vadd.f32 %v1422_v15, %v1421_v21  ;;  %v4506_v2 = vadd.f32 %v1434_v1, %v1433_v6  ;;  %v1460_v28 = vrot.slane %v5278_v47, 4  ;;  %v1458_v6 = vrot.slane %v4463_v18, 1 }
  0xb1   : > { %1071 = vperm.xlu1 %3660, %v4291_v20   ;;  %1068 = vperm.xlu0 %3662, %v5277_v11   ;;  %v1390_v20 = vmul.f32 %v4452_v7, %v4391_v34  ;;  %v1393_v34 = vmul.f32 %v4452_v7, %v4402_v39  ;;  %v1746_v39 = vsel %vm1676_vm2, %v1388_v14, %v1745_v9  ;;  %v5280_v61 = vunpack.c.l.bf16 %v4422_v44 }
  0xb2   : > { %v1747_v36 = vsel %vm1678_vm3, %v1389_v60, %v1746_v39  ;;  %v4517_v57 = vadd.f32 %v1440_v55, %v1439_v16  ;;  %v4523_v15 = vadd.f32 %v1446_v35, %v1445_v62  ;;  %v5279_v11 = vmov %v5278_v47 }
  0xb3   : > { %1050 = vperm.xlu2 %3661, %v4284_v13   ;;  %v1397_v13 = vmul.f32 %v4452_v7, %v4412_v12  ;;  %v1753_v12 = vsel %vm1676_vm2, %v1396_v37, %v1752_v17  ;;  %v1748_v10 = vsel %vm1680_vm4, %v1390_v20, %v1747_v36  ;;  %v1461_v59 = vadd.f32 %v5279_v11, %v1460_v28 }
  0xb4   : > { %v1749_v43 = vsel %vm1682_vm5, %v1391_v8, %v1748_v10  ;;  %v1466_v14 = vrot.slane %v5280_v61, 4  ;;  %v5281_v16 = vunpack.c.h.bf16 %v4422_v44  ;;  %v5282_v20 = vunpack.c.l.bf16 %v4429_v54 }
  0xb5   : > { %v1754_v40 = vsel %vm1678_vm3, %v1397_v13, %v1753_v12  ;;  %v1750_v21 = vsel %vm1684_vm6, %v1392_v33, %v1749_v43  ;;  %v5283_v8 = vunpack.c.h.bf16 %v4429_v54  ;;  %v5284_v62 = vunpack.c.l.bf16 %v4432_v56 }
  0xb6   : > { %v1755_v53 = vsel %vm1680_vm4, %v1398_v41, %v1754_v40  ;;  %v1472_v60 = vrot.slane %v5281_v16, 4  ;;  %v1478_v1 = vrot.slane %v5282_v20, 4  ;;  %v1496_v37 = vrot.slane %v5285_v3, 4 }
  0xb7   : > { %v1756_v23 = vsel %vm1682_vm5, %v1399_v46, %v1755_v53  ;;  %v1484_v58 = vrot.slane %v5283_v8, 4  ;;  %v1490_v4 = vrot.slane %v5284_v62, 4  ;;  %v5286_v33 = vmov %v5280_v61 }
  0xb8   : > { %v1757_v29 = vsel %vm1684_vm6, %v1400_v63, %v1756_v23  ;;  %v5287_v13 = vmov %v5281_v16  ;;  %v5288_v46 = vmov %v5282_v20  ;;  %v1502_v9 = vrot.slane %v3532_v50, 4 }
  0xb9   : > { %1074 = vperm.xlu1 %3660, %v4295_v22   ;;  %1077 = vperm.xlu0 %3662, %v4299_v26   ;;  %v1751_v22 = vsel %vm1686_vm7, %v1393_v34, %v1750_v21  ;;  %v1758_v26 = vsel %vm1686_vm7, %v1401_v38, %v1757_v29  ;;  %v1467_v34 = vadd.f32 %v5286_v33, %v1466_v14 }
  0xba   : > { %v1763_v25 = vpack.c.bf16 %v1758_v26, %v1751_v22  ;;  %v1473_v41 = vadd.f32 %v5287_v13, %v1472_v60  ;;  %v1479_v63 = vadd.f32 %v5288_v46, %v1478_v1  ;;  %v5289_v38 = vmov %v5283_v8 }
  0xbb   : > { %1053 = vperm.xlu2 %3661, %v4301_v27   ;;  %v1462_v27 = vrot.slane %v1461_v59, 2  ;;  %v1485_v39 = vadd.f32 %v5289_v38, %v1484_v58  ;;  %v5290_v12 = vmov %v5284_v62  ;;  %v5291_v40 = vmov %v5285_v3 }
  0xbc   : > { %1996 = vmatmul.bf16.vlgmr.msra.gmra.mxu2 %v1763_v25  ;;  %v1491_v36 = vadd.f32 %v5290_v12, %v1490_v4  ;;  %v1497_v55 = vadd.f32 %v5291_v40, %v1496_v37  ;;  %v1468_v35 = vrot.slane %v1467_v34, 2  ;;  %v1474_v10 = vrot.slane %v1473_v41, 2  ;;  %v4597_v12 = vld [vmem:[%s4238_s18 + $0x8] sm:$0xf] }
  0xbd   : > { %v1463_v17 = vadd.f32 %v1462_v27, %v1461_v59  ;;  %v1480_v44 = vrot.slane %v1479_v63, 2  ;;  %v1503_v53 = vadd.f32 %v3532_v50, %v1502_v9  ;;  %v1453_v43 = vadd.f32 %v1452_v45, %v4454_v30  ;;  %v4591_v9 = vld [vmem:[%s4238_s18 + $0x4] sm:$0xf] }
  0xbe   : > { %v1486_v23 = vrot.slane %v1485_v39, 2  ;;  %v1492_v47 = vrot.slane %v1491_v36, 2  ;;  %v1498_v28 = vrot.slane %v1497_v55, 2  ;;  %v1469_v54 = vadd.f32 %v1468_v35, %v1467_v34 }
  0xbf   : > { %v1475_v21 = vadd.f32 %v1474_v10, %v1473_v41  ;;  %v1481_v29 = vadd.f32 %v1480_v44, %v1479_v63  ;;  %v1504_v56 = vrot.slane %v1503_v53, 2  ;;  %v1464_v22 = vrot.slane %v1463_v17, 1  ;;  %v4583_v41 = vld [vmem:[%s4238_s18] sm:$0xf]  ;;  %v4606_v10 = vld [vmem:[%s4238_s18 + $0x10] sm:$0xf] }
  0xc0   : > { %v1487_v26 = vadd.f32 %v1486_v23, %v1485_v39  ;;  %v1493_v11 = vadd.f32 %v1492_v47, %v1491_v36  ;;  %v1499_v59 = vadd.f32 %v1498_v28, %v1497_v55  ;;  %v1470_v50 = vrot.slane %v1469_v54, 1  ;;  %v4600_v36 = vld [vmem:[%s4238_s18 + $0xc] sm:$0xf]  ;;  %v4612_v47 = vld [vmem:[%s4238_s18 + $0x14] sm:$0xf] }
  0xc1   : > { %1056 = vperm.xlu1 %3660, %v4306_v31   ;;  %1059 = vperm.xlu0 %3662, %v4308_v32   ;;  %v1476_v25 = vrot.slane %v1475_v21, 1  ;;  %v1482_v30 = vrot.slane %v1481_v29, 1  ;;  %v1505_v45 = vadd.f32 %v1504_v56, %v1503_v53  ;;  %v1508_v31 = vrot.slane %v3533_v51, 4  ;;  %v4615_v28 = vld [vmem:[%s4238_s18 + $0x18] sm:$0xf] }
  0xc2   : > { %v1488_v61 = vrot.slane %v1487_v26, 1  ;;  %v1494_v14 = vrot.slane %v1493_v11, 1  ;;  %v1500_v16 = vrot.slane %v1499_v59, 1  ;;  %v1459_v32 = vadd.f32 %v1458_v6, %v4463_v18  ;;  %5292 = vst [vmem:[#allocation29_spill] sm:$0xff] %v4615_v28 }
  0xc3   : > { %1080 = vperm.xlu2 %3661, %v4315_v42   ;;  %v1471_v60 = vadd.f32 %v1470_v50, %v1469_v54  ;;  %v1477_v20 = vadd.f32 %v1476_v25, %v1475_v21  ;;  %v1506_v1 = vrot.slane %v1505_v45, 1  ;;  %v1483_v27 = vadd.f32 %v1482_v30, %v1481_v29  ;;  %v4618_v54 = vld [vmem:[%s4238_s18 + $0x1c] sm:$0xf]  ;;  %v4632_v30 = vld [vmem:[%s4238_s18 + $0x24] sm:$0xf] }
  0xc4   : > { %v1489_v8 = vadd.f32 %v1488_v61, %v1487_v26  ;;  %v1495_v58 = vadd.f32 %v1494_v14, %v1493_v11  ;;  %v1509_v42 = vadd.f32 %v3533_v51, %v1508_v31  ;;  %v1465_v62 = vadd.f32 %v1464_v22, %v1463_v17  ;;  %v4624_v22 = vld [vmem:[%s4238_s18 + $0x20] sm:$0xf]  ;;  %v4638_v61 = vld [vmem:[%s4238_s18 + $0x2c] sm:$0xf] }
  0xc5   : > { %v1501_v4 = vadd.f32 %v1500_v16, %v1499_v59  ;;  %v1514_v3 = vmul.f32 %v4498_v19, %v4452_v7  ;;  %v1515_v37 = vmul.f32 %v4504_v0, %v4452_v7  ;;  %v1507_v33 = vadd.f32 %v1506_v1, %v1505_v45  ;;  %v4635_v45 = vld [vmem:[%s4238_s18 + $0x28] sm:$0xf] }
  0xc6   : > { %v1510_v18 = vrot.slane %v1509_v42, 2  ;;  %v1516_v6 = vmul.f32 %v4506_v2, %v4452_v7  ;;  %v1517_v34 = vmul.f32 %v4517_v57, %v4452_v7  ;;  %v1518_v5 = vmul.f32 %v4523_v15, %v4452_v7 }
  0xc7   : > { %v1519_v51 = vmul.f32 %v1453_v43, %v4452_v7  ;;  %v1522_v19 = vmul.f32 %v1471_v60, %v4452_v7  ;;  %v1523_v0 = vmul.f32 %v1477_v20, %v4452_v7  ;;  %v1524_v2 = vmul.f32 %v1483_v27, %v4452_v7  ;;  %v5293_v27 = vld [vmem:[#allocation28_spill] sm:$0xff] }
  0xc8   : > { %v1511_v13 = vadd.f32 %v1510_v18, %v1509_v42  ;;  %v1525_v57 = vmul.f32 %v1489_v8, %v4452_v7  ;;  %v1527_v15 = vmul.f32 %v1501_v4, %v4452_v7  ;;  %v1675_v46 = vsel %vm1674_vm1, %v1515_v37, %v1514_v3 }
  0xc9   : > { %1083 = vperm.xlu1 %3660, %v4321_v48   ;;  %1086 = vperm.xlu0 %3662, %v4323_v49   ;;  %v1526_v48 = vmul.f32 %v1495_v58, %v4452_v7  ;;  %v1520_v49 = vmul.f32 %v1459_v32, %v4452_v7  ;;  %v1688_v63 = vsel %vm1674_vm1, %v1523_v0, %v1522_v19  ;;  %v1530_v44 = vunpack.c.l.bf16 %v4583_v41 }
  0xca   : > { %v1512_v17 = vrot.slane %v1511_v13, 1  ;;  %v1528_v38 = vmul.f32 %v1507_v33, %v4452_v7  ;;  %v1677_v39 = vsel %vm1676_vm2, %v1516_v6, %v1675_v46  ;;  %v1521_v40 = vmul.f32 %v1465_v62, %v4452_v7 }
  0xcb   : > { %1062 = vperm.xlu2 %3661, %v4326_v52   ;;  %v1689_v52 = vsel %vm1676_vm2, %v1524_v2, %v1688_v63  ;;  %v1679_v55 = vsel %vm1678_vm3, %v1517_v34, %v1677_v39  ;;  %v1531_v21 = vunpack.c.l.bf16 %v4591_v9  ;;  %v1532_v26 = vunpack.c.l.bf16 %v4597_v12 }
  0xcc   : > { %v1690_v35 = vsel %vm1678_vm3, %v1525_v57, %v1689_v52  ;;  %v1513_v53 = vadd.f32 %v1512_v17, %v1511_v13  ;;  %v1681_v43 = vsel %vm1680_vm4, %v1518_v5, %v1679_v55  ;;  %v1533_v11 = vunpack.c.l.bf16 %v4600_v36  ;;  %v4653_v17 = vld [vmem:[%s4238_s18 + $0x30] sm:$0xf]  ;;  %v4656_v55 = vld [vmem:[%s4238_s18 + $0x34] sm:$0xf] }
  0xcd   : > { %v1691_v23 = vsel %vm1680_vm4, %v1526_v48, %v1690_v35  ;;  %v1683_v29 = vsel %vm1682_vm5, %v1519_v51, %v1681_v43  ;;  %v1534_v14 = vunpack.c.l.bf16 %v4606_v10  ;;  %v1535_v31 = vunpack.c.l.bf16 %v4612_v47  ;;  %v4659_v35 = vld [vmem:[%s4238_s18 + $0x38] sm:$0xf] }
  0xce   : > { %v1692_v56 = vsel %vm1682_vm5, %v1527_v15, %v1691_v23  ;;  %v1529_v59 = vmul.f32 %v1513_v53, %v4452_v7  ;;  %v1685_v50 = vsel %vm1684_vm6, %v1520_v49, %v1683_v29  ;;  %v1536_v32 = vunpack.c.l.bf16 %v4615_v28 }
  0xcf   : > { %v1693_v25 = vsel %vm1684_vm6, %v1528_v38, %v1692_v56  ;;  %v1687_v16 = vsel %vm1686_vm7, %v1521_v40, %v1685_v50  ;;  %v1537_v60 = vunpack.c.l.bf16 %v4618_v54  ;;  %v1538_v1 = vunpack.c.l.bf16 %v4624_v22 }
  0xd0   : > { %v1694_v20 = vsel %vm1686_vm7, %v1529_v59, %v1693_v25  ;;  %v1539_v58 = vunpack.c.l.bf16 %v4632_v30  ;;  %v1540_v42 = vunpack.c.l.bf16 %v4635_v45  ;;  %v1546_v62 = vrot.slane %v1530_v44, 4 }
  0xd1   : > { %1065 = vperm.xlu1 %3660, %v4330_v24   ;;  %v1761_v8 = vpack.c.bf16 %v1694_v20, %v1687_v16  ;;  %v1541_v24 = vunpack.c.l.bf16 %v4638_v61  ;;  %v1552_v4 = vrot.slane %v1531_v21, 4  ;;  %v1558_v3 = vrot.slane %v1532_v26, 4 }
  0xd2   : > { %v1564_v37 = vrot.slane %v1533_v11, 4  ;;  %v1570_v33 = vrot.slane %v1534_v14, 4  ;;  %v1576_v18 = vrot.slane %v1535_v31, 4  ;;  %v1582_v6 = vrot.slane %v1536_v32, 4 }
  0xd3   : > { %1089 = vperm.xlu2 %3661, %v5293_v27   ;;  %1968 = vmatmul.bf16.vlgmr.msra.gmra.mxu0 %v1761_v8  ;;  %v1588_v34 = vrot.slane %v1537_v60, 4  ;;  %v1547_v5 = vadd.f32 %v1546_v62, %v1530_v44  ;;  %v1553_v51 = vadd.f32 %v1552_v4, %v1531_v21  ;;  %v1559_v19 = vadd.f32 %v1558_v3, %v1532_v26  ;;  %v4662_v44 = vld [vmem:[%s4238_s18 + $0x3c] sm:$0xf] }
  0xd4   : > { %v1565_v0 = vadd.f32 %v1564_v37, %v1533_v11  ;;  %v1571_v13 = vadd.f32 %v1570_v33, %v1534_v14  ;;  %v1577_v2 = vadd.f32 %v1576_v18, %v1535_v31  ;;  %v1583_v57 = vadd.f32 %v1582_v6, %v1536_v32  ;;  %5294 = vst [vmem:[#allocation28_spill] sm:$0xff] %v4662_v44 }
  0xd5   : > { %v1589_v48 = vadd.f32 %v1588_v34, %v1537_v60  ;;  %v1548_v49 = vrot.slane %v1547_v5, 2  ;;  %v1554_v15 = vrot.slane %v1553_v51, 2  ;;  %v1560_v46 = vrot.slane %v1559_v19, 2 }
  0xd6   : > { %v1566_v63 = vrot.slane %v1565_v0, 2  ;;  %v1572_v38 = vrot.slane %v1571_v13, 2  ;;  %v1578_v39 = vrot.slane %v1577_v2, 2  ;;  %v1584_v52 = vrot.slane %v1583_v57, 2 }
  0xd7   : > { %v1590_v40 = vrot.slane %v1589_v48, 2  ;;  %v1549_v53 = vadd.f32 %v1548_v49, %v1547_v5  ;;  %v1555_v43 = vadd.f32 %v1554_v15, %v1553_v51  ;;  %v1561_v23 = vadd.f32 %v1560_v46, %v1559_v19 }
  0xd8   : > { %v1567_v21 = vadd.f32 %v1566_v63, %v1565_v0  ;;  %v4664_v29 = vadd.f32 %v1572_v38, %v1571_v13  ;;  %v4666_v56 = vadd.f32 %v1578_v39, %v1577_v2  ;;  %v4668_v26 = vadd.f32 %v1584_v52, %v1583_v57 }
  0xd9   : > { %v4670_v11 = vadd.f32 %v1590_v40, %v1589_v48  ;;  %v1550_v59 = vrot.slane %v1549_v53, 1  ;;  %v1556_v50 = vrot.slane %v1555_v43, 1  ;;  %v1562_v25 = vrot.slane %v1561_v23, 1 }
  0xda   : > { %v1568_v14 = vrot.slane %v1567_v21, 1  ;;  %v1542_v16 = vunpack.c.l.bf16 %v4653_v17  ;;  %v1543_v31 = vunpack.c.l.bf16 %v4656_v55  ;;  %v1544_v32 = vunpack.c.l.bf16 %v4659_v35 }
  0xdb   : > { %v1545_v60 = vunpack.c.l.bf16 %v4662_v44  ;;  %v1574_v20 = vrot.slane %v4664_v29, 1  ;;  %v1580_v27 = vrot.slane %v4666_v56, 1  ;;  %v1586_v8 = vrot.slane %v4668_v26, 1 }
  0xdc   : > { %v1592_v62 = vrot.slane %v4670_v11, 1  ;;  %v1551_v4 = vadd.f32 %v1550_v59, %v1549_v53  ;;  %v1557_v3 = vadd.f32 %v1556_v50, %v1555_v43  ;;  %v1563_v37 = vadd.f32 %v1562_v25, %v1561_v23  ;;  %v4680_v18 = vpop.permute.xlu2 %826 }
  0xdd   : > { %v1569_v33 = vadd.f32 %v1568_v14, %v1567_v21  ;;  %v1594_v6 = vrot.slane %v1538_v1, 4  ;;  %v1600_v34 = vrot.slane %v1539_v58, 4  ;;  %v1606_v5 = vrot.slane %v1540_v42, 4 }
  0xde   : > { %v1612_v51 = vrot.slane %v1541_v24, 4  ;;  %v1618_v19 = vrot.slane %v1542_v16, 4  ;;  %v1624_v0 = vrot.slane %v1543_v31, 4  ;;  %v1630_v13 = vrot.slane %v1544_v32, 4 }
  0xdf   : > { %v1636_v2 = vrot.slane %v1545_v60, 4  ;;  %v1595_v57 = vadd.f32 %v1594_v6, %v1538_v1  ;;  %v1601_v48 = vadd.f32 %v1600_v34, %v1539_v58  ;;  %v1607_v49 = vadd.f32 %v1606_v5, %v1540_v42 }
  0xe0   : > { %v1613_v15 = vadd.f32 %v1612_v51, %v1541_v24  ;;  %v1619_v46 = vadd.f32 %v1618_v19, %v1542_v16  ;;  %v1625_v63 = vadd.f32 %v1624_v0, %v1543_v31  ;;  %v1631_v38 = vadd.f32 %v1630_v13, %v1544_v32 }
  0xe1   : > { %v1637_v39 = vadd.f32 %v1636_v2, %v1545_v60  ;;  %v1596_v52 = vrot.slane %v1595_v57, 2  ;;  %v1602_v40 = vrot.slane %v1601_v48, 2  ;;  %v1608_v53 = vrot.slane %v1607_v49, 2 }
  0xe2   : > { %v1614_v43 = vrot.slane %v1613_v15, 2  ;;  %v1620_v23 = vrot.slane %v1619_v46, 2  ;;  %v1626_v21 = vrot.slane %v1625_v63, 2  ;;  %v1632_v1 = vrot.slane %v1631_v38, 2 }
  0xe3   : > { %v1638_v59 = vrot.slane %v1637_v39, 2  ;;  %v1597_v50 = vadd.f32 %v1596_v52, %v1595_v57  ;;  %v1603_v58 = vadd.f32 %v1602_v40, %v1601_v48  ;;  %v1609_v25 = vadd.f32 %v1608_v53, %v1607_v49 }
  0xe4   : > { %v1615_v14 = vadd.f32 %v1614_v43, %v1613_v15  ;;  %v1621_v42 = vadd.f32 %v1620_v23, %v1619_v46  ;;  %v1627_v6 = vadd.f32 %v1626_v21, %v1625_v63  ;;  %v1633_v34 = vadd.f32 %v1632_v1, %v1631_v38  ;;  %v851_v13 = vpop.permute.xlu2 %850 }
  0xe5   : > { %v1639_v24 = vadd.f32 %v1638_v59, %v1637_v39  ;;  %v1598_v16 = vrot.slane %v1597_v50, 1  ;;  %v1604_v31 = vrot.slane %v1603_v58, 1  ;;  %v1610_v32 = vrot.slane %v1609_v25, 1 }
  0xe6   : > { %v1616_v60 = vrot.slane %v1615_v14, 1  ;;  %v1622_v5 = vrot.slane %v1621_v42, 1  ;;  %v1628_v51 = vrot.slane %v1627_v6, 1  ;;  %v1634_v19 = vrot.slane %v1633_v34, 1 }
  0xe7   : > { %v1640_v0 = vrot.slane %v1639_v24, 1  ;;  %v1599_v2 = vadd.f32 %v1598_v16, %v1597_v50  ;;  %v1605_v44 = vadd.f32 %v1604_v31, %v1603_v58  ;;  %v1611_v28 = vadd.f32 %v1610_v32, %v1609_v25 }
  0xe8   : > { %v1617_v57 = vadd.f32 %v1616_v60, %v1615_v14  ;;  %v1575_v48 = vadd.f32 %v1574_v20, %v4664_v29  ;;  %v1581_v49 = vadd.f32 %v1580_v27, %v4666_v56  ;;  %v1587_v15 = vadd.f32 %v1586_v8, %v4668_v26 }
  0xe9   : > { %v1623_v46 = vadd.f32 %v1622_v5, %v1621_v42  ;;  %v1593_v63 = vadd.f32 %v1592_v62, %v4670_v11  ;;  %v1629_v38 = vadd.f32 %v1628_v51, %v1627_v6  ;;  %v1642_v39 = vmul.f32 %v1551_v4, %v4452_v7 }
  0xea   : > { %v1643_v52 = vmul.f32 %v1557_v3, %v4452_v7  ;;  %v1635_v40 = vadd.f32 %v1634_v19, %v1633_v34  ;;  %v1641_v53 = vadd.f32 %v1640_v0, %v1639_v24  ;;  %v1644_v43 = vmul.f32 %v1563_v37, %v4452_v7 }
  0xeb   : > { %v1645_v23 = vmul.f32 %v1569_v33, %v4452_v7  ;;  %v1650_v29 = vmul.f32 %v1599_v2, %v4452_v7  ;;  %v1651_v56 = vmul.f32 %v1605_v44, %v4452_v7  ;;  %v1652_v26 = vmul.f32 %v1611_v28, %v4452_v7 }
  0xec   : > { %v1653_v20 = vmul.f32 %v1617_v57, %v4452_v7  ;;  %v1646_v11 = vmul.f32 %v1575_v48, %v4452_v7  ;;  %v1647_v27 = vmul.f32 %v1581_v49, %v4452_v7  ;;  %v1648_v8 = vmul.f32 %v1587_v15, %v4452_v7  ;;  %v833_v59 = vpop.permute.xlu2 %832 }
  0xed   : > { %v1654_v62 = vmul.f32 %v1623_v46, %v4452_v7  ;;  %v1655_v4 = vmul.f32 %v1629_v38, %v4452_v7  ;;  %v1713_v3 = vsel %vm1674_vm1, %v1643_v52, %v1642_v39  ;;  %v1720_v37 = vsel %vm1674_vm1, %v1651_v56, %v1650_v29 }
  0xee   : > { %v787_v33 = vlaneseq  ;;  %v1649_v44 = vmul.f32 %v1593_v63, %v4452_v7  ;;  %v1656_v28 = vmul.f32 %v1635_v40, %v4452_v7  ;;  %v1714_v21 = vsel %vm1676_vm2, %v1644_v43, %v1713_v3 }
  0xef   : > { %v1721_v1 = vsel %vm1676_vm2, %v1652_v26, %v1720_v37  ;;  %v1657_v58 = vmul.f32 %v1641_v53, %v4452_v7  ;;  %v1715_v25 = vsel %vm1678_vm3, %v1645_v23, %v1714_v21 }
  0xf0   : > { %v1722_v14 = vsel %vm1678_vm3, %v1653_v20, %v1721_v1  ;;  %v4724_v42 = vshrl.u32 %v787_v33, 7  ;;  %v1716_v34 = vsel %vm1680_vm4, %v1646_v11, %v1715_v25 }
  0xf1   : > { %v1723_v24 = vsel %vm1680_vm4, %v1654_v62, %v1722_v14  ;;  %v1717_v16 = vsel %vm1682_vm5, %v1647_v27, %v1716_v34 }
  0xf2   : > { %v845_v50 = vpop.permute.xlu1 %844  ;;  %v821_v6 = vpop.permute.xlu0 %820  ;;  %v1724_v31 = vsel %vm1682_vm5, %v1655_v4, %v1723_v24  ;;  %vm869_vm8 = vcmp.eq.s32.totalorder %v4724_v42, %v4680_v18  ;;  %v1718_v7 = vsel %vm1684_vm6, %v1648_v8, %v1717_v16  ;;  %vm877_vm10 = vcmp.eq.s32.totalorder %v4724_v42, %v851_v13 }
  0xf3   : > { %v1725_v32 = vsel %vm1684_vm6, %v1656_v28, %v1724_v31  ;;  %vm885_vm9 = vmpackc.low %vm869_vm8, %vm869_vm8  ;;  %v1719_v60 = vsel %vm1686_vm7, %v1649_v44, %v1718_v7  ;;  %vm871_vm11 = vcmp.eq.s32.totalorder %v4724_v42, %v833_v59  ;;  %vm875_vm14 = vcmp.eq.s32.totalorder %v4724_v42, %v845_v50 }
  0xf4   : > { %v1726_v5 = vsel %vm1686_vm7, %v1657_v58, %v1725_v32  ;;  %v901_v19 = vsel %vm885_vm9, %v4597_v12, 0  ;;  %vm893_vm12 = vmpackc.low %vm877_vm10, %vm877_vm10  ;;  %v860_v0 = vpop.permute.xlu2 %859  ;;  %vm867_vm15 = vcmp.eq.s32.totalorder %v4724_v42, %v821_v6 }
  0xf5   : > { %v1762_v51 = vpack.c.bf16 %v1726_v5, %v1719_v60  ;;  %vm887_vm13 = vmpackc.low %vm871_vm11, %vm871_vm11  ;;  %v917_v57 = vunpack.c.l.bf16 %v901_v19  ;;  %v909_v13 = vsel %vm893_vm12, %v4635_v45, 0  ;;  %vm880_vm10 = vcmp.eq.s32.totalorder %v4724_v42, %v860_v0 }
  0xf6   : > { %v903_v48 = vsel %vm887_vm13, %v4606_v10, 0  ;;  %vm4743_vm0 = vmpackc.low %vm875_vm14, %vm875_vm14  ;;  %v925_v15 = vunpack.c.l.bf16 %v909_v13 }
  0xf7   : > { %1982 = vmatmul.bf16.vlgmr.msra.gmra.mxu1 %v1762_v51  ;;  %v943_v46 = vrot.slane %v917_v57, 4  ;;  %vm4748_vm9 = vmpackc.low %vm867_vm15, %vm867_vm15  ;;  %v919_v38 = vunpack.c.l.bf16 %v903_v48  ;;  %v907_v39 = vsel %vm4743_vm0, %v4624_v22, 0 }
  0xf8   : > { %v991_v53 = vrot.slane %v925_v15, 4  ;;  %v899_v43 = vsel %vm4748_vm9, %v4583_v41, 0  ;;  %vm4764_vm13 = vmpackc.low %vm880_vm10, %vm880_vm10  ;;  %v923_v20 = vunpack.c.l.bf16 %v907_v39 }
  0xf9   : > { %v944_v26 = vadd.f32 %v943_v46, %v917_v57  ;;  %v955_v27 = vrot.slane %v919_v38, 4  ;;  %v915_v8 = vunpack.c.l.bf16 %v899_v43  ;;  %v912_v4 = vsel %vm4764_vm13, %v4656_v55, 0  ;;  %v3412_v43 = vld [vmem:[#allocation10 + $0x10] sm:$0xff] }
  0xfa   : > { %v848_v18 = vpop.permute.xlu1 %847  ;;  %v824_v2 = vpop.permute.xlu0 %823  ;;  %v992_v62 = vadd.f32 %v991_v53, %v925_v15  ;;  %v979_v44 = vrot.slane %v923_v20, 4  ;;  %v928_v21 = vunpack.c.l.bf16 %v912_v4 }
  0xfb   : > { %vm876_vm8 = vcmp.eq.s32.totalorder %v4724_v42, %v848_v18  ;;  %vm868_vm12 = vcmp.eq.s32.totalorder %v4724_v42, %v824_v2  ;;  %v945_v33 = vrot.slane %v944_v26, 2  ;;  %v956_v28 = vadd.f32 %v955_v27, %v919_v38 }
  0xfc   : > { %vm4756_vm11 = vmpackc.low %vm876_vm8, %vm876_vm8  ;;  %v842_v29 = vpop.permute.xlu2 %841  ;;  %v993_v59 = vrot.slane %v992_v62, 2  ;;  %v931_v50 = vrot.slane %v915_v8, 4  ;;  %v980_v6 = vadd.f32 %v979_v44, %v923_v20  ;;  %v1009_v31 = vrot.slane %v928_v21, 4  ;;  %v3417_v44 = vld [vmem:[#allocation10 + $0x38] sm:$0xff] }
  0xfd   : > { %v908_v11 = vsel %vm4756_vm11, %v4632_v30, 0  ;;  %vm884_vm14 = vmpackc.low %vm868_vm12, %vm868_vm12  ;;  %v946_v14 = vadd.f32 %v945_v33, %v944_v26  ;;  %v957_v34 = vrot.slane %v956_v28, 2  ;;  %vm874_vm0 = vcmp.eq.s32.totalorder %v4724_v42, %v842_v29  ;;  %2474 = vmatpush.bf16.msra.mxu3 %v3417_v44  ;;  %v5321_v44 = vld [vmem:[#allocation29_spill] sm:$0xff] }
  0xfe   : > { %v924_v3 = vunpack.c.l.bf16 %v908_v11  ;;  %v900_v37 = vsel %vm884_vm14, %v4591_v9, 0  ;;  %v994_v32 = vadd.f32 %v993_v59, %v992_v62  ;;  %v932_v60 = vadd.f32 %v931_v50, %v915_v8  ;;  %vm4782_vm10 = vmpackc.low %vm874_vm0, %vm874_vm0 }
  0xff   : > { %v916_v1 = vunpack.c.l.bf16 %v900_v37  ;;  %v947_v51 = vrot.slane %v946_v14, 1  ;;  %v981_v19 = vrot.slane %v980_v6, 2  ;;  %v958_v0 = vadd.f32 %v957_v34, %v956_v28 }
 0x100   : > { %v985_v58 = vrot.slane %v924_v3, 4  ;;  %v1010_v18 = vadd.f32 %v1009_v31, %v928_v21  ;;  %v995_v57 = vrot.slane %v994_v32, 1  ;;  %v933_v13 = vrot.slane %v932_v60, 2 }
 0x101   : > { %v937_v7 = vrot.slane %v916_v1, 4  ;;  %v948_v15 = vadd.f32 %v947_v51, %v946_v14  ;;  %v982_v46 = vadd.f32 %v981_v19, %v980_v6  ;;  %v959_v63 = vrot.slane %v958_v0, 1 }
 0x102   : > { %v854_v40 = vpop.permute.xlu1 %853  ;;  %v830_v56 = vpop.permute.xlu0 %829  ;;  %v986_v5 = vadd.f32 %v985_v58, %v924_v3  ;;  %v1011_v52 = vrot.slane %v1010_v18, 2  ;;  %v996_v23 = vadd.f32 %v995_v57, %v994_v32  ;;  %v934_v29 = vadd.f32 %v933_v13, %v932_v60 }
 0x103   : > { %vm878_vm15 = vcmp.eq.s32.totalorder %v4724_v42, %v854_v40  ;;  %v938_v2 = vadd.f32 %v937_v7, %v916_v1  ;;  %vm870_vm9 = vcmp.eq.s32.totalorder %v4724_v42, %v830_v56  ;;  %v1029_v11 = vpack.c.bf16 %v948_v15, %v948_v15 }
 0x104   : > { %v987_v48 = vrot.slane %v986_v5, 2  ;;  %vm4777_vm8 = vmpackc.low %vm878_vm15, %vm878_vm15  ;;  %v983_v27 = vrot.slane %v982_v46, 1  ;;  %v960_v62 = vadd.f32 %v959_v63, %v958_v0  ;;  %v906_v4 = vsel %vm4782_vm10, %v4618_v54, 0  ;;  %v3416_v54 = vld [vmem:[#allocation10 + $0x30] sm:$0xff] }
 0x105   : > { %v1048_v24 = vpop.permute.xlu2 %1047  ;;  %v939_v40 = vrot.slane %v938_v2, 2  ;;  %v910_v53 = vsel %vm4777_vm8, %v4638_v61, 0  ;;  %vm4790_vm12 = vmpackc.low %vm870_vm9, %vm870_vm9  ;;  %v1012_v28 = vadd.f32 %v1011_v52, %v1010_v18  ;;  %v1037_v1 = vpack.c.bf16 %v996_v23, %v996_v23  ;;  %2475 = vmatpush.bf16.msra.mxu3 %v3416_v54 }
 0x106   : > { %v988_v56 = vadd.f32 %v987_v48, %v986_v5  ;;  %vm1092_vm14 = vcmp.eq.s32.totalorder %v4724_v42, %v1048_v24  ;;  %v926_v3 = vunpack.c.l.bf16 %v910_v53  ;;  %v902_v37 = vsel %vm4790_vm12, %v4600_v36, 0  ;;  %v3415_v48 = vld [vmem:[#allocation10 + $0x28] sm:$0xff] }
 0x107   : > { %v940_v21 = vadd.f32 %v939_v40, %v938_v2  ;;  %v935_v59 = vrot.slane %v934_v29, 1  ;;  %vm4812_vm8 = vmpackc.low %vm1092_vm14, %vm1092_vm14  ;;  %v918_v14 = vunpack.c.l.bf16 %v902_v37  ;;  %v4822_v24 = vperm.slane %v1029_v11, 0 }
 0x108   : > { %v989_v50 = vrot.slane %v988_v56, 1  ;;  %v984_v31 = vadd.f32 %v983_v27, %v982_v46  ;;  %v997_v7 = vrot.slane %v926_v3, 4  ;;  %v1013_v32 = vrot.slane %v1012_v28, 1  ;;  %v3414_v27 = vld [vmem:[#allocation10 + $0x20] sm:$0xff] }
 0x109   : > { %v941_v60 = vrot.slane %v940_v21, 1  ;;  %v1124_v5 = vsel %vm4812_vm8, %v4591_v9, 0  ;;  %v936_v51 = vadd.f32 %v935_v59, %v934_v29  ;;  %v949_v13 = vrot.slane %v918_v14, 4  ;;  %2476 = vmatpush.bf16.msra.mxu3 %v3415_v48 }
 0x10a   : > { %v836_v25 = vpop.permute.xlu1 %835  ;;  %v857_v16 = vpop.permute.xlu0 %856  ;;  %v990_v2 = vadd.f32 %v989_v50, %v988_v56  ;;  %v4831_v49 = vperm.slane %v1037_v1, 0  ;;  %v998_v15 = vadd.f32 %v997_v7, %v926_v3  ;;  %v1140_v46 = vunpack.c.l.bf16 %v1124_v5  ;;  %v5324_v7 = vld [vmem:[#allocation28_spill] sm:$0xff] }
 0x10b   : > { %vm872_vm11 = vcmp.eq.s32.totalorder %v4724_v42, %v836_v25  ;;  %vm879_vm13 = vcmp.eq.s32.totalorder %v4724_v42, %v857_v16  ;;  %v922_v25 = vunpack.c.l.bf16 %v906_v4  ;;  %v1031_v16 = vpack.c.bf16 %v960_v62, %v960_v62 }
 0x10c   : > { %vm4798_vm15 = vmpackc.low %vm872_vm11, %vm872_vm11  ;;  %v1035_v52 = vpack.c.bf16 %v984_v31, %v984_v31  ;;  %v1014_v40 = vadd.f32 %v1013_v32, %v1012_v28  ;;  %v942_v53 = vadd.f32 %v941_v60, %v940_v21  ;;  %v1027_v29 = vpack.c.bf16 %v936_v51, %v936_v51 }
 0x10d   : > { %v4795_v26 = vpop.permute.xlu2 %1050  ;;  %vm4808_vm0 = vmpackc.low %vm879_vm13, %vm879_vm13  ;;  %v904_v6 = vsel %vm4798_vm15, %v4612_v47, 0  ;;  %v973_v57 = vrot.slane %v922_v25, 4  ;;  %v4849_v23 = vperm.slane %v1031_v16, 0  ;;  %v1036_v8 = vpack.c.bf16 %v990_v2, %v990_v2  ;;  %2477 = vmatpush.bf16.msra.mxu3 %v3414_v27 }
 0x10e   : > { %v911_v34 = vsel %vm4808_vm0, %v4653_v17, 0  ;;  %v920_v19 = vunpack.c.l.bf16 %v904_v6  ;;  %vm1093_vm11 = vcmp.eq.s32.totalorder %v4724_v42, %v4795_v26  ;;  %v950_v4 = vadd.f32 %v949_v13, %v918_v14  ;;  %v3413_v6 = vld [vmem:[#allocation10 + $0x18] sm:$0xff] }
 0x10f   : > { %v927_v0 = vunpack.c.l.bf16 %v911_v34  ;;  %v974_v62 = vadd.f32 %v973_v57, %v922_v25  ;;  %vm4855_vm14 = vmpackc.low %vm1093_vm11, %vm1093_vm11  ;;  %v999_v37 = vrot.slane %v998_v15, 2  ;;  %v1161_v33 = vrot.slane %v1140_v46, 4 }
 0x110   : > { %v961_v56 = vrot.slane %v920_v19, 4  ;;  %v2048_v21 = vunpack.c.l.b16 %v4831_v49  ;;  %v2030_v26 = vperm.slane %v1035_v52, 0  ;;  %v1040_v1 = vpack.c.bf16 %v1014_v40, %v1014_v40 }
 0x111   : > { %v1003_v11 = vrot.slane %v927_v0, 4  ;;  %v1028_v59 = vpack.c.bf16 %v942_v53, %v942_v53  ;;  %v1125_v25 = vsel %vm4855_vm14, %v4597_v12, 0  ;;  %v2031_v34 = vperm.slane %v1036_v8, 0  ;;  %2478 = vmatpush.bf16.msra.mxu3 %v3413_v6 }
 0x112   : > { %v863_v39 = vpop.permute.xlu1 %862  ;;  %v839_v20 = vpop.permute.xlu0 %838  ;;  %v962_v58 = vadd.f32 %v961_v56, %v920_v19  ;;  %v951_v16 = vrot.slane %v950_v4, 2  ;;  %v2042_v60 = vunpack.c.l.b16 %v4849_v23  ;;  %v975_v5 = vrot.slane %v974_v62, 2 }
 0x113   : > { %vm881_vm9 = vcmp.eq.s32.totalorder %v4724_v42, %v863_v39  ;;  %vm873_vm10 = vcmp.eq.s32.totalorder %v4724_v42, %v839_v20  ;;  %v2040_v39 = vunpack.c.l.b16 %v4822_v24  ;;  %v1004_v54 = vadd.f32 %v1003_v11, %v927_v0 }
 0x114   : > { %vm4835_vm12 = vmpackc.low %vm881_vm9, %vm881_vm9  ;;  %v1000_v51 = vadd.f32 %v999_v37, %v998_v15  ;;  %v1162_v19 = vadd.f32 %v1161_v33, %v1140_v46  ;;  %v2022_v2 = vperm.slane %v1027_v29, 0  ;;  %v4878_v57 = vperm.slane %v1040_v1, 0 }
 0x115   : > { %v4839_v63 = vpop.permute.xlu2 %1053  ;;  %vm4845_vm13 = vmpackc.low %vm873_vm10, %vm873_vm10  ;;  %v913_v3 = vsel %vm4835_vm12, %v4659_v35, 0  ;;  %v1141_v12 = vunpack.c.l.bf16 %v1125_v25  ;;  %v2023_v48 = vperm.slane %v1028_v59, 0  ;;  %v963_v9 = vrot.slane %v962_v58, 2  ;;  %2479 = vmatpush.bf16.msra.mxu3 %v3412_v43 }
 0x116   : > { %v905_v28 = vsel %vm4845_vm13, %v5321_v44, 0  ;;  %v929_v14 = vunpack.c.l.bf16 %v913_v3  ;;  %v2047_v56 = vunpack.c.l.b16 %v2031_v34  ;;  %v952_v11 = vadd.f32 %v951_v16, %v950_v4  ;;  %v3440_v16 = vld [vmem:[#allocation10 + $0xf0] sm:$0xff] }
 0x117   : > { %v921_v31 = vunpack.c.l.bf16 %v905_v28  ;;  %v976_v15 = vadd.f32 %v975_v5, %v974_v62  ;;  %v1001_v46 = vrot.slane %v1000_v51, 1  ;;  %v1163_v29 = vrot.slane %v1162_v19, 2 }
 0x118   : > { %v1015_v52 = vrot.slane %v929_v14, 4  ;;  %v2046_v8 = vunpack.c.l.b16 %v2030_v26  ;;  %v2038_v20 = vunpack.c.l.b16 %v2022_v2  ;;  %v1167_v3 = vrot.slane %v1141_v12, 4 }
 0x119   : > { %v967_v27 = vrot.slane %v921_v31, 4  ;;  %v964_v33 = vadd.f32 %v963_v9, %v962_v58  ;;  %vm1094_vm10 = vcmp.eq.s32.totalorder %v4724_v42, %v4839_v63  ;;  %v2039_v62 = vunpack.c.l.b16 %v2023_v48  ;;  %v3411_v58 = vld [vmem:[#allocation10 + $0x8] sm:$0xff] }
 0x11a   : > { %v866_v38 = vpop.permute.xlu0 %865  ;;  %v1016_v1 = vadd.f32 %v1015_v52, %v929_v14  ;;  %v953_v59 = vrot.slane %v952_v11, 1  ;;  %v4897_v25 = vsel %vm1674_vm1, %v2047_v56, %v2046_v8  ;;  %v977_v63 = vrot.slane %v976_v15, 1  ;;  %vm4899_vm13 = vmpackc.low %vm1094_vm10, %vm1094_vm10  ;;  %2480 = vmatpush.bf16.msra.mxu3 %v3411_v58 }
 0x11b   : > { %v4829_v18 = vpop.permute.xlu1 %1044  ;;  %vm882_vm15 = vcmp.eq.s32.totalorder %v4724_v42, %v866_v38  ;;  %v1005_v38 = vrot.slane %v1004_v54, 2  ;;  %v968_v50 = vadd.f32 %v967_v27, %v921_v31  ;;  %v1002_v14 = vadd.f32 %v1001_v46, %v1000_v51 }
 0x11c   : > { %vm4867_vm0 = vmpackc.low %vm882_vm15, %vm882_vm15  ;;  %vm1091_vm8 = vcmp.eq.s32.totalorder %v4724_v42, %v4829_v18  ;;  %v2051_v18 = vunpack.c.l.b16 %v4878_v57  ;;  %v1164_v6 = vadd.f32 %v1163_v29, %v1162_v19  ;;  %v1168_v34 = vadd.f32 %v1167_v3, %v1141_v12  ;;  %v3410_v12 = vld [vmem:[#allocation10] sm:$0xff] }
 0x11d   : > { %v914_v32 = vsel %vm4867_vm0, %v5324_v7, 0  ;;  %v4880_v40 = vpop.permute.xlu2 %1080  ;;  %v1006_v28 = vadd.f32 %v1005_v38, %v1004_v54  ;;  %vm4887_vm11 = vmpackc.low %vm1091_vm8, %vm1091_vm8  ;;  %v3433_v54 = vld [vmem:[#allocation10 + $0xb8] sm:$0xff]  ;;  %v965_v5 = vrot.slane %v964_v33, 1  ;;  %v1017_v2 = vrot.slane %v1016_v1, 2 }
 0x11e   : > { %v930_v13 = vunpack.c.l.bf16 %v914_v32  ;;  %v1123_v31 = vsel %vm4887_vm11, %v4583_v41, 0  ;;  %2502 = vmatpush.bf16.msrb.mxu1 %v3433_v54  ;;  %v4911_v48 = vsel %vm1674_vm1, %v2039_v62, %v2038_v20  ;;  %v969_v9 = vrot.slane %v968_v50, 2  ;;  %2481 = vmatpush.bf16.msra.mxu3 %v3410_v12 }
 0x11f   : > { %vm1103_vm15 = vcmp.eq.s32.totalorder %v4724_v42, %v4880_v40  ;;  %v1038_v41 = vpack.c.bf16 %v1002_v14, %v1002_v14  ;;  %v1165_v38 = vrot.slane %v1164_v6, 1  ;;  %v1126_v52 = vsel %vm4899_vm13, %v4600_v36, 0 }
 0x120   : > { %v1021_v37 = vrot.slane %v930_v13, 4  ;;  %v1139_v43 = vunpack.c.l.bf16 %v1123_v31  ;;  %v1169_v27 = vrot.slane %v1168_v34, 2  ;;  %v4926_v8 = vadd.f32 %v977_v63, %v976_v15  ;;  %v3432_v15 = vld [vmem:[#allocation10 + $0xb0] sm:$0xff] }
 0x121   : > { %v966_v20 = vadd.f32 %v965_v5, %v964_v33  ;;  %v1018_v36 = vadd.f32 %v1017_v2, %v1016_v1  ;;  %v1142_v4 = vunpack.c.l.bf16 %v1126_v52  ;;  %v3441_v33 = vld [vmem:[#allocation10 + $0xf8] sm:$0xff]  ;;  %v4940_v1 = vperm.slane %v1038_v41, 0 }
 0x122   : > { %v1022_v32 = vadd.f32 %v1021_v37, %v930_v13  ;;  %v954_v13 = vadd.f32 %v953_v59, %v952_v11  ;;  %v970_v37 = vadd.f32 %v969_v9, %v968_v50  ;;  %v4942_v59 = vadd.f32 %v1165_v38, %v1164_v6  ;;  %2503 = vmatpush.bf16.msrb.mxu1 %v3432_v15  ;;  %v3431_v6 = vld [vmem:[#allocation10 + $0xa8] sm:$0xff] }
 0x123   : > { %v1072_v0 = vpop.permute.xlu1 %1071  ;;  %v1069_v53 = vpop.permute.xlu0 %1068  ;;  %v1155_v26 = vrot.slane %v1139_v43, 4  ;;  %v4951_v58 = vadd.f32 %v1169_v27, %v1168_v34  ;;  %2516 = vmatpush.bf16.msrb.mxu2 %v3441_v33  ;;  %v1032_v31 = vpack.c.bf16 %v966_v20, %v966_v20  ;;  %v1019_v5 = vrot.slane %v1018_v36, 1  ;;  %v3448_v34 = vld [vmem:[#allocation10 + $0x130] sm:$0xff] }
 0x124   : > { %vm1100_vm9 = vcmp.eq.s32.totalorder %v4724_v42, %v1072_v0  ;;  %vm1099_vm14 = vcmp.eq.s32.totalorder %v4724_v42, %v1069_v53  ;;  %v1007_v0 = vrot.slane %v1006_v28, 1  ;;  %v1023_v46 = vrot.slane %v1022_v32, 2 }
 0x125   : > { %vm4892_vm12 = vmpackc.low %vm1100_vm9, %vm1100_vm9  ;;  %v1063_v56 = vpop.permute.xlu2 %1062  ;;  %v1030_v40 = vpack.c.bf16 %v954_v13, %v954_v13  ;;  %v971_v2 = vrot.slane %v970_v37, 1  ;;  %v1156_v12 = vadd.f32 %v1155_v26, %v1139_v43  ;;  %v2049_v41 = vunpack.c.l.b16 %v4940_v1 }
 0x126   : > { %v1132_v51 = vsel %vm4892_vm12, %v4632_v30, 0  ;;  %vm4921_vm0 = vmpackc.low %vm1099_vm14, %vm1099_vm14  ;;  %v1008_v3 = vadd.f32 %v1007_v0, %v1006_v28  ;;  %v3449_v28 = vld [vmem:[#allocation10 + $0x138] sm:$0xff]  ;;  %vm1097_vm13 = vcmp.eq.s32.totalorder %v4724_v42, %v1063_v56  ;;  %v1171_v38 = vrot.slane %v4951_v58, 1  ;;  %2504 = vmatpush.bf16.msrb.mxu1 %v3431_v6 }
 0x127   : > { %v1148_v29 = vunpack.c.l.bf16 %v1132_v51  ;;  %vm4932_vm9 = vmpackc.low %vm1103_vm15, %vm1103_vm15  ;;  %v1131_v62 = vsel %vm4921_vm0, %v4624_v22, 0  ;;  %v1024_v22 = vadd.f32 %v1023_v46, %v1022_v32  ;;  %2530 = vmatpush.bf16.msrb.mxu3 %v3449_v28  ;;  %v1173_v51 = vrot.slane %v1142_v4, 4  ;;  %2517 = vmatpush.bf16.msrb.mxu2 %v3440_v16 }
 0x128   : > { %v1135_v54 = vsel %vm4932_vm9, %v4653_v17, 0  ;;  %v1147_v0 = vunpack.c.l.bf16 %v1131_v62  ;;  %v1039_v32 = vpack.c.bf16 %v1008_v3, %v1008_v3  ;;  %vm4971_vm14 = vmpackc.low %vm1097_vm13, %vm1097_vm13  ;;  %v1020_v43 = vadd.f32 %v1019_v5, %v1018_v36 }
 0x129   : > { %v1209_v63 = vrot.slane %v1148_v29, 4  ;;  %v1151_v13 = vunpack.c.l.bf16 %v1135_v54  ;;  %v1025_v52 = vrot.slane %v1024_v22, 1  ;;  %v972_v53 = vadd.f32 %v971_v2, %v970_v37 }
 0x12a   : > { %v1203_v27 = vrot.slane %v1147_v0, 4  ;;  %v4977_v3 = vperm.slane %v1039_v32, 0  ;;  %v1174_v62 = vadd.f32 %v1173_v51, %v1142_v4  ;;  %v1157_v15 = vrot.slane %v1156_v12, 2 }
 0x12b   : > { %v1075_v19 = vpop.permute.xlu1 %1074  ;;  %v1078_v11 = vpop.permute.xlu0 %1077  ;;  %v1210_v30 = vadd.f32 %v1209_v63, %v1148_v29  ;;  %2531 = vmatpush.bf16.msrb.mxu3 %v3448_v34  ;;  %v1227_v33 = vrot.slane %v1151_v13, 4  ;;  %v1129_v28 = vsel %vm4971_vm14, %v5321_v44, 0  ;;  %v1041_v26 = vpack.c.bf16 %v1020_v43, %v1020_v43 }
 0x12c   : > { %vm1101_vm8 = vcmp.eq.s32.totalorder %v4724_v42, %v1075_v19  ;;  %vm1102_vm10 = vcmp.eq.s32.totalorder %v4724_v42, %v1078_v11  ;;  %v4964_v19 = vperm.slane %v1030_v40, 0  ;;  %v1026_v40 = vadd.f32 %v1025_v52, %v1024_v22 }
 0x12d   : > { %vm4947_vm11 = vmpackc.low %vm1101_vm8, %vm1101_vm8  ;;  %v1090_v20 = vpop.permute.xlu2 %1089  ;;  %v1211_v36 = vrot.slane %v1210_v30, 2  ;;  %v1204_v50 = vadd.f32 %v1203_v27, %v1147_v0  ;;  %v1033_v22 = vpack.c.bf16 %v972_v53, %v972_v53  ;;  %v1175_v6 = vrot.slane %v1174_v62, 2 }
 0x12e   : > { %vm4956_vm12 = vmpackc.low %vm1102_vm10, %vm1102_vm10  ;;  %v1133_v17 = vsel %vm4947_vm11, %v4635_v45, 0  ;;  %v4975_v45 = vperm.slane %v1032_v31, 0  ;;  %vm1106_vm0 = vcmp.eq.s32.totalorder %v4724_v42, %v1090_v20  ;;  %v2041_v44 = vunpack.c.l.b16 %v4964_v19 }
 0x12f   : > { %v1134_v9 = vsel %vm4956_vm12, %v4638_v61, 0  ;;  %v1149_v46 = vunpack.c.l.bf16 %v1133_v17  ;;  %v4992_v16 = vadd.f32 %v1227_v33, %v1151_v13  ;;  %v4994_v31 = vunpack.c.l.bf16 %v1129_v28  ;;  %vm4996_vm11 = vmpackc.low %vm1106_vm0, %vm1106_vm0 }
 0x130   : > { %v1150_v29 = vunpack.c.l.bf16 %v1134_v9  ;;  %v2043_v63 = vunpack.c.l.b16 %v4975_v45  ;;  %v1158_v0 = vadd.f32 %v1157_v15, %v1156_v12  ;;  %v5000_v34 = vadd.f32 %v1211_v36, %v1210_v30 }
 0x131   : > { %v1215_v37 = vrot.slane %v1149_v46, 4  ;;  %v1042_v2 = vpack.c.bf16 %v1026_v40, %v1026_v40  ;;  %v2050_v51 = vunpack.c.l.b16 %v4977_v3  ;;  %v2036_v17 = vperm.slane %v1041_v26, 0 }
 0x132   : > { %v1221_v14 = vrot.slane %v1150_v29, 4  ;;  %v1205_v19 = vrot.slane %v1204_v50, 2  ;;  %v2028_v9 = vperm.slane %v1033_v22, 0  ;;  %v1138_v56 = vsel %vm4996_vm11, %v5324_v7, 0 }
 0x133   : > { %v1057_v11 = vpop.permute.xlu1 %1056  ;;  %v1060_v61 = vpop.permute.xlu0 %1059  ;;  %v1216_v13 = vadd.f32 %v1215_v37, %v1149_v46  ;;  %v1034_v12 = vpack.c.bf16 %v4926_v8, %v4926_v8  ;;  %v5011_v30 = vadd.f32 %v1175_v6, %v1174_v62  ;;  %v1159_v43 = vrot.slane %v1158_v0, 1 }
 0x134   : > { %vm1095_vm15 = vcmp.eq.s32.totalorder %v4724_v42, %v1057_v11  ;;  %vm1096_vm9 = vcmp.eq.s32.totalorder %v4724_v42, %v1060_v61  ;;  %v1222_v52 = vadd.f32 %v1221_v14, %v1150_v29  ;;  %v1229_v11 = vrot.slane %v4992_v16, 2 }
 0x135   : > { %vm1111_vm8 = vmpackc.low %vm1095_vm15, %vm1095_vm15  ;;  %v1213_v27 = vrot.slane %v5000_v34, 1  ;;  %v1191_v46 = vrot.slane %v4994_v31, 4  ;;  %v2037_v20 = vperm.slane %v1042_v2, 0  ;;  %v1206_v3 = vadd.f32 %v1205_v19, %v1204_v50 }
 0x136   : > { %v1127_v4 = vsel %vm1111_vm8, %v4606_v10, 0  ;;  %vm4986_vm10 = vmpackc.low %vm1096_vm9, %vm1096_vm9  ;;  %v1217_v53 = vrot.slane %v1216_v13, 2  ;;  %v1154_v29 = vunpack.c.l.bf16 %v1138_v56  ;;  %v2055_v7 = vsel %vm1676_vm2, %v2040_v39, %v4911_v48  ;;  %v3439_v56 = vld [vmem:[#allocation10 + $0xe8] sm:$0xff] }
 0x137   : > { %v1143_v10 = vunpack.c.l.bf16 %v1127_v4  ;;  %v1128_v32 = vsel %vm4986_vm10, %v4612_v47, 0  ;;  %v1223_v8 = vrot.slane %v1222_v52, 2  ;;  %v2029_v62 = vperm.slane %v1034_v12, 0  ;;  %2518 = vmatpush.bf16.msrb.mxu2 %v3439_v56 }
 0x138   : > { %v1144_v45 = vunpack.c.l.bf16 %v1128_v32  ;;  %v2044_v15 = vunpack.c.l.b16 %v2028_v9  ;;  %v2056_v33 = vsel %vm1678_vm3, %v2041_v44, %v2055_v7  ;;  %v2062_v26 = vsel %vm1676_vm2, %v2048_v21, %v4897_v25  ;;  %v3430_v9 = vld [vmem:[#allocation10 + $0xa0] sm:$0xff] }
 0x139   : > { %v1179_v47 = vrot.slane %v1143_v10, 4  ;;  %v2052_v50 = vunpack.c.l.b16 %v2036_v17  ;;  %v2053_v37 = vunpack.c.l.b16 %v2037_v20  ;;  %v2057_v24 = vsel %vm1680_vm4, %v2042_v60, %v2056_v33  ;;  %2505 = vmatpush.bf16.msrb.mxu1 %v3430_v9 }
 0x13a   : > { %v1185_v36 = vrot.slane %v1144_v45, 4  ;;  %v2063_v39 = vsel %vm1678_vm3, %v2049_v41, %v2062_v26  ;;  %v2058_v48 = vsel %vm1682_vm5, %v2043_v63, %v2057_v24  ;;  %v1207_v21 = vrot.slane %v1206_v3, 1 }
 0x13b   : > { %v1084_v61 = vpop.permute.xlu1 %1083  ;;  %v1087_v28 = vpop.permute.xlu0 %1086  ;;  %v1180_v40 = vadd.f32 %v1179_v47, %v1143_v10  ;;  %v2064_v4 = vsel %vm1680_vm4, %v2050_v51, %v2063_v39  ;;  %v1218_v25 = vadd.f32 %v1217_v53, %v1216_v13  ;;  %v2045_v54 = vunpack.c.l.b16 %v2029_v62  ;;  %v3429_v62 = vld [vmem:[#allocation10 + $0x98] sm:$0xff] }
 0x13c   : > { %vm1104_vm12 = vcmp.eq.s32.totalorder %v4724_v42, %v1084_v61  ;;  %vm1105_vm14 = vcmp.eq.s32.totalorder %v4724_v42, %v1087_v28  ;;  %v2059_v23 = vsel %vm1684_vm6, %v2044_v15, %v2058_v48  ;;  %v1186_v60 = vadd.f32 %v1185_v36, %v1144_v45 }
 0x13d   : > { %vm1120_vm13 = vmpackc.low %vm1104_vm12, %vm1104_vm12  ;;  %v2065_v1 = vsel %vm1682_vm5, %v2051_v18, %v2064_v4  ;;  %v1245_v63 = vrot.slane %v1154_v29, 4  ;;  %v1181_v22 = vrot.slane %v1180_v40, 2  ;;  %v1224_v6 = vadd.f32 %v1223_v8, %v1222_v52  ;;  %2506 = vmatpush.bf16.msrb.mxu1 %v3429_v62 }
 0x13e   : > { %v1136_v49 = vsel %vm1120_vm13, %v4656_v55, 0  ;;  %vm1121_vm15 = vmpackc.low %vm1105_vm14, %vm1105_vm14  ;;  %v2066_v55 = vsel %vm1684_vm6, %v2052_v50, %v2065_v1  ;;  %v2060_v5 = vsel %vm1686_vm7, %v2045_v54, %v2059_v23  ;;  %v1160_v2 = vadd.f32 %v1159_v43, %v1158_v0  ;;  %v3428_v54 = vld [vmem:[#allocation10 + $0x90] sm:$0xff]  ;;  %v3437_v23 = vld [vmem:[#allocation10 + $0xd8] sm:$0xff] }
 0x13f   : > { %v1152_v41 = vunpack.c.l.bf16 %v1136_v49  ;;  %v1137_v44 = vsel %vm1121_vm15, %v4659_v35, 0  ;;  %v2067_v10 = vsel %vm1686_vm7, %v2053_v37, %v2066_v55  ;;  %v1219_v51 = vrot.slane %v1218_v25, 1  ;;  %v3423_v55 = vld [vmem:[#allocation10 + $0x68] sm:$0xff] }
 0x140   : > { %v1153_v14 = vunpack.c.l.bf16 %v1137_v44  ;;  %v2068_v17 = vpack.c.b16 %v2067_v10, %v2060_v5  ;;  %v1214_v18 = vadd.f32 %v1213_v27, %v5000_v34  ;;  %v1192_v19 = vadd.f32 %v1191_v46, %v4994_v31  ;;  %v3425_v31 = vld [vmem:[#allocation10 + $0x78] sm:$0xff]  ;;  %v3447_v27 = vld [vmem:[#allocation10 + $0x128] sm:$0xff] }
 0x141   : > { %v1233_v32 = vrot.slane %v1152_v41, 4  ;;  %v1187_v35 = vrot.slane %v1186_v60, 2  ;;  %v5049_v52 = vadd.f32 %v1171_v38, %v4951_v58  ;;  %v1208_v12 = vadd.f32 %v1207_v21, %v1206_v3  ;;  %2488 = vmatpush.bf16.msrb.mxu0 %v3425_v31  ;;  %2532 = vmatpush.bf16.msrb.mxu3 %v3447_v27 }
 0x142   : > { %v1239_v57 = vrot.slane %v1153_v14, 4  ;;  %v1182_v47 = vadd.f32 %v1181_v22, %v1180_v40  ;;  %2482 = vmatmul.bf16.vlgmr.msra.gmra.mxu3 %v2068_v17  ;;  %v1177_v45 = vrot.slane %v5011_v30, 1  ;;  %v1225_v43 = vrot.slane %v1224_v6, 1  ;;  %2507 = vmatpush.bf16.msrb.mxu1 %v3428_v54  ;;  %v3133_v54 = vld [vmem:[%s732_s28] sm:$0xf] }
 0x143   : > { %v1234_v13 = vadd.f32 %v1233_v32, %v1152_v41  ;;  %v1246_v20 = vadd.f32 %v1245_v63, %v1154_v29  ;;  %v1251_v46 = vpack.c.bf16 %v1160_v2, %v1160_v2  ;;  %v1230_v61 = vadd.f32 %v1229_v11, %v4992_v16  ;;  %v3438_v29 = vld [vmem:[#allocation10 + $0xe0] sm:$0xff]  ;;  %v3424_v16 = vld [vmem:[#allocation10 + $0x70] sm:$0xff]  ;;  %v3670_v32 = vld [vmem:[%s4238_s18 + $0x1c] sm:$0xf]  ;;  %s5348_s18 = sld [smem:[#allocation36_spill]] }
 0x144   : > { %v1240_v0 = vadd.f32 %v1239_v57, %v1153_v14  ;;  %v1220_v58 = vadd.f32 %v1219_v51, %v1218_v25  ;;  %v1260_v3 = vpack.c.bf16 %v1214_v18, %v1214_v18  ;;  %v1193_v53 = vrot.slane %v1192_v19, 2  ;;  %2519 = vmatpush.bf16.msrb.mxu2 %v3438_v29  ;;  %v3446_v11 = vld [vmem:[#allocation10 + $0x120] sm:$0xff]  ;;  %v3445_v14 = vld [vmem:[#allocation10 + $0x118] sm:$0xff] }
 0x145   : > { %v1235_v34 = vrot.slane %v1234_v13, 2  ;;  %v1188_v7 = vadd.f32 %v1187_v35, %v1186_v60  ;;  %v1259_v15 = vpack.c.bf16 %v1208_v12, %v1208_v12  ;;  %v1183_v33 = vrot.slane %v1182_v47, 1  ;;  %2489 = vmatpush.bf16.msrb.mxu0 %v3424_v16  ;;  %2533 = vmatpush.bf16.msrb.mxu3 %v3446_v11 }
 0x146   : > { %v1241_v38 = vrot.slane %v1240_v0, 2  ;;  %v1252_v40 = vpack.c.bf16 %v4942_v59, %v4942_v59  ;;  %v1226_v36 = vadd.f32 %v1225_v43, %v1224_v6  ;;  %v1247_v26 = vrot.slane %v1246_v20, 2  ;;  %v1066_v59 = vpop.permute.xlu1 %1065  ;;  %v3444_v43 = vld [vmem:[#allocation10 + $0x110] sm:$0xff] }
 0x147   : > { %v1236_v8 = vadd.f32 %v1235_v34, %v1234_v13  ;;  %v1253_v37 = vpack.c.bf16 %v5049_v52, %v5049_v52  ;;  %v1178_v24 = vadd.f32 %v1177_v45, %v5011_v30  ;;  %v1231_v39 = vrot.slane %v1230_v61, 1  ;;  %v3422_v45 = vld [vmem:[#allocation10 + $0x60] sm:$0xff] }
 0x148   : > { %v1242_v28 = vadd.f32 %v1241_v38, %v1240_v0  ;;  %v1261_v48 = vpack.c.bf16 %v1220_v58, %v1220_v58  ;;  %v2086_v4 = vperm.slane %v1251_v46, 0  ;;  %v2095_v49 = vperm.slane %v1260_v3, 0  ;;  %2520 = vmatpush.bf16.msrb.mxu2 %v3437_v23  ;;  %v3426_v3 = vld [vmem:[#allocation10 + $0x80] sm:$0xff] }
 0x149   : > { %v1237_v50 = vrot.slane %v1236_v8, 1  ;;  %v1194_v21 = vadd.f32 %v1193_v53, %v1192_v19  ;;  %v1189_v25 = vrot.slane %v1188_v7, 1  ;;  %v2094_v60 = vperm.slane %v1259_v15, 0  ;;  %2490 = vmatpush.bf16.msrb.mxu0 %v3423_v55  ;;  %2534 = vmatpush.bf16.msrb.mxu3 %v3445_v14  ;;  %v3436_v19 = vld [vmem:[#allocation10 + $0xd0] sm:$0xff]  ;;  %v3435_v53 = vld [vmem:[#allocation10 + $0xc8] sm:$0xff] }
 0x14a   : > { %v1184_v1 = vadd.f32 %v1183_v33, %v1182_v47  ;;  %v1243_v41 = vrot.slane %v1242_v28, 1  ;;  %vm1098_vm0 = vcmp.eq.s32.totalorder %v4724_v42, %v1066_v59  ;;  %v2087_v44 = vperm.slane %v1252_v40, 0  ;;  %v3427_v42 = vld [vmem:[#allocation10 + $0x88] sm:$0xff]  ;;  %v3442_v59 = vld [vmem:[#allocation10 + $0x100] sm:$0xff] }
 0x14b   : > { %v1262_v63 = vpack.c.bf16 %v1226_v36, %v1226_v36  ;;  %v1248_v30 = vadd.f32 %v1247_v26, %v1246_v20  ;;  %v1238_v22 = vadd.f32 %v1237_v50, %v1236_v8  ;;  %vm1114_vm8 = vmpackc.low %vm1098_vm0, %vm1098_vm0  ;;  %v1254_v6 = vpack.c.bf16 %v1178_v24, %v1178_v24  ;;  %2508 = vmatpush.bf16.msrb.mxu1 %v3427_v42  ;;  %v3421_v36 = vld [vmem:[#allocation10 + $0x58] sm:$0xff]  ;;  %v3443_v26 = vld [vmem:[#allocation10 + $0x108] sm:$0xff] }
 0x14c   : > { %v1232_v5 = vadd.f32 %v1231_v39, %v1230_v61  ;;  %v2096_v10 = vperm.slane %v1261_v48, 0  ;;  %v1130_v2 = vsel %vm1114_vm8, %v3670_v32, 0  ;;  %v2102_v51 = vunpack.c.l.b16 %v2086_v4  ;;  %2521 = vmatpush.bf16.msrb.mxu2 %v3436_v19  ;;  %v3434_v48 = vld [vmem:[#allocation10 + $0xc0] sm:$0xff]  ;;  %v3135_v14 = vld [vmem:[%s732_s28 + $0x8] sm:$0xf0] }
 0x14d   : > { %v1195_v17 = vrot.slane %v1194_v21, 1  ;;  %v1190_v57 = vadd.f32 %v1189_v25, %v1188_v7  ;;  %v1146_v18 = vunpack.c.l.bf16 %v1130_v2  ;;  %v2111_v35 = vunpack.c.l.b16 %v2095_v49  ;;  %2491 = vmatpush.bf16.msrb.mxu0 %v3422_v45  ;;  %2535 = vmatpush.bf16.msrb.mxu3 %v3444_v43  ;;  %v3420_v25 = vld [vmem:[#allocation10 + $0x50] sm:$0xff]  ;;  %v3419_v32 = vld [vmem:[#allocation10 + $0x48] sm:$0xff] }
 0x14e   : > { %v2110_v13 = vunpack.c.l.b16 %v2094_v60  ;;  %v1255_v9 = vpack.c.bf16 %v1184_v1, %v1184_v1  ;;  %v1244_v56 = vadd.f32 %v1243_v41, %v1242_v28  ;;  %v2097_v52 = vperm.slane %v1262_v63, 0  ;;  %v3408_v63 = vld [vmem:[%s732_s28 + $0x4] sm:$0xf] }
 0x14f   : > { %v1249_v12 = vrot.slane %v1248_v30, 1  ;;  %v1264_v47 = vpack.c.bf16 %v1238_v22, %v1238_v22  ;;  %v1197_v0 = vrot.slane %v1146_v18, 4  ;;  %v2103_v20 = vunpack.c.l.b16 %v2087_v44  ;;  %2509 = vmatpush.bf16.msrb.mxu1 %v3426_v3  ;;  %v3409_v44 = vld [vmem:[%s732_s28 + $0x4] sm:$0xf0]  ;;  %s5346_s28 = sld [smem:[#allocation33_spill]] }
 0x150   : > { %v2088_v34 = vperm.slane %v1253_v37, 0  ;;  %v1263_v31 = vpack.c.bf16 %v1232_v5, %v1232_v5  ;;  %v2112_v27 = vunpack.c.l.b16 %v2096_v10  ;;  %v2089_v46 = vperm.slane %v1254_v6, 0  ;;  %2522 = vmatpush.bf16.msrb.mxu2 %v3435_v53  ;;  %v1969_v19 = vpop.f32.mrf.mxu0 }
 0x151   : > { %v1196_v61 = vadd.f32 %v1195_v17, %v1194_v21  ;;  %v1256_v58 = vpack.c.bf16 %v1190_v57, %v1190_v57  ;;  %v1198_v38 = vadd.f32 %v1197_v0, %v1146_v18  ;;  %v2118_v7 = vsel %vm1674_vm1, %v2103_v20, %v2102_v51  ;;  %2492 = vmatpush.bf16.msrb.mxu0 %v3421_v36 }
 0x152   : > { %v2125_v8 = vsel %vm1674_vm1, %v2111_v35, %v2110_v13  ;;  %v2090_v62 = vperm.slane %v1255_v9, 0  ;;  %v1265_v29 = vpack.c.bf16 %v1244_v56, %v1244_v56  ;;  %v2113_v15 = vunpack.c.l.b16 %v2097_v52  ;;  %2536 = vmatpush.bf16.msrb.mxu3 %v3443_v26  ;;  %v3663_v9 = vld [vmem:[%s5211_s6] ss:$0 sm:$0xff] }
 0x153   : > { %v1250_v33 = vadd.f32 %v1249_v12, %v1248_v30  ;;  %v2099_v28 = vperm.slane %v1264_v47, 0  ;;  %v1199_v40 = vrot.slane %v1198_v38, 2  ;;  %v2104_v50 = vunpack.c.l.b16 %v2088_v34  ;;  %v3418_v52 = vld [vmem:[#allocation10 + $0x40] sm:$0xff] }
 0x154   : > { %v2098_v16 = vperm.slane %v1263_v31, 0  ;;  %v2126_v11 = vsel %vm1676_vm2, %v2112_v27, %v2125_v8  ;;  %v2105_v37 = vunpack.c.l.b16 %v2089_v46  ;;  %v2091_v24 = vperm.slane %v1256_v58, 0  ;;  %2523 = vmatpush.bf16.msrb.mxu2 %v3434_v48  ;;  %v1997_v31 = vpop.f32.mrf.mxu2  ;;  %v3465_v48 = vld [vmem:[%s5345_s20 + $0x38] sm:$0xff] }
 0x155   : > { %v1200_v39 = vadd.f32 %v1199_v40, %v1198_v38  ;;  %v1257_v4 = vpack.c.bf16 %v1196_v61, %v1196_v61  ;;  %v2106_v49 = vunpack.c.l.b16 %v2090_v62  ;;  %v2100_v21 = vperm.slane %v1265_v29, 0  ;;  %2493 = vmatpush.bf16.msrb.mxu0 %v3420_v25  ;;  %2707 = vmatpush.bf16.msra.mxu1 %v3465_v48 }
 0x156   : > { %v2119_v23 = vsel %vm1676_vm2, %v2104_v50, %v2118_v7  ;;  %v1266_v60 = vpack.c.bf16 %v1250_v33, %v1250_v33  ;;  %v2115_v1 = vunpack.c.l.b16 %v2099_v28  ;;  %v2127_v30 = vsel %vm1678_vm3, %v2113_v15, %v2126_v11  ;;  %2537 = vmatpush.bf16.msrb.mxu3 %v3442_v59  ;;  %v3457_v50 = vld [vmem:[%s5214_s9 + $0x38] sm:$0xff]  ;;  %v3455_v11 = vld [vmem:[%s5214_s9 + $0x28] sm:$0xff] }
 0x157   : > { %v1201_v41 = vrot.slane %v1200_v39, 1  ;;  %v2114_v22 = vunpack.c.l.b16 %v2098_v16  ;;  %v3134_v55 = vor.u32 %v3409_v44, %v3133_v54  ;;  %v2107_v6 = vunpack.c.l.b16 %v2091_v24  ;;  %v3456_v16 = vld [vmem:[%s5214_s9 + $0x30] sm:$0xff]  ;;  %v3451_v54 = vld [vmem:[%s5214_s9 + $0x8] sm:$0xff]  ;;  %v3462_v44 = vld [vmem:[%s5345_s20 + $0x20] sm:$0xff] }
 0x158   : > { %v3138_v10 = vor.u32 %v3408_v63, %v3135_v14  ;;  %v2120_v2 = vsel %vm1678_vm3, %v2105_v37, %v2119_v23  ;;  %v2092_v51 = vperm.slane %v1257_v4, 0  ;;  %v2116_v17 = vunpack.c.l.b16 %v2100_v21  ;;  %v1971_v3 = vpop.f32.mrf.mxu0  ;;  %v3454_v37 = vld [vmem:[%s5214_s9 + $0x20] sm:$0xff]  ;;  %v3452_v4 = vld [vmem:[%s5214_s9 + $0x10] sm:$0xff] }
 0x159   : > { %v1202_v5 = vadd.f32 %v1201_v41, %v1200_v39  ;;  %2524 = vmatmul.bf16.vlgmr.msrb.gmra.mxu2 %v3134_v55  ;;  %v2121_v57 = vsel %vm1680_vm4, %v2106_v49, %v2120_v2  ;;  %v2128_v18 = vsel %vm1680_vm4, %v2114_v22, %v2127_v30  ;;  %v2101_v42 = vperm.slane %v1266_v60, 0  ;;  %2494 = vmatpush.bf16.msrb.mxu0 %v3419_v32  ;;  %v3453_v39 = vld [vmem:[%s5214_s9 + $0x18] sm:$0xff]  ;;  %v3664_v49 = vld [vmem:[%s5346_s28] ss:$0 sm:$0xff]  ;;  %v3464_v21 = vld [vmem:[%s5345_s20 + $0x30] sm:$0xff]  ;;  %s3865_s28 = sshra.s32 %s2804_s29, 4  ;;  %s3866_s28 = int_to_ptr.hbm [resolvable:$true] %s3865_s28 }
 0x15a   : > { %v2129_v13 = vsel %vm1682_vm5, %v2115_v1, %v2128_v18  ;;  %2538 = vmatmul.bf16.vlgmr.msrb.gmra.mxu3 %v3138_v10  ;;  %v2122_v12 = vsel %vm1682_vm5, %v2107_v6, %v2121_v57  ;;  %v2108_v47 = vunpack.c.l.b16 %v2092_v51  ;;  %v1970_v20 = vadd.f32 %v3663_v9, %v1969_v19  ;;  %2708 = vmatpush.bf16.msra.mxu1 %v3464_v21  ;;  %v3463_v60 = vld [vmem:[%s5345_s20 + $0x28] sm:$0xff]  ;;  %v3450_v41 = vld [vmem:[%s5214_s9] sm:$0xff]  ;;  %s3867_s30 = scalar_lea.hbm %s3866_s28, 8  ;;  %p3872_p11 = scmp.lt.s32.totalorder %s3866_s28, %s5350_s8 }
 0x15b   : > { %v1258_v35 = vpack.c.bf16 %v1202_v5, %v1202_v5  ;;  %v2130_v0 = vsel %vm1684_vm6, %v2116_v17, %v2129_v13  ;;  %v2117_v43 = vunpack.c.l.b16 %v2101_v42  ;;  %v1972_v7 = vadd.f32 %v3663_v9, %v1971_v3  ;;  %v3466_v3 = vld [vmem:[#allocation11] sm:$0xff]  ;;  %p3868_p3 = scmp.ne.s32.totalorder %s3866_s28, %s3867_s30  ;;  %p3873_p10 = scmp.lt.s32.totalorder %s3871_s25, %s3867_s30 }
 0x15c   : > { %v2123_v34 = vsel %vm1684_vm6, %v2108_v47, %v2122_v12  ;;  %v1999_v62 = vpop.f32.mrf.mxu2  ;;  %v3461_v12 = vld [vmem:[%s5345_s20 + $0x18] sm:$0xff]  ;;  %v3460_v47 = vld [vmem:[%s5345_s20 + $0x10] sm:$0xff]  ;;  %vm2744_vm1 = vcmask 261120  }
 0x15d   : > { %v2093_v56 = vperm.slane %v1258_v35, 0  ;;  %2495 = vmatpush.bf16.msrb.mxu0 %v3418_v52  ;;  %v2131_v46 = vsel %vm1686_vm7, %v2117_v43, %v2130_v0  ;;  %v3459_v0 = vld [vmem:[%s5345_s20 + $0x8] sm:$0xff]  ;;  %p3869_p1 = pnand %p3868_p3, %p4133_p5  ;;  %p3874_p12 = por %p3873_p10, %p3872_p11 }
 0x15e   : > { %2709 = vmatpush.bf16.msra.mxu1 %v3463_v60  ;;  %v3467_v43 = vld [vmem:[#allocation11 + $0x8] sm:$0xff] }
 0x15f   : > { %v2109_v45 = vunpack.c.l.b16 %v2093_v56  ;;  %2754 = vmatpush.bf16.msra.mxu2 %v3467_v43  ;;  %p3870_p2 = pneg %p3869_p1 }
 0x161   : > { %v2124_v27 = vsel %vm1686_vm7, %v2109_v45, %v2123_v34  ;;  %2622 = vmatpush.bf16.msra.mxu0 %v3457_v50  ;;  %v3458_v45 = vld [vmem:[%s5345_s20] sm:$0xff]  ;;  %p3875_p13 = pnand %p3874_p12, %p3870_p2 }
 0x162   : > { %v2132_v61 = vpack.c.b16 %v2131_v46, %v2124_v27  ;;  %2710 = vmatpush.bf16.msra.mxu1 %v3462_v44  ;;  %v3665_v34 = vld [vmem:[%s5347_s12] ss:$0 sm:$0xff] }
 0x163   : > { %2755 = vmatpush.bf16.msra.mxu2 %v3466_v3 }
 0x164   : > { %2496 = vmatmul.bf16.vlgmr.msrb.gmra.mxu0 %v2132_v61 }
 0x165   : > { %2623 = vmatpush.bf16.msra.mxu0 %v3456_v16 }
 0x166   : > { %2711 = vmatpush.bf16.msra.mxu1 %v3461_v12 }
 0x169   : > { %2624 = vmatpush.bf16.msra.mxu0 %v3455_v11 }
 0x16a   : > { %2712 = vmatpush.bf16.msra.mxu1 %v3460_v47 }
 0x16d   : > { %2625 = vmatpush.bf16.msra.mxu0 %v3454_v37 }
 0x16e   : > { %2713 = vmatpush.bf16.msra.mxu1 %v3459_v0 }
 0x171   : > { %2626 = vmatpush.bf16.msra.mxu0 %v3453_v39 }
 0x172   : > { %2714 = vmatpush.bf16.msra.mxu1 %v3458_v45 }
 0x174   : > { %v1983_v58 = vpop.f32.mrf.mxu1 }
 0x175   : > { %v1984_v38 = vadd.f32 %v1983_v58, %v1970_v20  ;;  %2627 = vmatpush.bf16.msra.mxu0 %v3452_v4 }
 0x177   : > { %v1998_v53 = vadd.f32 %v1997_v31, %v1984_v38 }
 0x179   : > { %v2002_v29 = vpack.c.bf16 %v1998_v53, %v1998_v53  ;;  %2628 = vmatpush.bf16.msra.mxu0 %v3451_v54 }
 0x17b   : > { %v2136_v28 = vunpack.c.l.b16 %v2002_v29 }
 0x17c   : > { %v1985_v8 = vpop.f32.mrf.mxu1 }
 0x17d   : > { %v1986_v15 = vadd.f32 %v1985_v8, %v1972_v7  ;;  %2629 = vmatpush.bf16.msra.mxu0 %v3450_v41  ;;  %v3666_v7 = vld [vmem:[%s5348_s18] ss:$0 sm:$0xff] }
 0x17f   : > { %v2000_v33 = vadd.f32 %v1999_v62, %v1986_v15 }
 0x181   : > { %v2003_v40 = vpack.c.bf16 %v2000_v33, %v2000_v33 }
 0x183   : > { %v2137_v36 = vunpack.c.l.b16 %v2003_v40 }
 0x185   : > { %v2138_v26 = vpack.c.b16 %v2137_v36, %v2136_v28 }
 0x187   : > { %2510 = vmatmul.bf16.vlgmr.msrb.gmra.mxu1 %v2138_v26 }
 0x1c5   : > { %v2483_v24 = vpop.f32.mrf.mxu3 }
 0x1c6   : > { %v2484_v23 = vadd.f32 %v3664_v49, %v2483_v24 }
 0x1cd   : > { %v2485_v59 = vpop.f32.mrf.mxu3 }
 0x1ce   : > { %v2486_v6 = vadd.f32 %v3664_v49, %v2485_v59 }
 0x1dc   : > { %v2525_v30 = vpop.f32.mrf.mxu2 }
 0x1dd   : > { %v2539_v55 = vpop.f32.mrf.mxu3 }
 0x1e1   : > { %v2497_v25 = vpop.f32.mrf.mxu0 }
 0x1e2   : > { %v2498_v1 = vadd.f32 %v2497_v25, %v2484_v23 }
 0x1e4   : > { %v2527_v17 = vpop.f32.mrf.mxu2 }
 0x1e5   : > { %v2541_v18 = vpop.f32.mrf.mxu3 }
 0x1e9   : > { %v2499_v14 = vpop.f32.mrf.mxu0 }
 0x1ea   : > { %v2500_v10 = vadd.f32 %v2499_v14, %v2486_v6 }
 0x204   : > { %v2511_v63 = vpop.f32.mrf.mxu1 }
 0x205   : > { %v2512_v22 = vadd.f32 %v2511_v63, %v2498_v1 }
 0x207   : > { %v2526_v5 = vadd.f32 %v2525_v30, %v2512_v22 }
 0x209   : > { %v2540_v2 = vadd.f32 %v2539_v55, %v2526_v5 }
 0x20b   : > { %v2544_v42 = vpack.c.bf16 %v2540_v2, %v2540_v2 }
 0x20c   : > { %v2513_v32 = vpop.f32.mrf.mxu1 }
 0x20d   : > { %v2514_v51 = vadd.f32 %v2513_v32, %v2500_v10  ;;  %v2570_v9 = vunpack.c.l.b16 %v2544_v42 }
 0x20f   : > { %v2528_v57 = vadd.f32 %v2527_v17, %v2514_v51 }
 0x211   : > { %v2542_v19 = vadd.f32 %v2541_v18, %v2528_v57 }
 0x213   : > { %v2545_v35 = vpack.c.bf16 %v2542_v19, %v2542_v19  ;;  %v3537_v13 = vpack.c.bf16 %v2542_v19, %v2540_v2 }
 0x215   : > { %v2571_v56 = vunpack.c.l.b16 %v2545_v35  ;;  %3538 = vst [vmem:[%s5126_s21] sm:$0xff] %v3537_v13  }
 0x217   : > { %v2572_v52 = vpack.c.b16 %v2571_v56, %v2570_v9 }
 0x219   : > { %2630 = vmatmul.bf16.vlgmr.msra.gmra.mxu0 %v2572_v52 }
 0x296   : > { %v2631_v20 = vpop.f32.mrf.mxu0 }
 0x297   : > { %v2632_v31 = vadd.f32 %v3665_v34, %v2631_v20 }
 0x299   : > { %v2636_v61 = vmax.f32 %v2632_v31, 0.0 }
 0x29e   : > { %v2633_v27 = vpop.f32.mrf.mxu0 }
 0x29f   : > { %v2634_v46 = vadd.f32 %v3665_v34, %v2633_v27 }
 0x2a1   : > { %v2637_v58 = vmax.f32 %v2634_v46, 0.0 }
 0x2a3   : > { %v2638_v38 = vpack.c.bf16 %v2637_v58, %v2636_v61 }
 0x2a5   : > { %2715 = vmatmul.bf16.vlgmr.msra.gmra.mxu1 %v2638_v38 }
 0x322   : > { %v2716_v53 = vpop.f32.mrf.mxu1 }
 0x323   : > { %v2717_v8 = vadd.f32 %v3666_v7, %v2716_v53 }
 0x325   : > { %v2721_v15 = vmax.f32 %v2717_v8, 0.0 }
 0x32a   : > { %v2718_v62 = vpop.f32.mrf.mxu1 }
 0x32b   : > { %v2719_v29 = vadd.f32 %v3666_v7, %v2718_v62 }
 0x32d   : > { %v2722_v33 = vmax.f32 %v2719_v29, 0.0 }
 0x32f   : > { %v2723_v28 = vpack.c.bf16 %v2722_v33, %v2721_v15 }
 0x331   : > { %3371 = vmatmul.msk.bf16.vlgmr.msra.gmra.mxu2 %vm2744_vm1, %v2723_v28 }
 0x332   : > { %3878 = shalt.err (!%p3875_p13)
}
 0x333   : > { %s3971_s21 = smov 64   ;;  %s3972_s2 = smov 4  }
 0x334   : > { %3577 = dma.vmem_to_hbm [thread:$0]  (%p4133_p5), %s2802_s24, 128, %s2804_s29, %s2772_s26, %s3971_s21, %s3971_s21, %s3972_s2  }
 0x335   : > { %s5351_s27 = sld [smem:[#allocation37_spill]]  ;;  %s710_s11 = scalar_lea.vmem [#allocation13], %s3028_s15 }
 0x336   : > { %s5352_s30 = sld [smem:[#allocation38_spill]]  ;;  %s2784_s25 = sshll.u32 %s710_s11, 4  ;;  %s2785_s25 = int_to_ptr.vmem [resolvable:$true] %s2784_s25 }
 0x337   : > { %s2767_s24 = scalar_lea.sflag [#allocation4], %s4234_s14 }
 0x33b   : > { %v3667_v36 = vld [vmem:[%s5351_s27] ss:$0 sm:$0xff] }
 0x33c   : > { %s2783_s5 = scalar_lea.hbm %s5352_s30, %s3468_s17  ;;  %s3899_s15 = scalar_lea.hbm %s5352_s30, 32 }
 0x33d   : > { %s2786_s12 = sshll.u32 %s2783_s5, 4  ;;  %s2787_s12 = int_to_ptr.hbm [resolvable:$true] %s2786_s12 }
 0x33e   : > { %s3893_s29 = sshra.s32 %s2787_s12, 4  ;;  %s3894_s29 = int_to_ptr.hbm [resolvable:$true] %s3893_s29 }
 0x33f   : > { %s3895_s26 = scalar_lea.hbm %s3894_s29, 8  ;;  %p3900_p0 = scmp.lt.s32.totalorder %s3894_s29, %s5352_s30 }
 0x340   : > { %p3896_p8 = scmp.ne.s32.totalorder %s3894_s29, %s3895_s26  ;;  %p3901_p4 = scmp.lt.s32.totalorder %s3899_s15, %s3895_s26 }
 0x342   : > { %p3897_p7 = pnand %p3896_p8, %p4133_p5  ;;  %p3902_p3 = por %p3901_p4, %p3900_p0 }
 0x344   : > { %p3898_p9 = pneg %p3897_p7 }
 0x346   : > { %p3903_p1 = pnand %p3902_p3, %p3898_p9 }
 0x3b4   : > { %v2757_v40 = vpop.f32.mrf.mxu2 }
 0x3b5   : > { %v2758_v50 = vadd.f32 %v3667_v36, %v2757_v40 }
 0x3bc   : > { %v2759_v26 = vpop.f32.mrf.mxu2 }
 0x3bd   : > { %v2760_v16 = vadd.f32 %v3667_v36, %v2759_v26 }
 0x3bf   : > { %v3542_v11 = vpack.c.bf16 %v2760_v16, %v2758_v50 }
 0x3c1   : > { %3543 = vst [vmem:[%s710_s11] sm:$0xff] %v3542_v11  }
 0x3c2   : > { %3906 = shalt.err (!%p3903_p1)
}
 0x3c3   : > { %3576 = dma.vmem_to_hbm [thread:$0]  (%p4133_p5), %s2785_s25, 128, %s2787_s12, %s2767_s24, %s3971_s21, %s3971_s21, %s3972_s2  }
 0x3c4 PF: > { %s5353_s14 = sld [smem:[#allocation23_spill]] }
 0x3c5   : > { %s5354_s27 = sld [smem:[#allocation22_spill]] }
 0x3ca   : > { %p3614_p2 = scmp.ge.s32.totalorder %s5353_s14, 2 }
 0x3cb   : > { %s2818_s28 = sand.u32 1, %s5354_s27  }
 0x3cc   : > { %p3601_p11 = pnand %p3614_p2, %p4093_p6  ;;  %s2819_s5 = scalar_lea.sflag [#allocation4], %s2818_s28 }
 0x3ce   : > { %p3602_p10 = pneg %p3601_p11 }
 0x3d0   : > { %3940 = dma.done.wait (%p3602_p10), %s2819_s5, 128  }
 0x3d1   : > { %3942 = vsyncadd (%p3602_p10), %s2819_s5, 4294967168  ;;  %s2829_s11 = scalar_lea.sflag [#allocation15], %s2818_s28 }
 0x3d2   : > { %3944 = dma.done.wait (%p3602_p10), %s2829_s11, 128  }
 0x3d3   : > { %3946 = vsyncadd (%p3602_p10), %s2829_s11, 4294967168  ;;  %s5356_s24 = sld [smem:[#allocation25_spill]]  ;;  %s5358_s21 = smov %s3953_s22 }
 0x3d4   : > { %s5357_s10 = sld [smem:[#allocation26_spill]]  ;;  %s5359_s22 = smov %s3957_s23 }
 0x3d9   : > { %p38_p5 = scmp.ge.s32.totalorder %s5356_s24, 6  }
 0x3da   : > { %s5360_s23 = smov %s5357_s10 }
 0x3db   :  { %40 = sbr.rel (!%p38_p5) target bundleno = 22 (0x16), region = 184 }
 0x3e0   :  { %2835 = vsyncpa [#allocation3], 1 }
 0x3e1   :  { %2837 = vsyncpa [#allocation3 + $0x1], 1 }
 0x3e2   :  { %2838 = vsyncpa [#allocation6], 1 }
 0x3e3   :  { %2840 = vsyncpa [#allocation6 + $0x1], 1 }
 0x3e4   :  { %2841 = vsyncpa [#allocation9], 1 }
 0x3e5   :  { %2842 = vsyncpa [#allocation12], 1 }
 0x3e6   :  { %2843 = vsyncpa [#allocation4], 1 }
 0x3e7   :  { %2845 = vsyncpa [#allocation4 + $0x1], 1 }
 0x3e8   :  { %2846 = vsyncpa [#allocation15], 1 }
 0x3e9   :  { %2848 = vsyncpa [#allocation15 + $0x1], 1 }

</bundles_post_ra>
